<compile_context>
chip_gen: v7x
topology: tpu7x:2x2x1
jax: 0.10.0
libtpu: 0.0.40
codegen_flags: <defaults>
</compile_context>

<pallas_src>
import functools

import jax
import jax.numpy as jnp
import numpy as np
from jax import lax
from jax.experimental import pallas as pl
from jax.experimental.pallas import tpu as pltpu

EPS = 1e-5


# ------------------------------- fused kernel --------------------------------

def _zero_halo(buf):
    """Zero only the 1-pixel border of a (H+2, W+2, C) scratch buffer."""
    Hp, Wp, C = buf.shape
    dt = buf.dtype
    buf[0:1, :, :] = jnp.zeros((1, Wp, C), dt)
    buf[Hp - 1:Hp, :, :] = jnp.zeros((1, Wp, C), dt)
    buf[:, 0:1, :] = jnp.zeros((Hp, 1, C), dt)
    buf[:, Wp - 1:Wp, :] = jnp.zeros((Hp, 1, C), dt)


def _basic_block_kernel(x_ref, w1_ref, b1_ref, w2_ref, b2_ref, *rest, has_proj):
    if has_proj:
        ws_ref, bs_ref, out_ref, xpad, midpad = rest
    else:
        out_ref, xpad, midpad = rest

    _, H, W, Cin = x_ref.shape
    Co = w2_ref.shape[-1]
    cdt = xpad.dtype                       # matmul operand dtype (bf16 by default)

    x = x_ref[0]                           # (H, W, Cin), f32

    # ---- refresh only the zero halo; interiors are fully overwritten below ----
    _zero_halo(xpad)
    _zero_halo(midpad)

    xpad[1:H + 1, 1:W + 1, :] = x.astype(cdt)

    def conv3x3(padded_ref, w_ref, cin):
        # 3 accumulating matmuls over kh, each with K = 3*cin (one 3-tap concat per kh),
        # f32 accumulation on the MXU.
        # TODO(synk): on v7x accumulate per-tap matmuls directly (MRB in-place accumulate)
        # and drop the concat entirely.
        acc = None
        for kh in range(3):
            taps = [padded_ref[kh:kh + H, kw:kw + W, :] for kw in range(3)]
            p = jnp.concatenate(taps, axis=-1).reshape(H * W, 3 * cin)
            c = jnp.dot(p, w_ref[kh], preferred_element_type=jnp.float32)
            acc = c if acc is None else acc + c
        return acc                          # (H*W, Co), f32

    # ---- conv1 (BN scale folded into w1) + bias + ReLU -------------------------
    mid = jnp.maximum(conv3x3(xpad, w1_ref, Cin) + b1_ref[...], 0.0)

    # ---- keep mid in VMEM (bf16), build its zero-haloed copy for conv2 ---------
    midpad[1:H + 1, 1:W + 1, :] = mid.reshape(H, W, Co).astype(cdt)

    # ---- conv2 (BN scale folded into w2) + bias --------------------------------
    y = conv3x3(midpad, w2_ref, Co) + b2_ref[...]

    # ---- shortcut fused in the same tile ----------------------------------------
    # TODO(synk): optionally fuse the 1x1 projection into conv1's matmul as extra output
    # columns (center-tap rows of K) to improve MXU column fill on v6e/v7x.
    if has_proj:
        sc = jnp.dot(x.reshape(H * W, Cin).astype(ws_ref.dtype), ws_ref[...],
                     preferred_element_type=jnp.float32) + bs_ref[...]
    else:
        sc = x.reshape(H * W, Cin)          # Cin == Co here (f32)

    res = jnp.maximum(y + sc, 0.0)          # (H*W, Co), f32
    # Lane-dense store: (Co, H*W) block has H*W (multiple of 128) on the lane axis,
    # and is already the NCHW layout the wrapper needs.
    out_ref[0] = res.T.astype(out_ref.dtype)


# ------------------------------ parameter prep -------------------------------

def _fold_bn(bn):
    gamma, beta, mean, var = bn
    scale = gamma / jnp.sqrt(var + EPS)
    bias = beta - mean * scale
    return scale, bias


def _prep_conv3x3(w_oihw, bn, compute_dtype):
    scale, bias = _fold_bn(bn)
    w = jnp.transpose(w_oihw, (2, 3, 1, 0)) * scale          # (3, 3, Cin, Co) * scale[Co]
    kh, kw, cin, co = w.shape
    w = w.reshape(kh, kw * cin, co).astype(compute_dtype)     # (3, 3*Cin, Co), per-kh slabs
    return w, bias.reshape(1, co).astype(jnp.float32)


def _prep_conv1x1(w_oihw, bn, compute_dtype):
    scale, bias = _fold_bn(bn)
    w = (jnp.transpose(w_oihw, (2, 3, 1, 0))[0, 0] * scale).astype(compute_dtype)  # (Cin, Co)
    return w, bias.reshape(1, -1).astype(jnp.float32)


# ------------------------------ forward wrapper -------------------------------

def basic_block_forward(x_nchw, params, stride=1, compute_dtype=jnp.bfloat16):
    """BasicBlock forward. Input/output NCHW (PyTorch convention)."""
    # TODO(synk): stride>1 downsampling path (strided conv + strided shortcut) not implemented.
    assert stride == 1, "stride>1 not implemented in the Pallas kernel"
    # TODO(synk): in a full ResNet keep activations NHWC end-to-end instead of this boundary transpose.
    x = jnp.transpose(x_nchw, (0, 2, 3, 1)).astype(jnp.float32)   # NCHW -> NHWC
    N, H, W, Cin = x.shape

    w1, b1 = _prep_conv3x3(params["conv1_w"], params["bn1"], compute_dtype)
    w2, b2 = _prep_conv3x3(params["conv2_w"], params["bn2"], compute_dtype)
    Co = w1.shape[-1]
    has_proj = (stride != 1) or (Cin != Co)

    args = [x, w1, b1, w2, b2]
    in_specs = [
        pl.BlockSpec((1, H, W, Cin), lambda n: (n, 0, 0, 0)),
        pl.BlockSpec(w1.shape, lambda n: (0, 0, 0)),
        pl.BlockSpec(b1.shape, lambda n: (0, 0)),
        pl.BlockSpec(w2.shape, lambda n: (0, 0, 0)),
        pl.BlockSpec(b2.shape, lambda n: (0, 0)),
    ]
    if has_proj:
        ws, bs = _prep_conv1x1(params["short_w"], params["short_bn"], compute_dtype)
        args += [ws, bs]
        in_specs += [pl.BlockSpec(ws.shape, lambda n: (0, 0)),
                     pl.BlockSpec(bs.shape, lambda n: (0, 0))]

    kernel = functools.partial(_basic_block_kernel, has_proj=has_proj)

    # TODO(synk): for large spatial extents (v7x: 64 MiB VMEM) add an H-tile grid axis with a
    # 2-row halo and mark it "parallel" alongside N so the second TensorCore is used.
    out = pl.pallas_call(
        kernel,
        out_shape=jax.ShapeDtypeStruct((N, Co, H * W), jnp.float32),
        grid_spec=pltpu.PrefetchScalarGridSpec(
            num_scalar_prefetch=0,
            grid=(N,),
            in_specs=in_specs,
            out_specs=pl.BlockSpec((1, Co, H * W), lambda n: (n, 0, 0)),
            scratch_shapes=[
                pltpu.VMEM((H + 2, W + 2, Cin), compute_dtype),   # zero-haloed x
                pltpu.VMEM((H + 2, W + 2, Co), compute_dtype),    # zero-haloed mid
            ]),
        compiler_params=pltpu.CompilerParams(
            dimension_semantics=("parallel",),
            # v5e/v6e have 128 MiB physical VMEM (push higher there); v7x has 64 MiB.
            vmem_limit_bytes=64 * 1024 * 1024),
    )(*args)

    return out.reshape(N, Co, H, W)        # already NCHW; reshape is a free metadata op


# ------------------------------ plain-JAX reference ---------------------------

def _ref_conv(x, w, stride, pad):
    return lax.conv_general_dilated(
        x, w, (stride, stride), [(pad, pad), (pad, pad)],
        dimension_numbers=("NCHW", "OIHW", "NCHW"))


def _ref_bn(x, bn):
    gamma, beta, mean, var = bn
    inv = gamma / jnp.sqrt(var + EPS)
    return (x - mean[None, :, None, None]) * inv[None, :, None, None] + beta[None, :, None, None]


def basic_block_reference(x, params, stride=1):
    out = jax.nn.relu(_ref_bn(_ref_conv(x, params["conv1_w"], stride, 1), params["bn1"]))
    out = _ref_bn(_ref_conv(out, params["conv2_w"], 1, 1), params["bn2"])
    in_planes, planes = x.shape[1], params["conv1_w"].shape[0]
    if stride != 1 or in_planes != planes:
        short = _ref_bn(_ref_conv(x, params["short_w"], stride, 0), params["short_bn"])
    else:
        short = x
    return jax.nn.relu(out + short)


# ----------------------------------- main -------------------------------------

if __name__ == "__main__":
    key = jax.random.PRNGKey(0)
    N, H, W = 2, 16, 16   # NOTE: real ResNet channel counts (>=64) use the lanes properly;
                          # tiny C here is only for the correctness demo.

    def make_params(keys, in_planes, planes):
        ar = lambda c, s, o: jnp.asarray(np.arange(c, dtype=np.float32) * s + o)
        p = {
            "conv1_w": jax.random.normal(keys[0], (planes, in_planes, 3, 3), jnp.float32) * 0.2,
            "conv2_w": jax.random.normal(keys[1], (planes, planes, 3, 3), jnp.float32) * 0.2,
            # (gamma, beta, running_mean, running_var) — deterministic, non-trivial
            "bn1": (1.0 + ar(planes, 0.10, 0.0), ar(planes, 0.05, -0.1),
                    ar(planes, 0.02, -0.03), 1.0 + ar(planes, 0.07, 0.0)),
            "bn2": (1.0 + ar(planes, 0.08, 0.0), ar(planes, 0.03, 0.02),
                    ar(planes, -0.01, 0.04), 1.0 + ar(planes, 0.05, 0.0)),
        }
        if in_planes != planes:
            p["short_w"] = jax.random.normal(keys[2], (planes, in_planes, 1, 1), jnp.float32) * 0.2
            p["short_bn"] = (1.0 + ar(planes, 0.06, 0.0), ar(planes, 0.02, 0.0),
                             ar(planes, 0.01, -0.02), 1.0 + ar(planes, 0.03, 0.0))
        return p

    def max_rel_err(out, ref):
        out = np.asarray(out, np.float32)
        ref = np.asarray(ref, np.float32)
        scale = max(float(np.abs(ref).max()), 1.0)
        return float(np.abs(out - ref).max()) / scale

    ks = jax.random.split(key, 8)

    # 1) identity-shortcut config: in_planes == planes == 4
    x1 = jax.random.normal(ks[0], (N, 4, H, W), jnp.float32)
    p1 = make_params(ks[1:4], 4, 4)
    ref1 = jax.block_until_ready(basic_block_reference(x1, p1, stride=1))

    out1_f32 = jax.block_until_ready(basic_block_forward(x1, p1, compute_dtype=jnp.float32))
    assert out1_f32.shape == ref1.shape
    assert max_rel_err(out1_f32, ref1) < 3e-2, max_rel_err(out1_f32, ref1)

    out1_bf16 = jax.block_until_ready(basic_block_forward(x1, p1))   # bf16 operands (default)
    assert max_rel_err(out1_bf16, ref1) < 8e-2, max_rel_err(out1_bf16, ref1)

    # 2) projection-shortcut config: in_planes=4 -> planes=8 (channel change)
    x2 = jax.random.normal(ks[4], (N, 4, H, W), jnp.float32)
    p2 = make_params(ks[5:8], 4, 8)
    ref2 = jax.block_until_ready(basic_block_reference(x2, p2, stride=1))

    out2_f32 = jax.block_until_ready(basic_block_forward(x2, p2, compute_dtype=jnp.float32))
    assert out2_f32.shape == ref2.shape
    assert max_rel_err(out2_f32, ref2) < 3e-2, max_rel_err(out2_f32, ref2)

    out2_bf16 = jax.block_until_ready(basic_block_forward(x2, p2))
    assert max_rel_err(out2_bf16, ref2) < 8e-2, max_rel_err(out2_bf16, ref2)

    print("KERNEL_OK")
</pallas_src>

<mosaic_0001>
module attributes {stable_mosaic.version = 11 : i64} {
  func.func @_basic_block_kernel(%arg0: i32, %arg1: memref<1x16x16x4xf32, #tpu.memory_space<vmem>>, %arg2: memref<3x12x4xf32, #tpu.memory_space<vmem>>, %arg3: memref<1x4xf32, #tpu.memory_space<vmem>>, %arg4: memref<3x12x4xf32, #tpu.memory_space<vmem>>, %arg5: memref<1x4xf32, #tpu.memory_space<vmem>>, %arg6: memref<1x4x256xf32, #tpu.memory_space<vmem>>, %arg7: memref<18x18x4xf32, #tpu.memory_space<vmem>>, %arg8: memref<18x18x4xf32, #tpu.memory_space<vmem>>) attributes {dimension_semantics = [#tpu.dimension_semantics<parallel>], iteration_bounds = array<i64: 2>, scalar_prefetch = 0 : i64, scratch_operands = 2 : i64, tpu.core_type = #tpu.core_type<tc>, window_params = [{transform_indices = @transform_0, window_bounds = array<i64: 1, 16, 16, 4>}, {pipeline_mode = #tpu.pipeline_mode<synchronous>, transform_indices = @transform_1, window_bounds = array<i64: 3, 12, 4>}, {pipeline_mode = #tpu.pipeline_mode<synchronous>, transform_indices = @transform_2, window_bounds = array<i64: 1, 4>}, {pipeline_mode = #tpu.pipeline_mode<synchronous>, transform_indices = @transform_3, window_bounds = array<i64: 3, 12, 4>}, {pipeline_mode = #tpu.pipeline_mode<synchronous>, transform_indices = @transform_4, window_bounds = array<i64: 1, 4>}, {transform_indices = @transform_5, window_bounds = array<i64: 1, 4, 256>}]} {
    %c0 = arith.constant 0 : index
    %c0_0 = arith.constant 0 : index
    %c0_1 = arith.constant 0 : index
    %c0_2 = arith.constant 0 : index
    %0 = vector.load %arg1[%c0, %c0_0, %c0_1, %c0_2] : memref<1x16x16x4xf32, #tpu.memory_space<vmem>>, vector<1x16x16x4xf32>
    %1 = vector.shape_cast %0 : vector<1x16x16x4xf32> to vector<16x16x4xf32>
    %cst = arith.constant 0.000000e+00 : f32
    %2 = vector.broadcast %cst : f32 to vector<1x18x4xf32>
    %c0_3 = arith.constant 0 : index
    %c0_4 = arith.constant 0 : index
    %c0_5 = arith.constant 0 : index
    %3 = vector.load %arg7[%c0_3, %c0_4, %c0_5] : memref<18x18x4xf32, #tpu.memory_space<vmem>>, vector<1x18x4xf32>
    tpu.vector_store %arg7[%c0_3, %c0_4, %c0_5], %2 {strides = array<i32>} : memref<18x18x4xf32, #tpu.memory_space<vmem>>, vector<1x18x4xf32>,
    %cst_6 = arith.constant 0.000000e+00 : f32
    %4 = vector.broadcast %cst_6 : f32 to vector<1x18x4xf32>
    %c17 = arith.constant 17 : index
    %c0_7 = arith.constant 0 : index
    %c0_8 = arith.constant 0 : index
    %5 = vector.load %arg7[%c17, %c0_7, %c0_8] : memref<18x18x4xf32, #tpu.memory_space<vmem>>, vector<1x18x4xf32>
    tpu.vector_store %arg7[%c17, %c0_7, %c0_8], %4 {strides = array<i32>} : memref<18x18x4xf32, #tpu.memory_space<vmem>>, vector<1x18x4xf32>,
    %cst_9 = arith.constant 0.000000e+00 : f32
    %6 = vector.broadcast %cst_9 : f32 to vector<18x1x4xf32>
    %c0_10 = arith.constant 0 : index
    %c0_11 = arith.constant 0 : index
    %c0_12 = arith.constant 0 : index
    %7 = vector.load %arg7[%c0_10, %c0_11, %c0_12] : memref<18x18x4xf32, #tpu.memory_space<vmem>>, vector<18x1x4xf32>
    tpu.vector_store %arg7[%c0_10, %c0_11, %c0_12], %6 {strides = array<i32>} : memref<18x18x4xf32, #tpu.memory_space<vmem>>, vector<18x1x4xf32>,
    %cst_13 = arith.constant 0.000000e+00 : f32
    %8 = vector.broadcast %cst_13 : f32 to vector<18x1x4xf32>
    %c0_14 = arith.constant 0 : index
    %c17_15 = arith.constant 17 : index
    %c0_16 = arith.constant 0 : index
    %9 = vector.load %arg7[%c0_14, %c17_15, %c0_16] : memref<18x18x4xf32, #tpu.memory_space<vmem>>, vector<18x1x4xf32>
    tpu.vector_store %arg7[%c0_14, %c17_15, %c0_16], %8 {strides = array<i32>} : memref<18x18x4xf32, #tpu.memory_space<vmem>>, vector<18x1x4xf32>,
    %cst_17 = arith.constant 0.000000e+00 : f32
    %10 = vector.broadcast %cst_17 : f32 to vector<1x18x4xf32>
    %c0_18 = arith.constant 0 : index
    %c0_19 = arith.constant 0 : index
    %c0_20 = arith.constant 0 : index
    %11 = vector.load %arg8[%c0_18, %c0_19, %c0_20] : memref<18x18x4xf32, #tpu.memory_space<vmem>>, vector<1x18x4xf32>
    tpu.vector_store %arg8[%c0_18, %c0_19, %c0_20], %10 {strides = array<i32>} : memref<18x18x4xf32, #tpu.memory_space<vmem>>, vector<1x18x4xf32>,
    %cst_21 = arith.constant 0.000000e+00 : f32
    %12 = vector.broadcast %cst_21 : f32 to vector<1x18x4xf32>
    %c17_22 = arith.constant 17 : index
    %c0_23 = arith.constant 0 : index
    %c0_24 = arith.constant 0 : index
    %13 = vector.load %arg8[%c17_22, %c0_23, %c0_24] : memref<18x18x4xf32, #tpu.memory_space<vmem>>, vector<1x18x4xf32>
    tpu.vector_store %arg8[%c17_22, %c0_23, %c0_24], %12 {strides = array<i32>} : memref<18x18x4xf32, #tpu.memory_space<vmem>>, vector<1x18x4xf32>,
    %cst_25 = arith.constant 0.000000e+00 : f32
    %14 = vector.broadcast %cst_25 : f32 to vector<18x1x4xf32>
    %c0_26 = arith.constant 0 : index
    %c0_27 = arith.constant 0 : index
    %c0_28 = arith.constant 0 : index
    %15 = vector.load %arg8[%c0_26, %c0_27, %c0_28] : memref<18x18x4xf32, #tpu.memory_space<vmem>>, vector<18x1x4xf32>
    tpu.vector_store %arg8[%c0_26, %c0_27, %c0_28], %14 {strides = array<i32>} : memref<18x18x4xf32, #tpu.memory_space<vmem>>, vector<18x1x4xf32>,
    %cst_29 = arith.constant 0.000000e+00 : f32
    %16 = vector.broadcast %cst_29 : f32 to vector<18x1x4xf32>
    %c0_30 = arith.constant 0 : index
    %c17_31 = arith.constant 17 : index
    %c0_32 = arith.constant 0 : index
    %17 = vector.load %arg8[%c0_30, %c17_31, %c0_32] : memref<18x18x4xf32, #tpu.memory_space<vmem>>, vector<18x1x4xf32>
    tpu.vector_store %arg8[%c0_30, %c17_31, %c0_32], %16 {strides = array<i32>} : memref<18x18x4xf32, #tpu.memory_space<vmem>>, vector<18x1x4xf32>,
    %c1 = arith.constant 1 : index
    %c1_33 = arith.constant 1 : index
    %c0_34 = arith.constant 0 : index
    %18 = vector.load %arg7[%c1, %c1_33, %c0_34] : memref<18x18x4xf32, #tpu.memory_space<vmem>>, vector<16x16x4xf32>
    tpu.vector_store %arg7[%c1, %c1_33, %c0_34], %1 {strides = array<i32>} : memref<18x18x4xf32, #tpu.memory_space<vmem>>, vector<16x16x4xf32>,
    %c0_35 = arith.constant 0 : index
    %c0_36 = arith.constant 0 : index
    %c0_37 = arith.constant 0 : index
    %19 = vector.load %arg7[%c0_35, %c0_36, %c0_37] : memref<18x18x4xf32, #tpu.memory_space<vmem>>, vector<16x16x4xf32>
    %c0_38 = arith.constant 0 : index
    %c1_39 = arith.constant 1 : index
    %c0_40 = arith.constant 0 : index
    %20 = vector.load %arg7[%c0_38, %c1_39, %c0_40] : memref<18x18x4xf32, #tpu.memory_space<vmem>>, vector<16x16x4xf32>
    %c0_41 = arith.constant 0 : index
    %c2 = arith.constant 2 : index
    %c0_42 = arith.constant 0 : index
    %21 = vector.load %arg7[%c0_41, %c2, %c0_42] : memref<18x18x4xf32, #tpu.memory_space<vmem>>, vector<16x16x4xf32>
    %22 = tpu.concatenate %19, %20, %21 in 2 : vector<16x16x4xf32>, vector<16x16x4xf32>, vector<16x16x4xf32> -> vector<16x16x12xf32>
    %23 = vector.shape_cast %22 : vector<16x16x12xf32> to vector<256x12xf32>
    %c0_43 = arith.constant 0 : index
    %c0_44 = arith.constant 0 : index
    %c0_45 = arith.constant 0 : index
    %24 = vector.load %arg2[%c0_43, %c0_44, %c0_45] : memref<3x12x4xf32, #tpu.memory_space<vmem>>, vector<1x12x4xf32>
    %25 = vector.shape_cast %24 : vector<1x12x4xf32> to vector<12x4xf32>
    %cst_46 = arith.constant dense<0.000000e+00> : vector<256x4xf32>
    %26 = tpu.matmul %23, %25, %cst_46 {dimension_numbers = #tpu.dot_dimension_numbers<[1], [0], [0], [1], [0, 0, 1, 1], [], []>} : vector<256x12xf32>, vector<12x4xf32>, vector<256x4xf32> -> vector<256x4xf32>
    %c1_47 = arith.constant 1 : index
    %c0_48 = arith.constant 0 : index
    %c0_49 = arith.constant 0 : index
    %27 = vector.load %arg7[%c1_47, %c0_48, %c0_49] : memref<18x18x4xf32, #tpu.memory_space<vmem>>, vector<16x16x4xf32>
    %c1_50 = arith.constant 1 : index
    %c1_51 = arith.constant 1 : index
    %c0_52 = arith.constant 0 : index
    %28 = vector.load %arg7[%c1_50, %c1_51, %c0_52] : memref<18x18x4xf32, #tpu.memory_space<vmem>>, vector<16x16x4xf32>
    %c1_53 = arith.constant 1 : index
    %c2_54 = arith.constant 2 : index
    %c0_55 = arith.constant 0 : index
    %29 = vector.load %arg7[%c1_53, %c2_54, %c0_55] : memref<18x18x4xf32, #tpu.memory_space<vmem>>, vector<16x16x4xf32>
    %30 = tpu.concatenate %27, %28, %29 in 2 : vector<16x16x4xf32>, vector<16x16x4xf32>, vector<16x16x4xf32> -> vector<16x16x12xf32>
    %31 = vector.shape_cast %30 : vector<16x16x12xf32> to vector<256x12xf32>
    %c1_56 = arith.constant 1 : index
    %c0_57 = arith.constant 0 : index
    %c0_58 = arith.constant 0 : index
    %32 = vector.load %arg2[%c1_56, %c0_57, %c0_58] : memref<3x12x4xf32, #tpu.memory_space<vmem>>, vector<1x12x4xf32>
    %33 = vector.shape_cast %32 : vector<1x12x4xf32> to vector<12x4xf32>
    %cst_59 = arith.constant dense<0.000000e+00> : vector<256x4xf32>
    %34 = tpu.matmul %31, %33, %cst_59 {dimension_numbers = #tpu.dot_dimension_numbers<[1], [0], [0], [1], [0, 0, 1, 1], [], []>} : vector<256x12xf32>, vector<12x4xf32>, vector<256x4xf32> -> vector<256x4xf32>
    %35 = arith.addf %26, %34 : vector<256x4xf32>
    %c2_60 = arith.constant 2 : index
    %c0_61 = arith.constant 0 : index
    %c0_62 = arith.constant 0 : index
    %36 = vector.load %arg7[%c2_60, %c0_61, %c0_62] : memref<18x18x4xf32, #tpu.memory_space<vmem>>, vector<16x16x4xf32>
    %c2_63 = arith.constant 2 : index
    %c1_64 = arith.constant 1 : index
    %c0_65 = arith.constant 0 : index
    %37 = vector.load %arg7[%c2_63, %c1_64, %c0_65] : memref<18x18x4xf32, #tpu.memory_space<vmem>>, vector<16x16x4xf32>
    %c2_66 = arith.constant 2 : index
    %c2_67 = arith.constant 2 : index
    %c0_68 = arith.constant 0 : index
    %38 = vector.load %arg7[%c2_66, %c2_67, %c0_68] : memref<18x18x4xf32, #tpu.memory_space<vmem>>, vector<16x16x4xf32>
    %39 = tpu.concatenate %36, %37, %38 in 2 : vector<16x16x4xf32>, vector<16x16x4xf32>, vector<16x16x4xf32> -> vector<16x16x12xf32>
    %40 = vector.shape_cast %39 : vector<16x16x12xf32> to vector<256x12xf32>
    %c2_69 = arith.constant 2 : index
    %c0_70 = arith.constant 0 : index
    %c0_71 = arith.constant 0 : index
    %41 = vector.load %arg2[%c2_69, %c0_70, %c0_71] : memref<3x12x4xf32, #tpu.memory_space<vmem>>, vector<1x12x4xf32>
    %42 = vector.shape_cast %41 : vector<1x12x4xf32> to vector<12x4xf32>
    %cst_72 = arith.constant dense<0.000000e+00> : vector<256x4xf32>
    %43 = tpu.matmul %40, %42, %cst_72 {dimension_numbers = #tpu.dot_dimension_numbers<[1], [0], [0], [1], [0, 0, 1, 1], [], []>} : vector<256x12xf32>, vector<12x4xf32>, vector<256x4xf32> -> vector<256x4xf32>
    %44 = arith.addf %35, %43 : vector<256x4xf32>
    %c0_73 = arith.constant 0 : index
    %c0_74 = arith.constant 0 : index
    %45 = vector.load %arg3[%c0_73, %c0_74] : memref<1x4xf32, #tpu.memory_space<vmem>>, vector<1x4xf32>
    %46 = vector.broadcast %45 : vector<1x4xf32> to vector<256x4xf32>
    %47 = arith.addf %44, %46 : vector<256x4xf32>
    %cst_75 = arith.constant 0.000000e+00 : f32
    %48 = vector.broadcast %cst_75 : f32 to vector<256x4xf32>
    %49 = arith.maximumf %47, %48 : vector<256x4xf32>
    %50 = vector.shape_cast %49 : vector<256x4xf32> to vector<16x16x4xf32>
    %c1_76 = arith.constant 1 : index
    %c1_77 = arith.constant 1 : index
    %c0_78 = arith.constant 0 : index
    %51 = vector.load %arg8[%c1_76, %c1_77, %c0_78] : memref<18x18x4xf32, #tpu.memory_space<vmem>>, vector<16x16x4xf32>
    tpu.vector_store %arg8[%c1_76, %c1_77, %c0_78], %50 {strides = array<i32>} : memref<18x18x4xf32, #tpu.memory_space<vmem>>, vector<16x16x4xf32>,
    %c0_79 = arith.constant 0 : index
    %c0_80 = arith.constant 0 : index
    %c0_81 = arith.constant 0 : index
    %52 = vector.load %arg8[%c0_79, %c0_80, %c0_81] : memref<18x18x4xf32, #tpu.memory_space<vmem>>, vector<16x16x4xf32>
    %c0_82 = arith.constant 0 : index
    %c1_83 = arith.constant 1 : index
    %c0_84 = arith.constant 0 : index
    %53 = vector.load %arg8[%c0_82, %c1_83, %c0_84] : memref<18x18x4xf32, #tpu.memory_space<vmem>>, vector<16x16x4xf32>
    %c0_85 = arith.constant 0 : index
    %c2_86 = arith.constant 2 : index
    %c0_87 = arith.constant 0 : index
    %54 = vector.load %arg8[%c0_85, %c2_86, %c0_87] : memref<18x18x4xf32, #tpu.memory_space<vmem>>, vector<16x16x4xf32>
    %55 = tpu.concatenate %52, %53, %54 in 2 : vector<16x16x4xf32>, vector<16x16x4xf32>, vector<16x16x4xf32> -> vector<16x16x12xf32>
    %56 = vector.shape_cast %55 : vector<16x16x12xf32> to vector<256x12xf32>
    %c0_88 = arith.constant 0 : index
    %c0_89 = arith.constant 0 : index
    %c0_90 = arith.constant 0 : index
    %57 = vector.load %arg4[%c0_88, %c0_89, %c0_90] : memref<3x12x4xf32, #tpu.memory_space<vmem>>, vector<1x12x4xf32>
    %58 = vector.shape_cast %57 : vector<1x12x4xf32> to vector<12x4xf32>
    %cst_91 = arith.constant dense<0.000000e+00> : vector<256x4xf32>
    %59 = tpu.matmul %56, %58, %cst_91 {dimension_numbers = #tpu.dot_dimension_numbers<[1], [0], [0], [1], [0, 0, 1, 1], [], []>} : vector<256x12xf32>, vector<12x4xf32>, vector<256x4xf32> -> vector<256x4xf32>
    %c1_92 = arith.constant 1 : index
    %c0_93 = arith.constant 0 : index
    %c0_94 = arith.constant 0 : index
    %60 = vector.load %arg8[%c1_92, %c0_93, %c0_94] : memref<18x18x4xf32, #tpu.memory_space<vmem>>, vector<16x16x4xf32>
    %c1_95 = arith.constant 1 : index
    %c1_96 = arith.constant 1 : index
    %c0_97 = arith.constant 0 : index
    %61 = vector.load %arg8[%c1_95, %c1_96, %c0_97] : memref<18x18x4xf32, #tpu.memory_space<vmem>>, vector<16x16x4xf32>
    %c1_98 = arith.constant 1 : index
    %c2_99 = arith.constant 2 : index
    %c0_100 = arith.constant 0 : index
    %62 = vector.load %arg8[%c1_98, %c2_99, %c0_100] : memref<18x18x4xf32, #tpu.memory_space<vmem>>, vector<16x16x4xf32>
    %63 = tpu.concatenate %60, %61, %62 in 2 : vector<16x16x4xf32>, vector<16x16x4xf32>, vector<16x16x4xf32> -> vector<16x16x12xf32>
    %64 = vector.shape_cast %63 : vector<16x16x12xf32> to vector<256x12xf32>
    %c1_101 = arith.constant 1 : index
    %c0_102 = arith.constant 0 : index
    %c0_103 = arith.constant 0 : index
    %65 = vector.load %arg4[%c1_101, %c0_102, %c0_103] : memref<3x12x4xf32, #tpu.memory_space<vmem>>, vector<1x12x4xf32>
    %66 = vector.shape_cast %65 : vector<1x12x4xf32> to vector<12x4xf32>
    %cst_104 = arith.constant dense<0.000000e+00> : vector<256x4xf32>
    %67 = tpu.matmul %64, %66, %cst_104 {dimension_numbers = #tpu.dot_dimension_numbers<[1], [0], [0], [1], [0, 0, 1, 1], [], []>} : vector<256x12xf32>, vector<12x4xf32>, vector<256x4xf32> -> vector<256x4xf32>
    %68 = arith.addf %59, %67 : vector<256x4xf32>
    %c2_105 = arith.constant 2 : index
    %c0_106 = arith.constant 0 : index
    %c0_107 = arith.constant 0 : index
    %69 = vector.load %arg8[%c2_105, %c0_106, %c0_107] : memref<18x18x4xf32, #tpu.memory_space<vmem>>, vector<16x16x4xf32>
    %c2_108 = arith.constant 2 : index
    %c1_109 = arith.constant 1 : index
    %c0_110 = arith.constant 0 : index
    %70 = vector.load %arg8[%c2_108, %c1_109, %c0_110] : memref<18x18x4xf32, #tpu.memory_space<vmem>>, vector<16x16x4xf32>
    %c2_111 = arith.constant 2 : index
    %c2_112 = arith.constant 2 : index
    %c0_113 = arith.constant 0 : index
    %71 = vector.load %arg8[%c2_111, %c2_112, %c0_113] : memref<18x18x4xf32, #tpu.memory_space<vmem>>, vector<16x16x4xf32>
    %72 = tpu.concatenate %69, %70, %71 in 2 : vector<16x16x4xf32>, vector<16x16x4xf32>, vector<16x16x4xf32> -> vector<16x16x12xf32>
    %73 = vector.shape_cast %72 : vector<16x16x12xf32> to vector<256x12xf32>
    %c2_114 = arith.constant 2 : index
    %c0_115 = arith.constant 0 : index
    %c0_116 = arith.constant 0 : index
    %74 = vector.load %arg4[%c2_114, %c0_115, %c0_116] : memref<3x12x4xf32, #tpu.memory_space<vmem>>, vector<1x12x4xf32>
    %75 = vector.shape_cast %74 : vector<1x12x4xf32> to vector<12x4xf32>
    %cst_117 = arith.constant dense<0.000000e+00> : vector<256x4xf32>
    %76 = tpu.matmul %73, %75, %cst_117 {dimension_numbers = #tpu.dot_dimension_numbers<[1], [0], [0], [1], [0, 0, 1, 1], [], []>} : vector<256x12xf32>, vector<12x4xf32>, vector<256x4xf32> -> vector<256x4xf32>
    %77 = arith.addf %68, %76 : vector<256x4xf32>
    %c0_118 = arith.constant 0 : index
    %c0_119 = arith.constant 0 : index
    %78 = vector.load %arg5[%c0_118, %c0_119] : memref<1x4xf32, #tpu.memory_space<vmem>>, vector<1x4xf32>
    %79 = vector.broadcast %78 : vector<1x4xf32> to vector<256x4xf32>
    %80 = arith.addf %77, %79 : vector<256x4xf32>
    %81 = vector.shape_cast %1 : vector<16x16x4xf32> to vector<256x4xf32>
    %82 = arith.addf %80, %81 : vector<256x4xf32>
    %cst_120 = arith.constant 0.000000e+00 : f32
    %83 = vector.broadcast %cst_120 : f32 to vector<256x4xf32>
    %84 = arith.maximumf %82, %83 : vector<256x4xf32>
    %85 = tpu.transpose %84, [1, 0] : vector<256x4xf32> -> vector<4x256xf32>
    %c0_121 = arith.constant 0 : index
    %c0_122 = arith.constant 0 : index
    %c0_123 = arith.constant 0 : index
    %86 = vector.load %arg6[%c0_121, %c0_122, %c0_123] : memref<1x4x256xf32, #tpu.memory_space<vmem>>, vector<1x4x256xf32>
    %87 = vector.shape_cast %86 : vector<1x4x256xf32> to vector<4x256xf32>
    %88 = vector.shape_cast %85 : vector<4x256xf32> to vector<1x4x256xf32>
    tpu.vector_store %arg6[%c0_121, %c0_122, %c0_123], %88 {strides = array<i32>} : memref<1x4x256xf32, #tpu.memory_space<vmem>>, vector<1x4x256xf32>,
    return
  }
  func.func @transform_0(%arg0: i32) -> (i32, i32, i32, i32) {
    %c0_i32 = arith.constant 0 : i32
    %c0_i32_0 = arith.constant 0 : i32
    %c0_i32_1 = arith.constant 0 : i32
    %c0_i32_2 = arith.constant 0 : i32
    return %arg0, %c0_i32, %c0_i32_0, %c0_i32_1 : i32, i32, i32, i32
  }
  func.func @transform_1(%arg0: i32) -> (i32, i32, i32) {
    %c0_i32 = arith.constant 0 : i32
    %c0_i32_0 = arith.constant 0 : i32
    %c0_i32_1 = arith.constant 0 : i32
    %c0_i32_2 = arith.constant 0 : i32
    return %c0_i32, %c0_i32_0, %c0_i32_1 : i32, i32, i32
  }
  func.func @transform_2(%arg0: i32) -> (i32, i32) {
    %c0_i32 = arith.constant 0 : i32
    %c0_i32_0 = arith.constant 0 : i32
    %c0_i32_1 = arith.constant 0 : i32
    return %c0_i32, %c0_i32_0 : i32, i32
  }
  func.func @transform_3(%arg0: i32) -> (i32, i32, i32) {
    %c0_i32 = arith.constant 0 : i32
    %c0_i32_0 = arith.constant 0 : i32
    %c0_i32_1 = arith.constant 0 : i32
    %c0_i32_2 = arith.constant 0 : i32
    return %c0_i32, %c0_i32_0, %c0_i32_1 : i32, i32, i32
  }
  func.func @transform_4(%arg0: i32) -> (i32, i32) {
    %c0_i32 = arith.constant 0 : i32
    %c0_i32_0 = arith.constant 0 : i32
    %c0_i32_1 = arith.constant 0 : i32
    return %c0_i32, %c0_i32_0 : i32, i32
  }
  func.func @transform_5(%arg0: i32) -> (i32, i32, i32) {
    %c0_i32 = arith.constant 0 : i32
    %c0_i32_0 = arith.constant 0 : i32
    %c0_i32_1 = arith.constant 0 : i32
    return %arg0, %c0_i32, %c0_i32_0 : i32, i32, i32
  }
}

</mosaic_0001>

<bundles_post_ra>
// kernel: tpu_custom_call.1
= control target key start
LH: loop header
LB: loop body
LE: loop exit
PB: predicated region body
PF: predicated region fallthrough
CT: control target
= control target key end

     0   :  { %10 = vsyncpa [#allocation5], 0  ;;  %s9114_s0 = inlined_call_operand.hbm [shape: f32[2,16,16,4], index: 0, kind: input, shape index: {}]   ;;  %s9115_s1 = inlined_call_operand.hbm [shape: f32[3,12,4], index: 1, kind: input, shape index: {}]   ;;  %s9116_s2 = inlined_call_operand.hbm [shape: f32[1,4], index: 2, kind: input, shape index: {}]   ;;  %s9117_s3 = inlined_call_operand.hbm [shape: f32[3,12,4], index: 3, kind: input, shape index: {}]   ;;  %s9118_s4 = inlined_call_operand.hbm [shape: f32[1,4], index: 4, kind: input, shape index: {}]   ;;  %s9119_s5 = inlined_call_operand.hbm [shape: f32[2,4,256], index: 5, kind: output, shape index: {}]  }
   0x1   :  { %12 = vsyncpa [#allocation5 + $0x1], 0 }
   0x2   :  { %13 = vsyncpa [#allocation8], 0 }
   0x3   :  { %14 = vsyncpa [#allocation11], 0 }
   0x4   :  { %15 = vsyncpa [#allocation6], 0 }
   0x5   :  { %17 = vsyncpa [#allocation6 + $0x1], 0  ;;  %s6632_s18 = smov 0   ;;  %s6634_s19 = smov 0  }
   0x6   :  { %s6636_s20 = smov 0   ;;  %s6638_s21 = smov 0  }
   0x7 LB: > { %s6653_s22 = sadd.s32 4294967295, %s6588_s21   ;;  %s5375_s23 = sadd.s32 4294967294, %s6588_s21   ;;  %s6588_s21 = sphi %s6638_s21, %s9313_s21   ;;  %s6584_s20 = sphi %s6636_s20, %s9312_s20   ;;  %s6580_s19 = sphi %s6634_s19, %s9311_s19   ;;  %s6576_s18 = sphi %s6632_s18, %s9310_s18  }
   0x8   : > { %p43_p0 = scmp.ne.s32.totalorder %s6580_s19, %s6576_s18  ;;  %p9120_p1 = scmp.eq.s32.totalorder %s6653_s22, 0 }
   0x9   : > { %p157_p3 = scmp.eq.s32.totalorder %s5375_s23, 1  ;;  %p5376_p5 = scmp.ge.s32.totalorder %s6588_s21, 1 }
   0xa   : > { %p6662_p4 = por %p9120_p1, %p43_p0  ;;  %p164_p7 = scmp.lt.s32.totalorder %s6588_s21, 3 }
   0xb   : > { %p6667_p6 = por %p157_p3, %p43_p0  ;;  %s6590_s27 = smov [#allocation7]  }
   0xc   : > { %s9174_s24 = scalar_select %p6662_p4, 1, 0 }
   0xd   : > { %s9175_s25 = scalar_select %p6667_p6, 1, 0 }
   0xe   : > { %p6672_p8 = pnand %p5376_p5, %p164_p7  ;;  %s176_s28 = sshll.u32 %s6590_s27, 4  ;;  %s6676_s28 = int_to_ptr.vmem [resolvable:$true] %s176_s28 }
   0xf   : > { %s6591_s30 = smov [#allocation10]   ;;  %s6592_s7 = smov [#allocation9]  }
  0x10   : > { %s9176_s26 = scalar_select %p6672_p8, 1, 0 }
  0x11   : > { %p6299_p9 = pneg %p6672_p8  ;;  %s200_s6 = sshll.u32 %s6591_s30, 4  ;;  %s6687_s6 = int_to_ptr.vmem [resolvable:$true] %s200_s6 }
  0x12   : > { %s6689_s8 = sshll.u32 %s6592_s7, 4  ;;  %s6372_s11 = scalar_lea.hbm %s9115_s1, 768  ;;  %s191_s8 = int_to_ptr.vmem [resolvable:$true] %s6689_s8 }
  0x13   : > { %p6683_p11 = pnand %p6299_p9, %p9120_p1  ;;  %p6373_p12 = scmp.ne.s32.totalorder %s9115_s1, %s6372_s11 }
  0x14   : > { %p6379_p5 = scmp.lt.u32.totalorder %s6372_s11, %s9115_s1 }
  0x15   : > { %p6699_p13 = pneg %p6683_p11 }
  0x17   : > { %p6375_p0 = pnand %p6699_p13, %p6373_p12 }
  0x19   : > { %p6376_p3 = pneg %p6375_p0 }
  0x1b   : > { %p6381_p7 = pnand %p6379_p5, %p6376_p3 }
  0x1d   : > { %6384 = shalt.err (!%p6381_p7)
}
  0x1e   : > { %s6385_s17 = scalar_lea.vmem %s6676_s28, 768  ;;  %p6393_p2 = scmp.lt.s32.totalorder %s6676_s28, %s6676_s28 }
  0x1f   : > { %p6386_p9 = scmp.ne.s32.totalorder %s6676_s28, %s6385_s17  ;;  %p6394_p6 = scmp.lt.s32.totalorder %s6385_s17, %s6385_s17 }
  0x21   : > { %p6388_p10 = pnand %p6386_p9, %p6699_p13  ;;  %p6395_p12 = por %p6394_p6, %p6393_p2 }
  0x23   : > { %p6389_p1 = pneg %p6388_p10 }
  0x25   : > { %p6396_p0 = pnand %p6395_p12, %p6389_p1 }
  0x27   : > { %6399 = shalt.err (!%p6396_p0)
}
  0x28   : > { %s6593_s23 = smov 128   ;;  %s6594_s27 = smov 8  }
  0x29   : > { %6302 = dma.hbm_to_vmem [thread:$0]  (!%p6683_p11), %s9115_s1, 768, %s6676_s28, [#allocation8], %s6593_s23, %s6593_s23, %s6594_s27  }
  0x2a   : > { %s6400_s11 = scalar_lea.hbm %s9117_s3, 768 }
  0x2b   : > { %p6401_p1 = scmp.ne.s32.totalorder %s9117_s3, %s6400_s11  ;;  %p6407_p10 = scmp.lt.u32.totalorder %s6400_s11, %s9117_s3 }
  0x2d   : > { %p6403_p2 = pnand %p6401_p1, %p6699_p13 }
  0x2f   : > { %p6404_p6 = pneg %p6403_p2 }
  0x31   : > { %p6409_p3 = pnand %p6407_p10, %p6404_p6 }
  0x33   : > { %6412 = shalt.err (!%p6409_p3)
}
  0x34   : > { %s6413_s28 = scalar_lea.vmem %s6687_s6, 768  ;;  %p6421_p12 = scmp.lt.s32.totalorder %s6687_s6, %s6687_s6 }
  0x35   : > { %p6414_p5 = scmp.ne.s32.totalorder %s6687_s6, %s6413_s28  ;;  %p6422_p0 = scmp.lt.s32.totalorder %s6413_s28, %s6413_s28 }
  0x37   : > { %p6416_p7 = pnand %p6414_p5, %p6699_p13  ;;  %p6423_p1 = por %p6422_p0, %p6421_p12 }
  0x39   : > { %p6417_p9 = pneg %p6416_p7 }
  0x3b   : > { %p6424_p2 = pnand %p6423_p1, %p6417_p9 }
  0x3d   : > { %6427 = shalt.err (!%p6424_p2)
}
  0x3e   : > { %6308 = dma.hbm_to_vmem [thread:$0]  (!%p6683_p11), %s9117_s3, 768, %s6687_s6, [#allocation11], %s6593_s23, %s6593_s23, %s6594_s27  }
  0x3f   : > { %s6428_s10 = scalar_lea.hbm %s9116_s2, 16 }
  0x40   : > { %p6429_p6 = scmp.ne.s32.totalorder %s9116_s2, %s6428_s10  ;;  %p6435_p5 = scmp.lt.u32.totalorder %s6428_s10, %s9116_s2 }
  0x42   : > { %p6431_p10 = pnand %p6429_p6, %p6699_p13 }
  0x44   : > { %p6432_p3 = pneg %p6431_p10 }
  0x46   : > { %p6437_p7 = pnand %p6435_p5, %p6432_p3 }
  0x48   : > { %6440 = shalt.err (!%p6437_p7)
}
  0x49   : > { %s6441_s16 = scalar_lea.vmem %s191_s8, 16  ;;  %s6448_s6 = scalar_lea.vmem %s191_s8, 32 }
  0x4a   : > { %p6442_p9 = scmp.ne.s32.totalorder %s191_s8, %s6441_s16  ;;  %p6449_p1 = scmp.lt.s32.totalorder %s191_s8, %s191_s8 }
  0x4b   : > { %p6450_p2 = scmp.lt.s32.totalorder %s6448_s6, %s6441_s16 }
  0x4c   : > { %p6444_p12 = pnand %p6442_p9, %p6699_p13 }
  0x4d   : > { %p6451_p4 = por %p6450_p2, %p6449_p1 }
  0x4e   : > { %p6445_p0 = pneg %p6444_p12 }
  0x50   : > { %p6452_p8 = pnand %p6451_p4, %p6445_p0 }
  0x52   : > { %6455 = shalt.err (!%p6452_p8)
}
  0x53   : > { %6305 = dma.hbm_to_vmem [thread:$0]  (!%p6683_p11), %s9116_s2, 16, %s191_s8, [#allocation8]  }
  0x54   : > { %s6595_s30 = smov [#allocation12]   ;;  %s6456_s11 = scalar_lea.hbm %s9118_s4, 16 }
  0x55   : > { %s214_s7 = sshll.u32 %s6595_s30, 4  ;;  %p6457_p6 = scmp.ne.s32.totalorder %s9118_s4, %s6456_s11  ;;  %s215_s7 = int_to_ptr.vmem [resolvable:$true] %s214_s7 }
  0x56   : > { %p6463_p10 = scmp.lt.u32.totalorder %s6456_s11, %s9118_s4 }
  0x57   : > { %p6459_p4 = pnand %p6457_p6, %p6699_p13 }
  0x59   : > { %p6460_p8 = pneg %p6459_p4 }
  0x5b   : > { %p6465_p3 = pnand %p6463_p10, %p6460_p8 }
  0x5d   : > { %6468 = shalt.err (!%p6465_p3)
}
  0x5e   : > { %s6469_s8 = scalar_lea.vmem %s215_s7, 16  ;;  %s6476_s6 = scalar_lea.vmem %s215_s7, 32 }
  0x5f   : > { %p6470_p5 = scmp.ne.s32.totalorder %s215_s7, %s6469_s8  ;;  %p6477_p12 = scmp.lt.s32.totalorder %s215_s7, %s215_s7 }
  0x60   : > { %p6478_p0 = scmp.lt.s32.totalorder %s6476_s6, %s6469_s8 }
  0x61   : > { %p6472_p7 = pnand %p6470_p5, %p6699_p13 }
  0x62   : > { %p6479_p1 = por %p6478_p0, %p6477_p12 }
  0x63   : > { %p6473_p9 = pneg %p6472_p7 }
  0x65   : > { %p6480_p2 = pnand %p6479_p1, %p6473_p9 }
  0x67   : > { %6483 = shalt.err (!%p6480_p2)
}
  0x68   : > { %6311 = dma.hbm_to_vmem [thread:$0]  (!%p6683_p11), %s9118_s4, 16, %s215_s7, [#allocation11]  }
  0x69   : > { %s6787_s14 = sadd.s32 1, %s6588_s21   ;;  %s30_s30 = sadd.s32 1, %s6584_s20 }
  0x6a   : > { %s27_s29 = ssub.s32 %s6588_s21, %s6787_s14  ;;  %p37_p13 = scmp.ne.s32.totalorder %s6584_s20, %s6580_s19 }
  0x6b   : > { %p28_p6 = scmp.eq.s32.totalorder %s27_s29, 0  ;;  %p38_p4 = scmp.eq.s32.totalorder %s6588_s21, 0 }
  0x6c   : > { %p9179_p8 = scmp.eq.s32.totalorder %s6653_s22, 1  ;;  %p6324_p3 = scmp.lt.s32.totalorder %s6588_s21, 2 }
  0x6d   : > { %s6803_s10 = scalar_select %p28_p6, %s6584_s20, %s30_s30  }
  0x6e   : > { %p6797_p10 = por %p9179_p8, %p37_p13  ;;  %p39_p5 = por %p38_p4, %p37_p13 }
  0x6f   : > { %s225_s11 = sand.u32 1, %s6584_s20   ;;  %s5597_s7 = sshll.u32 %s6588_s21, 12 }
  0x70   : > { %s5382_s12 = sshll.u32 %s225_s11, 8  ;;  %s6810_s16 = scalar_lea.hbm %s9114_s0, %s5597_s7 }
  0x71   : > { %s229_s8 = scalar_lea.vmem [#allocation4], %s5382_s12  ;;  %p6814_p11 = pnand %p6324_p3, %p39_p5 }
  0x72   : > { %s236_s6 = sshll.u32 %s229_s8, 4  ;;  %s6818_s17 = scalar_lea.sflag [#allocation5], %s225_s11  ;;  %s6812_s6 = int_to_ptr.vmem [resolvable:$true] %s236_s6 }
  0x73   : > { %s6484_s30 = scalar_lea.hbm %s6810_s16, 4096  ;;  %p6486_p9 = pneg %p6814_p11 }
  0x74   : > { %p6485_p7 = scmp.ne.s32.totalorder %s6810_s16, %s6484_s30  ;;  %s6489_s7 = scalar_lea.hbm %s9114_s0, 8192 }
  0x75   : > { %p6490_p1 = scmp.lt.u32.totalorder %s6810_s16, %s9114_s0  ;;  %p6491_p2 = scmp.lt.u32.totalorder %s6489_s7, %s6484_s30 }
  0x76   : > { %p6487_p12 = pnand %p6486_p9, %p6485_p7  ;;  %p6493_p6 = scmp.lt.u32.totalorder %s6484_s30, %s6810_s16 }
  0x77   : > { %p6492_p13 = por %p6491_p2, %p6490_p1 }
  0x78   : > { %p6488_p0 = pneg %p6487_p12 }
  0x79   : > { %p6494_p4 = por %p6493_p6, %p6492_p13 }
  0x7b   : > { %p6495_p8 = pnand %p6494_p4, %p6488_p0 }
  0x7d   : > { %6498 = shalt.err (!%p6495_p8)
}
  0x7e   : > { %s6499_s11 = scalar_lea.vmem %s6812_s6, 4096  ;;  %s6596_s8 = smov [#allocation4]  }
  0x7f   : > { %p6500_p3 = scmp.ne.s32.totalorder %s6812_s6, %s6499_s11  ;;  %s6504_s29 = sshll.u32 %s6596_s8, 4  ;;  %s6505_s29 = int_to_ptr.vmem [resolvable:$false] %s6504_s29 }
  0x80   : > { %s6506_s12 = scalar_lea.vmem %s6505_s29, 8192  ;;  %p6507_p12 = scmp.lt.s32.totalorder %s6812_s6, %s6505_s29 }
  0x81   : > { %p6502_p5 = pnand %p6500_p3, %p6486_p9  ;;  %p6508_p1 = scmp.lt.s32.totalorder %s6506_s12, %s6499_s11 }
  0x83   : > { %p6503_p7 = pneg %p6502_p5  ;;  %p6509_p2 = por %p6508_p1, %p6507_p12 }
  0x85   : > { %p6510_p13 = pnand %p6509_p2, %p6503_p7 }
  0x87   : > { %6513 = shalt.err (!%p6510_p13)
}
  0x88   : > { %6315 = dma.hbm_to_vmem [thread:$0]  (!%p6814_p11), %s6810_s16, 4096, %s6812_s6, %s6818_s17, %s6593_s23, %s6593_s23, %s6594_s27  }
  0x89   : > { %p9182_p9 = scmp.ne.s32.totalorder %s9176_s26, 0 }
  0x8b   : > { %248 = sbr.rel (%p9182_p9) target bundleno = 1606 (0x646), region = 40 }
  0x92   : > { %s6852_s30 = sand.u32 1, %s6580_s19   ;;  %p9183_p0 = scmp.ne.s32.totalorder %s9174_s24, 0 }
  0x93   : > { %s5386_s7 = sshll.u32 %s6852_s30, 8  ;;  %s251_s13 = scalar_lea.sflag [#allocation5], %s6852_s30 }
  0x94   : > { %s6856_s15 = scalar_lea.vmem [#allocation4], %s5386_s7 }
  0x95   : > { %6559 = dma.done.wait (%p9183_p0), %s251_s13, 4096  }
  0x96   : > { %6561 = vsyncadd (%p9183_p0), %s251_s13, 4294963200  ;;  %p9184_p11 = scmp.eq.s32.totalorder %s6653_s22, 0 }
  0x98   : > { %6563 = dma.done.wait (%p9184_p11), [#allocation8], 784   ;;  %p9185_p6 = pmov %p9184_p11 }
  0x9a   : > { %6565 = vsyncadd (%p9185_p6), [#allocation8], 4294966512  ;;  %p9186_p4 = pmov %p9185_p6 }
  0x9c   : > { %6567 = dma.done.wait (%p9186_p4), [#allocation11], 784   ;;  %p9187_p8 = pmov %p9186_p4 }
  0x9d   : > { %vm329_vm0 = vcmask 31744   ;;  %vm338_vm1 = vcmask 24576   ;;  %v6597_v0 = vmov 0.0   ;;  %v7023_v1 = vld [vmem:[%s6856_s15] sm:$0xff]  ;;  %v7026_v2 = vld [vmem:[%s6856_s15 + $0x8] sm:$0xff]  ;;  %v7029_v3 = vld [vmem:[%s6856_s15 + $0x18] sm:$0xff] }
  0x9e   : > { %6569 = vsyncadd (%p9187_p8), [#allocation11], 4294966512  ;;  %330 = vst.msk [vmem:[#allocation2] sm:$0xff] %vm329_vm0, %v6597_v0  ;;  %vm332_vm2 = vcmask 25600   ;;  %v7038_v4 = vld [vmem:[%s6856_s15 + $0x10] sm:$0xff]  ;;  %v7041_v5 = vld [vmem:[%s6856_s15 + $0x28] sm:$0xff] }
  0x9f   : > { %331 = vst.msk [vmem:[#allocation2 + $0x8] sm:$0xff] %vm329_vm0, %v6597_v0  ;;  %335 = vst.msk [vmem:[#allocation2 + $0x198] sm:$0xff] %vm329_vm0, %v6597_v0  ;;  %v7044_v6 = vld [vmem:[%s6856_s15 + $0x20] sm:$0xff]  ;;  %v7057_v7 = vld [vmem:[%s6856_s15 + $0x38] sm:$0xff]  ;;  %s6598_s24 = smov 8   ;;  %s6599_s26 = smov 4  }
  0xa0   : > { %336 = vst.msk [vmem:[#allocation2 + $0x1a0] sm:$0xff] %vm329_vm0, %v6597_v0  ;;  %375 = vst.msk [vmem:[#allocation3] sm:$0xff] %vm329_vm0, %v6597_v0  ;;  %v7060_v8 = vld [vmem:[%s6856_s15 + $0x30] sm:$0xff]  ;;  %v7063_v9 = vld [vmem:[%s6856_s15 + $0x48] sm:$0xff]  ;;  %vm1386_vm3 = vcmask 1043456   ;;  %vm6600_vm4 = vmmov 1  }
  0xa1   : > { %376 = vst.msk [vmem:[#allocation3 + $0x8] sm:$0xff] %vm329_vm0, %v6597_v0  ;;  %379 = vst.msk [vmem:[#allocation3 + $0x198] sm:$0xff] %vm329_vm0, %v6597_v0  ;;  %v7080_v10 = vld [vmem:[%s6856_s15 + $0x40] sm:$0xff]  ;;  %v7083_v11 = vld [vmem:[%s6856_s15 + $0x58] sm:$0xff]  ;;  %vm835_vm6 = vcmask 64512   ;;  %vm1289_vm7 = vcmask 97280  }
  0xa2   : > { %380 = vst.msk [vmem:[#allocation3 + $0x1a0] sm:$0xff] %vm329_vm0, %v6597_v0  ;;  %9188 = vst [vmem:[#allocation18_spill] sm:$0xff] %v7023_v1  ;;  %v7086_v12 = vld [vmem:[%s6856_s15 + $0x50] sm:$0xff]  ;;  %v7095_v13 = vld [vmem:[%s6856_s15 + $0x68] sm:$0xff]  ;;  %s5391_s23 = sshll.u32 %s6852_s30, 3  ;;  %s5598_s27 = sshll.u32 %s6653_s22, 7 }
  0xa3   : > { %358 = vst.msk [vmem:[#allocation2 + $0x29] sm:$0x1] %vm338_vm1, %v6597_v0  ;;  %340 = vst.msk [vmem:[#allocation2 + $0x18] sm:$0x1] %vm338_vm1, %v6597_v0  ;;  %v7098_v14 = vld [vmem:[%s6856_s15 + $0x60] sm:$0xff]  ;;  %v7101_v15 = vld [vmem:[%s6856_s15 + $0x78] sm:$0xff]  ;;  %s9070_s11 = scalar_lea.hbm %s9119_s5, %s5598_s27 }
  0xa4   : > { %341 = vst.msk [vmem:[#allocation2 + $0x30] sm:$0x1] %vm338_vm1, %v6597_v0  ;;  %342 = vst.msk [vmem:[#allocation2 + $0x48] sm:$0x1] %vm338_vm1, %v6597_v0  ;;  %v7110_v16 = vld [vmem:[%s6856_s15 + $0x70] sm:$0xff]  ;;  %v7113_v17 = vld [vmem:[%s6856_s15 + $0x88] sm:$0xff] }
  0xa5   : > { %343 = vst.msk [vmem:[#allocation2 + $0x60] sm:$0x1] %vm338_vm1, %v6597_v0  ;;  %344 = vst.msk [vmem:[#allocation2 + $0x78] sm:$0x1] %vm338_vm1, %v6597_v0  ;;  %v7116_v18 = vld [vmem:[%s6856_s15 + $0x80] sm:$0xff]  ;;  %v7125_v19 = vld [vmem:[%s6856_s15 + $0x98] sm:$0xff] }
  0xa6   : > { %345 = vst.msk [vmem:[#allocation2 + $0x90] sm:$0x1] %vm338_vm1, %v6597_v0  ;;  %346 = vst.msk [vmem:[#allocation2 + $0xa8] sm:$0x1] %vm338_vm1, %v6597_v0  ;;  %v7128_v20 = vld [vmem:[%s6856_s15 + $0x90] sm:$0xff]  ;;  %v7131_v21 = vld [vmem:[%s6856_s15 + $0xa8] sm:$0xff] }
  0xa7   : > { %347 = vst.msk [vmem:[#allocation2 + $0xc0] sm:$0x1] %vm338_vm1, %v6597_v0  ;;  %348 = vst.msk [vmem:[#allocation2 + $0xd8] sm:$0x1] %vm338_vm1, %v6597_v0  ;;  %v7140_v22 = vld [vmem:[%s6856_s15 + $0xa0] sm:$0xff]  ;;  %v7143_v23 = vld [vmem:[%s6856_s15 + $0xb8] sm:$0xff] }
  0xa8   : > { %349 = vst.msk [vmem:[#allocation2 + $0xf0] sm:$0x1] %vm338_vm1, %v6597_v0  ;;  %350 = vst.msk [vmem:[#allocation2 + $0x108] sm:$0x1] %vm338_vm1, %v6597_v0  ;;  %v7146_v24 = vld [vmem:[%s6856_s15 + $0xb0] sm:$0xff]  ;;  %v7193_v36 = vld [vmem:[%s6856_s15 + $0xc8] sm:$0xff] }
  0xa9   : > { %351 = vst.msk [vmem:[#allocation2 + $0x120] sm:$0x1] %vm338_vm1, %v6597_v0  ;;  %352 = vst.msk [vmem:[#allocation2 + $0x138] sm:$0x1] %vm338_vm1, %v6597_v0  ;;  %v7196_v37 = vld [vmem:[%s6856_s15 + $0xc0] sm:$0xff]  ;;  %v7199_v38 = vld [vmem:[%s6856_s15 + $0xd8] sm:$0xff] }
  0xaa   : > { %353 = vst.msk [vmem:[#allocation2 + $0x150] sm:$0x1] %vm338_vm1, %v6597_v0  ;;  %354 = vst.msk [vmem:[#allocation2 + $0x168] sm:$0x1] %vm338_vm1, %v6597_v0  ;;  %v7214_v40 = vld [vmem:[%s6856_s15 + $0xd0] sm:$0xff]  ;;  %v7217_v41 = vld [vmem:[%s6856_s15 + $0xe8] sm:$0xff] }
  0xab   : > { %355 = vst.msk [vmem:[#allocation2 + $0x180] sm:$0x1] %vm338_vm1, %v6597_v0  ;;  %359 = vst.msk [vmem:[#allocation2 + $0x41] sm:$0x1] %vm338_vm1, %v6597_v0  ;;  %v7224_v42 = vld [vmem:[%s6856_s15 + $0xe0] sm:$0xff]  ;;  %v1287_v43 = vld [vmem:[#allocation7 + $0x10] sm:$0xff] }
  0xac   : > { %360 = vst.msk [vmem:[#allocation2 + $0x59] sm:$0x1] %vm338_vm1, %v6597_v0  ;;  %361 = vst.msk [vmem:[#allocation2 + $0x71] sm:$0x1] %vm338_vm1, %v6597_v0  ;;  %v1288_v44 = vld [vmem:[#allocation7 + $0x18] sm:$0xf] }
  0xad   : > { %362 = vst.msk [vmem:[#allocation2 + $0x89] sm:$0x1] %vm338_vm1, %v6597_v0  ;;  %363 = vst.msk [vmem:[#allocation2 + $0xa1] sm:$0x1] %vm338_vm1, %v6597_v0  ;;  %v6115_v45 = vpack.c.bf16 %v1288_v44, %v1287_v43  ;;  %v7234_v47 = vld [vmem:[%s6856_s15 + $0xf8] sm:$0xff]  ;;  %v7237_v48 = vld [vmem:[%s6856_s15 + $0xf0] sm:$0xff] }
  0xae   : > { %364 = vst.msk [vmem:[#allocation2 + $0xb9] sm:$0x1] %vm338_vm1, %v6597_v0  ;;  %365 = vst.msk [vmem:[#allocation2 + $0xd1] sm:$0x1] %vm338_vm1, %v6597_v0  ;;  %s296_s16 = scalar_lea.vmem [#allocation13], %s5391_s23  ;;  %s5253_s8 = scalar_lea.sflag [#allocation6], %s6852_s30 }
  0xaf   : > { %366 = vst.msk [vmem:[#allocation2 + $0xe9] sm:$0x1] %vm338_vm1, %v6597_v0  ;;  %367 = vst.msk [vmem:[#allocation2 + $0x101] sm:$0x1] %vm338_vm1, %v6597_v0  ;;  %s5267_s6 = sshll.u32 %s296_s16, 4  ;;  %s6601_s22 = smov [#allocation13]   ;;  %s9072_s6 = int_to_ptr.vmem [resolvable:$true] %s5267_s6 }
  0xb0   : > { %368 = vst.msk [vmem:[#allocation2 + $0x119] sm:$0x1] %vm338_vm1, %v6597_v0  ;;  %369 = vst.msk [vmem:[#allocation2 + $0x131] sm:$0x1] %vm338_vm1, %v6597_v0  ;;  %s6514_s29 = scalar_lea.vmem %s9072_s6, 128  ;;  %s6518_s12 = sshll.u32 %s6601_s22, 4  ;;  %s6519_s12 = int_to_ptr.vmem [resolvable:$false] %s6518_s12 }
  0xb1   : > { %370 = vst.msk [vmem:[#allocation2 + $0x149] sm:$0x1] %vm338_vm1, %v6597_v0  ;;  %371 = vst.msk [vmem:[#allocation2 + $0x161] sm:$0x1] %vm338_vm1, %v6597_v0  ;;  %p6515_p3 = scmp.ne.s32.totalorder %s9072_s6, %s6514_s29  ;;  %s6520_s7 = scalar_lea.vmem %s6519_s12, 256 }
  0xb2   : > { %372 = vst.msk [vmem:[#allocation2 + $0x179] sm:$0x1] %vm338_vm1, %v6597_v0  ;;  %373 = vst.msk [vmem:[#allocation2 + $0x191] sm:$0x1] %vm338_vm1, %v6597_v0  ;;  %p6521_p12 = scmp.lt.s32.totalorder %s9072_s6, %s6519_s12  ;;  %p6522_p1 = scmp.lt.s32.totalorder %s6520_s7, %s6514_s29 }
  0xb3   : > { %383 = vst.msk [vmem:[#allocation3 + $0x18] sm:$0x1] %vm338_vm1, %v6597_v0  ;;  %384 = vst.msk [vmem:[#allocation3 + $0x30] sm:$0x1] %vm338_vm1, %v6597_v0  ;;  %p6516_p5 = pnand %p6515_p3, %p6797_p10 }
  0xb4   : > { %385 = vst.msk [vmem:[#allocation3 + $0x48] sm:$0x1] %vm338_vm1, %v6597_v0  ;;  %386 = vst.msk [vmem:[#allocation3 + $0x60] sm:$0x1] %vm338_vm1, %v6597_v0  ;;  %p6523_p2 = por %p6522_p1, %p6521_p12 }
  0xb5   : > { %387 = vst.msk [vmem:[#allocation3 + $0x78] sm:$0x1] %vm338_vm1, %v6597_v0  ;;  %388 = vst.msk [vmem:[#allocation3 + $0x90] sm:$0x1] %vm338_vm1, %v6597_v0  ;;  %p6517_p7 = pneg %p6516_p5 }
  0xb6   : > { %389 = vst.msk [vmem:[#allocation3 + $0xa8] sm:$0x1] %vm338_vm1, %v6597_v0  ;;  %390 = vst.msk [vmem:[#allocation3 + $0xc0] sm:$0x1] %vm338_vm1, %v6597_v0 }
  0xb7   : > { %391 = vst.msk [vmem:[#allocation3 + $0xd8] sm:$0x1] %vm338_vm1, %v6597_v0  ;;  %392 = vst.msk [vmem:[#allocation3 + $0xf0] sm:$0x1] %vm338_vm1, %v6597_v0  ;;  %p6524_p13 = pnand %p6523_p2, %p6517_p7 }
  0xb8   : > { %393 = vst.msk [vmem:[#allocation3 + $0x108] sm:$0x1] %vm338_vm1, %v6597_v0  ;;  %394 = vst.msk [vmem:[#allocation3 + $0x120] sm:$0x1] %vm338_vm1, %v6597_v0 }
  0xb9   : > { %395 = vst.msk [vmem:[#allocation3 + $0x138] sm:$0x1] %vm338_vm1, %v6597_v0  ;;  %396 = vst.msk [vmem:[#allocation3 + $0x150] sm:$0x1] %vm338_vm1, %v6597_v0 }
  0xba   : > { %397 = vst.msk [vmem:[#allocation3 + $0x168] sm:$0x1] %vm338_vm1, %v6597_v0  ;;  %398 = vst.msk [vmem:[#allocation3 + $0x180] sm:$0x1] %vm338_vm1, %v6597_v0 }
  0xbb   : > { %401 = vst.msk [vmem:[#allocation3 + $0x29] sm:$0x1] %vm338_vm1, %v6597_v0  ;;  %402 = vst.msk [vmem:[#allocation3 + $0x41] sm:$0x1] %vm338_vm1, %v6597_v0 }
  0xbc   : > { %403 = vst.msk [vmem:[#allocation3 + $0x59] sm:$0x1] %vm338_vm1, %v6597_v0  ;;  %404 = vst.msk [vmem:[#allocation3 + $0x71] sm:$0x1] %vm338_vm1, %v6597_v0 }
  0xbd   : > { %405 = vst.msk [vmem:[#allocation3 + $0x89] sm:$0x1] %vm338_vm1, %v6597_v0  ;;  %406 = vst.msk [vmem:[#allocation3 + $0xa1] sm:$0x1] %vm338_vm1, %v6597_v0 }
  0xbe   : > { %407 = vst.msk [vmem:[#allocation3 + $0xb9] sm:$0x1] %vm338_vm1, %v6597_v0  ;;  %408 = vst.msk [vmem:[#allocation3 + $0xd1] sm:$0x1] %vm338_vm1, %v6597_v0 }
  0xbf   : > { %409 = vst.msk [vmem:[#allocation3 + $0xe9] sm:$0x1] %vm338_vm1, %v6597_v0  ;;  %410 = vst.msk [vmem:[#allocation3 + $0x101] sm:$0x1] %vm338_vm1, %v6597_v0 }
  0xc0   : > { %411 = vst.msk [vmem:[#allocation3 + $0x119] sm:$0x1] %vm338_vm1, %v6597_v0  ;;  %412 = vst.msk [vmem:[#allocation3 + $0x131] sm:$0x1] %vm338_vm1, %v6597_v0 }
  0xc1   : > { %413 = vst.msk [vmem:[#allocation3 + $0x149] sm:$0x1] %vm338_vm1, %v6597_v0  ;;  %414 = vst.msk [vmem:[#allocation3 + $0x161] sm:$0x1] %vm338_vm1, %v6597_v0 }
  0xc2   : > { %415 = vst.msk [vmem:[#allocation3 + $0x179] sm:$0x1] %vm338_vm1, %v6597_v0  ;;  %416 = vst.msk [vmem:[#allocation3 + $0x191] sm:$0x1] %vm338_vm1, %v6597_v0 }
  0xc3   : > { %339 = vst.msk [vmem:[#allocation2] sm:$0x1] %vm338_vm1, %v6597_v0  ;;  %356 = vst.msk [vmem:[#allocation2 + $0x198] sm:$0x1] %vm338_vm1, %v6597_v0 }
  0xc4   : > { %382 = vst.msk [vmem:[#allocation3] sm:$0x1] %vm338_vm1, %v6597_v0  ;;  %399 = vst.msk [vmem:[#allocation3 + $0x198] sm:$0x1] %vm338_vm1, %v6597_v0 }
  0xc5   : > { %9189 = vst [vmem:[#allocation19_spill] sm:$0xff] %v7026_v2  ;;  %9190 = vst [vmem:[#allocation20_spill] sm:$0xff] %v7029_v3 }
  0xc6   : > { %419 = vst.msk [vmem:[#allocation2 + $0x19] sm:$0xff] %vm329_vm0, %v7023_v1  ;;  %420 = vst.msk [vmem:[#allocation2 + $0x21] sm:$0xff] %vm329_vm0, %v7026_v2 }
  0xc7   : > { %422 = vst.msk [vmem:[#allocation2 + $0x39] sm:$0xff] %vm329_vm0, %v7029_v3  ;;  %9191 = vst [vmem:[#allocation21_spill] sm:$0xff] %v7038_v4 }
  0xc8   : > { %9192 = vst [vmem:[#allocation22_spill] sm:$0xff] %v7041_v5  ;;  %9193 = vst [vmem:[#allocation23_spill] sm:$0xff] %v7044_v6 }
  0xc9   : > { %333 = vst.msk [vmem:[#allocation2 + $0x10] sm:$0x3] %vm332_vm2, %v6597_v0  ;;  %337 = vst.msk [vmem:[#allocation2 + $0x1a8] sm:$0x3] %vm332_vm2, %v6597_v0 }
  0xca   : > { %377 = vst.msk [vmem:[#allocation3 + $0x10] sm:$0x3] %vm332_vm2, %v6597_v0  ;;  %381 = vst.msk [vmem:[#allocation3 + $0x1a8] sm:$0x3] %vm332_vm2, %v6597_v0 }
  0xcb   : > { %421 = vst.msk [vmem:[#allocation2 + $0x31] sm:$0xff] %vm329_vm0, %v7038_v4  ;;  %424 = vst.msk [vmem:[#allocation2 + $0x51] sm:$0xff] %vm329_vm0, %v7041_v5 }
  0xcc   : > { %423 = vst.msk [vmem:[#allocation2 + $0x49] sm:$0xff] %vm329_vm0, %v7044_v6  ;;  %9194 = vst [vmem:[#allocation24_spill] sm:$0xff] %v7057_v7 }
  0xcd   : > { %9195 = vst [vmem:[#allocation25_spill] sm:$0xff] %v7060_v8  ;;  %9196 = vst [vmem:[#allocation26_spill] sm:$0xff] %v7063_v9  ;;  %v7148_v25 = vld [vmem:[#allocation2 + $0x1a] sm:$0xff]  ;;  %v7162_v27 = vld [vmem:[#allocation2 + $0x22] sm:$0xff] }
  0xce   : > { %357 = vst.msk [vmem:[#allocation2 + $0x11] sm:$0x1] %vm338_vm1, %v6597_v0  ;;  %374 = vst.msk [vmem:[#allocation2 + $0x1a9] sm:$0x1] %vm338_vm1, %v6597_v0  ;;  %v7150_v26 = vld [vmem:[#allocation2 + $0x19] sm:$0xff]  ;;  %1126 = vrot.lane.b32.xlu1 %v7148_v25, %s6598_s24  ;;  %v7164_v28 = vld [vmem:[#allocation2 + $0x21] sm:$0xff] }
  0xcf   : > { %400 = vst.msk [vmem:[#allocation3 + $0x11] sm:$0x1] %vm338_vm1, %v6597_v0  ;;  %417 = vst.msk [vmem:[#allocation3 + $0x1a9] sm:$0x1] %vm338_vm1, %v6597_v0  ;;  %998 = vrot.lane.b32.xlu0 %v7150_v26, %s6599_s26  ;;  %v7170_v29 = vld [vmem:[#allocation2 + $0x39] sm:$0xff] }
  0xd0   : > { %426 = vst.msk [vmem:[#allocation2 + $0x69] sm:$0xff] %vm329_vm0, %v7057_v7  ;;  %425 = vst.msk [vmem:[#allocation2 + $0x61] sm:$0xff] %vm329_vm0, %v7060_v8  ;;  %v7178_v31 = vld [vmem:[#allocation2 + $0x3a] sm:$0xff] }
  0xd1   : > { %428 = vst.msk [vmem:[#allocation2 + $0x81] sm:$0xff] %vm329_vm0, %v7063_v9  ;;  %9197 = vst [vmem:[#allocation27_spill] sm:$0xff] %v7080_v10  ;;  %v7435_v6 = vld [vmem:[#allocation2 + $0x18] sm:$0xff] }
  0xd2   : > { %9198 = vst [vmem:[#allocation28_spill] sm:$0xff] %v7083_v11  ;;  %9199 = vst [vmem:[#allocation29_spill] sm:$0xff] %v7086_v12  ;;  %1128 = vrot.lane.b32.xlu1 %v7162_v27, %s6598_s24  ;;  %v7172_v30 = vld [vmem:[#allocation2 + $0x31] sm:$0xff] }
  0xd3   : > { %427 = vst.msk [vmem:[#allocation2 + $0x79] sm:$0xff] %vm329_vm0, %v7080_v10  ;;  %430 = vst.msk [vmem:[#allocation2 + $0x99] sm:$0xff] %vm329_vm0, %v7083_v11  ;;  %1000 = vrot.lane.b32.xlu0 %v7164_v28, %s6599_s26  ;;  %v7180_v32 = vld [vmem:[#allocation2 + $0x32] sm:$0xff]  ;;  %v7188_v34 = vld [vmem:[#allocation2 + $0x49] sm:$0xff] }
  0xd4   : > { %429 = vst.msk [vmem:[#allocation2 + $0x91] sm:$0xff] %vm329_vm0, %v7086_v12  ;;  %9200 = vst [vmem:[#allocation30_spill] sm:$0xff] %v7095_v13  ;;  %v7186_v33 = vld [vmem:[#allocation2 + $0x51] sm:$0xff] }
  0xd5   : > { %9201 = vst [vmem:[#allocation31_spill] sm:$0xff] %v7098_v14  ;;  %9202 = vst [vmem:[#allocation32_spill] sm:$0xff] %v7101_v15  ;;  %v7190_v35 = vld [vmem:[#allocation2 + $0x52] sm:$0xff]  ;;  %v7205_v39 = vld [vmem:[#allocation2 + $0x4a] sm:$0xff] }
  0xd6   : > { %432 = vst.msk [vmem:[#allocation2 + $0xb1] sm:$0xff] %vm329_vm0, %v7095_v13  ;;  %431 = vst.msk [vmem:[#allocation2 + $0xa9] sm:$0xff] %vm329_vm0, %v7098_v14  ;;  %1004 = vrot.lane.b32.xlu1 %v7170_v29, %s6599_s26 }
  0xd7   : > { %434 = vst.msk [vmem:[#allocation2 + $0xc9] sm:$0xff] %vm329_vm0, %v7101_v15  ;;  %9203 = vst [vmem:[#allocation33_spill] sm:$0xff] %v7110_v16  ;;  %1002 = vrot.lane.b32.xlu0 %v7172_v30, %s6599_s26  ;;  %v7247_v49 = vld [vmem:[#allocation2 + $0x69] sm:$0xff]  ;;  %v7249_v50 = vld [vmem:[#allocation2 + $0x61] sm:$0xff] }
  0xd8   : > { %9204 = vst [vmem:[#allocation34_spill] sm:$0xff] %v7113_v17  ;;  %9205 = vst [vmem:[#allocation35_spill] sm:$0xff] %v7116_v18  ;;  %v7259_v51 = vld [vmem:[#allocation2 + $0x6a] sm:$0xff]  ;;  %v7261_v52 = vld [vmem:[#allocation2 + $0x62] sm:$0xff] }
  0xd9   : > { %433 = vst.msk [vmem:[#allocation2 + $0xc1] sm:$0xff] %vm329_vm0, %v7110_v16  ;;  %436 = vst.msk [vmem:[#allocation2 + $0xe1] sm:$0xff] %vm329_vm0, %v7113_v17  ;;  %v7267_v53 = vld [vmem:[#allocation2 + $0x81] sm:$0xff] }
  0xda   : > { %435 = vst.msk [vmem:[#allocation2 + $0xd9] sm:$0xff] %vm329_vm0, %v7116_v18  ;;  %9206 = vst [vmem:[#allocation36_spill] sm:$0xff] %v7125_v19  ;;  %1132 = vrot.lane.b32.xlu1 %v7178_v31, %s6598_s24  ;;  %v7269_v54 = vld [vmem:[#allocation2 + $0x79] sm:$0xff]  ;;  %v7275_v55 = vld [vmem:[#allocation2 + $0x82] sm:$0xff] }
  0xdb   : > { %9207 = vst [vmem:[#allocation37_spill] sm:$0xff] %v7128_v20  ;;  %9208 = vst [vmem:[#allocation38_spill] sm:$0xff] %v7131_v21  ;;  %1130 = vrot.lane.b32.xlu0 %v7180_v32, %s6598_s24  ;;  %v7277_v56 = vld [vmem:[#allocation2 + $0x7a] sm:$0xff]  ;;  %v7285_v58 = vld [vmem:[#allocation2 + $0x91] sm:$0xff] }
  0xdc   : > { %438 = vst.msk [vmem:[#allocation2 + $0xf9] sm:$0xff] %vm329_vm0, %v7125_v19  ;;  %437 = vst.msk [vmem:[#allocation2 + $0xf1] sm:$0xff] %vm329_vm0, %v7128_v20  ;;  %v7283_v57 = vld [vmem:[#allocation2 + $0x99] sm:$0xff] }
  0xdd   : > { %440 = vst.msk [vmem:[#allocation2 + $0x111] sm:$0xff] %vm329_vm0, %v7131_v21  ;;  %9209 = vst [vmem:[#allocation39_spill] sm:$0xff] %v7140_v22  ;;  %v7291_v59 = vld [vmem:[#allocation2 + $0x9a] sm:$0xff]  ;;  %v7293_v60 = vld [vmem:[#allocation2 + $0x92] sm:$0xff] }
  0xde   : > { %9210 = vst [vmem:[#allocation40_spill] sm:$0xff] %v7143_v23  ;;  %9211 = vst [vmem:[#allocation41_spill] sm:$0xff] %v7146_v24  ;;  %1008 = vrot.lane.b32.xlu1 %v7186_v33, %s6599_s26  ;;  %v7299_v61 = vld [vmem:[#allocation2 + $0xb1] sm:$0xff]  ;;  %v7301_v62 = vld [vmem:[#allocation2 + $0xa9] sm:$0xff] }
  0xdf   : > { %439 = vst.msk [vmem:[#allocation2 + $0x109] sm:$0xff] %vm329_vm0, %v7140_v22  ;;  %442 = vst.msk [vmem:[#allocation2 + $0x129] sm:$0xff] %vm329_vm0, %v7143_v23  ;;  %1006 = vrot.lane.b32.xlu0 %v7188_v34, %s6599_s26  ;;  %v7307_v63 = vld [vmem:[#allocation2 + $0xb2] sm:$0xff]  ;;  %v7309_v0 = vld [vmem:[#allocation2 + $0xaa] sm:$0xff] }
  0xe0   : > { %441 = vst.msk [vmem:[#allocation2 + $0x121] sm:$0xff] %vm329_vm0, %v7146_v24  ;;  %9212 = vst [vmem:[#allocation42_spill] sm:$0xff] %v7193_v36  ;;  %v7315_v43 = vld [vmem:[#allocation2 + $0xc9] sm:$0xff]  ;;  %v7317_v44 = vld [vmem:[#allocation2 + $0xc1] sm:$0xff] }
  0xe1   : > { %9213 = vst [vmem:[#allocation43_spill] sm:$0xff] %v7196_v37  ;;  %9214 = vst [vmem:[#allocation44_spill] sm:$0xff] %v7199_v38 }
  0xe2   : > { %444 = vst.msk [vmem:[#allocation2 + $0x141] sm:$0xff] %vm329_vm0, %v7193_v36  ;;  %443 = vst.msk [vmem:[#allocation2 + $0x139] sm:$0xff] %vm329_vm0, %v7196_v37  ;;  %1136 = vrot.lane.b32.xlu1 %v7190_v35, %s6598_s24 }
  0xe3   : > { %446 = vst.msk [vmem:[#allocation2 + $0x159] sm:$0xff] %vm329_vm0, %v7199_v38  ;;  %9215 = vst [vmem:[#allocation45_spill] sm:$0xff] %v7214_v40  ;;  %1134 = vrot.lane.b32.xlu0 %v7205_v39, %s6598_s24  ;;  %v7341_v38 = vld [vmem:[#allocation2 + $0xda] sm:$0xff]  ;;  %v7349_v36 = vld [vmem:[#allocation2 + $0xf1] sm:$0xff] }
  0xe4   : > { %9216 = vst [vmem:[#allocation46_spill] sm:$0xff] %v7217_v41  ;;  %445 = vst.msk [vmem:[#allocation2 + $0x151] sm:$0xff] %vm329_vm0, %v7214_v40  ;;  %v7347_v40 = vld [vmem:[#allocation2 + $0xf9] sm:$0xff]  ;;  %v7363_v24 = vld [vmem:[#allocation2 + $0x111] sm:$0xff] }
  0xe5   : > { %448 = vst.msk [vmem:[#allocation2 + $0x171] sm:$0xff] %vm329_vm0, %v7217_v41  ;;  %9217 = vst [vmem:[#allocation47_spill] sm:$0xff] %v7224_v42  ;;  %v7333_v41 = vld [vmem:[#allocation2 + $0xd9] sm:$0xff] }
  0xe6   : > { %447 = vst.msk [vmem:[#allocation2 + $0x169] sm:$0xff] %vm329_vm0, %v7224_v42  ;;  %vm7229_vm5 = vmpackc.low %vm1386_vm3, %vm6600_vm4  ;;  %1012 = vrot.lane.b32.xlu1 %v7247_v49, %s6599_s26  ;;  %v7339_v42 = vld [vmem:[#allocation2 + $0xe2] sm:$0xff]  ;;  %v7355_v37 = vld [vmem:[#allocation2 + $0xfa] sm:$0xff] }
  0xe7   : > { %9220 = vst [vmem:[#allocation48_spill] sm:$0xff] %v7234_v47  ;;  %9221 = vst [vmem:[#allocation49_spill] sm:$0xff] %v7237_v48  ;;  %6117 = vmatprep.subr.msk.bf16.mxu0 %vm7229_vm5, %v6115_v45  ;;  %1010 = vrot.lane.b32.xlu0 %v7249_v50, %s6599_s26  ;;  %v7357_v23 = vld [vmem:[#allocation2 + $0xf2] sm:$0xff]  ;;  %v7365_v21 = vld [vmem:[#allocation2 + $0x109] sm:$0xff] }
  0xe8   : > { %450 = vst.msk [vmem:[#allocation2 + $0x189] sm:$0xff] %vm329_vm0, %v7234_v47  ;;  %449 = vst.msk [vmem:[#allocation2 + $0x181] sm:$0xff] %vm329_vm0, %v7237_v48  ;;  %6120 = vmatpush3.bf16.msk.msra.mxu0 %vm7229_vm5, %v6115_v45  ;;  %v7323_v45 = vld [vmem:[#allocation2 + $0xca] sm:$0xff]  ;;  %v7325_v47 = vld [vmem:[#allocation2 + $0xc2] sm:$0xff] }
  0xe9   : > { %v7331_v48 = vld [vmem:[#allocation2 + $0xe1] sm:$0xff]  ;;  %v7371_v22 = vld [vmem:[#allocation2 + $0x112] sm:$0xff]  ;;  %v7373_v19 = vld [vmem:[#allocation2 + $0x10a] sm:$0xff]  ;;  %9232 = vst [vmem:[#allocation60_spill] sm:$0xff] %v7435_v6 }
  0xea   : > { %1140 = vrot.lane.b32.xlu1 %v7259_v51, %s6598_s24  ;;  %v7379_v20 = vld [vmem:[#allocation2 + $0x129] sm:$0xff]  ;;  %v7381_v17 = vld [vmem:[#allocation2 + $0x121] sm:$0xff]  ;;  %v7397_v13 = vld [vmem:[#allocation2 + $0x139] sm:$0xff] }
  0xeb   : > { %1138 = vrot.lane.b32.xlu0 %v7261_v52, %s6598_s24  ;;  %v7387_v18 = vld [vmem:[#allocation2 + $0x12a] sm:$0xff]  ;;  %v7389_v15 = vld [vmem:[#allocation2 + $0x122] sm:$0xff]  ;;  %9223 = vst [vmem:[#allocation51_spill] sm:$0xff] %v7397_v13  ;;  %v7405_v11 = vld [vmem:[#allocation2 + $0x13a] sm:$0xff] }
  0xec   : > { %v7395_v16 = vld [vmem:[#allocation2 + $0x141] sm:$0xff]  ;;  %9225 = vst [vmem:[#allocation53_spill] sm:$0xff] %v7405_v11  ;;  %v7411_v12 = vld [vmem:[#allocation2 + $0x159] sm:$0xff]  ;;  %v7413_v9 = vld [vmem:[#allocation2 + $0x151] sm:$0xff] }
  0xed   : > { %9222 = vst [vmem:[#allocation50_spill] sm:$0xff] %v7395_v16  ;;  %v7403_v14 = vld [vmem:[#allocation2 + $0x142] sm:$0xff]  ;;  %9226 = vst [vmem:[#allocation54_spill] sm:$0xff] %v7411_v12  ;;  %v7419_v10 = vld [vmem:[#allocation2 + $0x15a] sm:$0xff] }
  0xee   : > { %1016 = vrot.lane.b32.xlu1 %v7267_v53, %s6599_s26  ;;  %9224 = vst [vmem:[#allocation52_spill] sm:$0xff] %v7403_v14  ;;  %9227 = vst [vmem:[#allocation55_spill] sm:$0xff] %v7413_v9  ;;  %v7421_v7 = vld [vmem:[#allocation2 + $0x152] sm:$0xff]  ;;  %v7429_v5 = vld [vmem:[#allocation2 + $0x169] sm:$0xff] }
  0xef   : > { %1014 = vrot.lane.b32.xlu0 %v7269_v54, %s6599_s26  ;;  %9228 = vst [vmem:[#allocation56_spill] sm:$0xff] %v7419_v10  ;;  %9229 = vst [vmem:[#allocation57_spill] sm:$0xff] %v7421_v7  ;;  %v7427_v8 = vld [vmem:[#allocation2 + $0x171] sm:$0xff] }
  0xf0   : > { %9230 = vst [vmem:[#allocation58_spill] sm:$0xff] %v7427_v8  ;;  %9231 = vst [vmem:[#allocation59_spill] sm:$0xff] %v7429_v5  ;;  %v7437_v3 = vld [vmem:[#allocation2 + $0x172] sm:$0xff]  ;;  %v7439_v4 = vld [vmem:[#allocation2 + $0x16a] sm:$0xff] }
  0xf1   : > { %9233 = vst [vmem:[#allocation61_spill] sm:$0xff] %v7437_v3  ;;  %9234 = vst [vmem:[#allocation62_spill] sm:$0xff] %v7439_v4 }
  0xf2   : > { %1144 = vrot.lane.b32.xlu1 %v7275_v55, %s6598_s24 }
  0xf3   : > { %1142 = vrot.lane.b32.xlu0 %v7277_v56, %s6598_s24 }
  0xf6   : > { %1020 = vrot.lane.b32.xlu1 %v7283_v57, %s6599_s26 }
  0xf7   : > { %1018 = vrot.lane.b32.xlu0 %v7285_v58, %s6599_s26 }
  0xfa   : > { %1148 = vrot.lane.b32.xlu1 %v7291_v59, %s6598_s24 }
  0xfb   : > { %1146 = vrot.lane.b32.xlu0 %v7293_v60, %s6598_s24 }
  0xfe   : > { %1024 = vrot.lane.b32.xlu1 %v7299_v61, %s6599_s26 }
  0xff   : > { %1022 = vrot.lane.b32.xlu0 %v7301_v62, %s6599_s26 }
 0x102   : > { %1152 = vrot.lane.b32.xlu1 %v7307_v63, %s6598_s24 }
 0x103   : > { %1150 = vrot.lane.b32.xlu0 %v7309_v0, %s6598_s24 }
 0x106   : > { %1028 = vrot.lane.b32.xlu1 %v7315_v43, %s6599_s26 }
 0x107   : > { %1026 = vrot.lane.b32.xlu0 %v7317_v44, %s6599_s26 }
 0x10a   : > { %1156 = vrot.lane.b32.xlu1 %v7323_v45, %s6598_s24 }
 0x10b   : > { %1154 = vrot.lane.b32.xlu0 %v7325_v47, %s6598_s24 }
 0x10e   : > { %1032 = vrot.lane.b32.xlu1 %v7331_v48, %s6599_s26 }
 0x10f   : > { %1030 = vrot.lane.b32.xlu0 %v7333_v41, %s6599_s26 }
 0x112   : > { %1160 = vrot.lane.b32.xlu1 %v7339_v42, %s6598_s24 }
 0x113   : > { %1158 = vrot.lane.b32.xlu0 %v7341_v38, %s6598_s24 }
 0x116   : > { %1036 = vrot.lane.b32.xlu1 %v7347_v40, %s6599_s26 }
 0x117   : > { %1034 = vrot.lane.b32.xlu0 %v7349_v36, %s6599_s26 }
 0x11a   : > { %1164 = vrot.lane.b32.xlu1 %v7355_v37, %s6598_s24 }
 0x11b   : > { %1162 = vrot.lane.b32.xlu0 %v7357_v23, %s6598_s24 }
 0x11e   : > { %1040 = vrot.lane.b32.xlu1 %v7363_v24, %s6599_s26 }
 0x11f   : > { %1038 = vrot.lane.b32.xlu0 %v7365_v21, %s6599_s26 }
 0x122   : > { %1168 = vrot.lane.b32.xlu1 %v7371_v22, %s6598_s24 }
 0x123   : > { %1166 = vrot.lane.b32.xlu0 %v7373_v19, %s6598_s24 }
 0x126   : > { %1044 = vrot.lane.b32.xlu1 %v7379_v20, %s6599_s26 }
 0x127   : > { %1042 = vrot.lane.b32.xlu0 %v7381_v17, %s6599_s26 }
 0x12a   : > { %1172 = vrot.lane.b32.xlu1 %v7387_v18, %s6598_s24 }
 0x12b   : > { %1170 = vrot.lane.b32.xlu0 %v7389_v15, %s6598_s24 }
 0x12e   : > { %1048 = vrot.lane.b32.xlu1 %v7395_v16, %s6599_s26 }
 0x12f   : > { %1046 = vrot.lane.b32.xlu0 %v7397_v13, %s6599_s26 }
 0x132   : > { %1176 = vrot.lane.b32.xlu1 %v7403_v14, %s6598_s24  ;;  %v932_v14 = vld [vmem:[#allocation2 + $0x181] sm:$0xff] }
 0x133   : > { %1174 = vrot.lane.b32.xlu0 %v7405_v11, %s6598_s24  ;;  %v933_v11 = vld [vmem:[#allocation2 + $0x189] sm:$0xff] }
 0x136   : > { %1052 = vrot.lane.b32.xlu1 %v7411_v12, %s6599_s26 }
 0x137   : > { %1050 = vrot.lane.b32.xlu0 %v7413_v9, %s6599_s26  ;;  %v869_v9 = vld [vmem:[#allocation7 + $0x8] sm:$0xf] }
 0x13a   : > { %1180 = vrot.lane.b32.xlu1 %v7419_v10, %s6598_s24  ;;  %v868_v10 = vld [vmem:[#allocation7] sm:$0xff] }
 0x13b   : > { %1178 = vrot.lane.b32.xlu0 %v7421_v7, %s6598_s24  ;;  %v6121_v12 = vpack.c.bf16 %v869_v9, %v868_v10 }
 0x13d   : > { %6123 = vmatprep.subr.msk.bf16.mxu0 %vm7229_vm5, %v6121_v12 }
 0x13e   : > { %1056 = vrot.lane.b32.xlu1 %v7427_v8, %s6599_s26  ;;  %v7448_v8 = vld [vmem:[#allocation2 + $0x20] sm:$0xff] }
 0x13f   : > { %1054 = vrot.lane.b32.xlu0 %v7429_v5, %s6599_s26  ;;  %9235 = vst [vmem:[#allocation63_spill] sm:$0xff] %v7448_v8 }
 0x140   : > { %v1127_v2 = vpop.permute.xlu1 %1126 }
 0x141   : > { %v999_v1 = vpop.permute.xlu0 %998 }
 0x142   : > { %v1222_v7 = vsel %vm329_vm0, %v7435_v6, %v999_v1  ;;  %1184 = vrot.lane.b32.xlu1 %v7437_v3, %s6598_s24  ;;  %v7461_v6 = vld [vmem:[#allocation2 + $0x38] sm:$0xff]  ;;  %v7477_v3 = vld [vmem:[#allocation2 + $0x50] sm:$0xff] }
 0x143   : > { %1182 = vrot.lane.b32.xlu0 %v7439_v4, %s6598_s24  ;;  %v1254_v5 = vsel %vm835_vm6, %v1222_v7, %v1127_v2  ;;  %v965_v7 = vld [vmem:[#allocation2 + $0x18a] sm:$0xff]  ;;  %9236 = vst [vmem:[#allocation64_spill] sm:$0xff] %v7461_v6 }
 0x144   : > { %5807 = vmatprep.mubr.msk.f32.mxu0 %vm1289_vm7, %v1254_v5  ;;  %v1129_v13 = vpop.permute.xlu1 %1128  ;;  %v964_v5 = vld [vmem:[#allocation2 + $0x182] sm:$0xff]  ;;  %v7463_v4 = vld [vmem:[#allocation2 + $0x30] sm:$0xff] }
 0x145   : > { %v1001_v16 = vpop.permute.xlu0 %1000 }
 0x146   : > { %v1223_v1 = vsel %vm329_vm0, %v7448_v8, %v1001_v16  ;;  %1060 = vrot.lane.b32.xlu1 %v933_v11, %s6599_s26  ;;  %v484_v11 = vld [vmem:[#allocation2 + $0x9] sm:$0xff] }
 0x147   : > { %1058 = vrot.lane.b32.xlu0 %v932_v14, %s6599_s26  ;;  %v1255_v2 = vsel %vm835_vm6, %v1223_v1, %v1129_v13  ;;  %v483_v14 = vld [vmem:[#allocation2 + $0x1] sm:$0xff] }
 0x148   : > { %5808 = vmatmul.mubr.msk.f32.vlgmr.msra.gmra.mrb[0].mxu0 %vm1289_vm7, %v1255_v2  ;;  %v1005_v9 = vpop.permute.xlu1 %1004 }
 0x149   : > { %v1003_v10 = vpop.permute.xlu0 %1002  ;;  %6126 = vmatpush3.bf16.msk.msra.mxu0 %vm7229_vm5, %v6121_v12  ;;  %v1225_v13 = vsel %vm329_vm0, %v7461_v6, %v1005_v9 }
 0x14a   : > { %1188 = vrot.lane.b32.xlu1 %v965_v7, %s6598_s24  ;;  %v1224_v16 = vsel %vm329_vm0, %v7463_v4, %v1003_v10  ;;  %v516_v7 = vld [vmem:[#allocation2 + $0xa] sm:$0xff] }
 0x14b   : > { %1186 = vrot.lane.b32.xlu0 %v964_v5, %s6598_s24  ;;  %v515_v5 = vld [vmem:[#allocation2 + $0x2] sm:$0xff] }
 0x14c   : > { %v1133_v1 = vpop.permute.xlu1 %1132  ;;  %v7479_v10 = vld [vmem:[#allocation2 + $0x48] sm:$0xff] }
 0x14d   : > { %v1131_v2 = vpop.permute.xlu0 %1130  ;;  %v1257_v12 = vsel %vm835_vm6, %v1225_v13, %v1133_v1 }
 0x14e   : > { %v1256_v8 = vsel %vm835_vm6, %v1224_v16, %v1131_v2  ;;  %581 = vrot.lane.b32.xlu1 %v484_v11, %s6599_s26 }
 0x14f   : > { %579 = vrot.lane.b32.xlu0 %v483_v14, %s6599_s26  ;;  %5810 = vmatprep.mubr.msk.f32.mxu0 %vm1289_vm7, %v1256_v8 }
 0x150   : > { %5811 = vmatmul.mubr.msk.f32.gmra.mrb[2].mxu0 %vm1289_vm7, %v1257_v12  ;;  %v1009_v9 = vpop.permute.xlu1 %1008 }
 0x151   : > { %v1007_v6 = vpop.permute.xlu0 %1006  ;;  %v1227_v11 = vsel %vm329_vm0, %v7477_v3, %v1009_v9 }
 0x152   : > { %709 = vrot.lane.b32.xlu1 %v516_v7, %s6598_s24  ;;  %v1226_v8 = vsel %vm329_vm0, %v7479_v10, %v1007_v6  ;;  %v7495_v7 = vld [vmem:[#allocation2 + $0x68] sm:$0xff]  ;;  %v7497_v6 = vld [vmem:[#allocation2 + $0x60] sm:$0xff] }
 0x153   : > { %707 = vrot.lane.b32.xlu0 %v515_v5, %s6598_s24 }
 0x154   : > { %v1137_v14 = vpop.permute.xlu1 %1136 }
 0x155   : > { %v1135_v13 = vpop.permute.xlu0 %1134  ;;  %v1259_v16 = vsel %vm835_vm6, %v1227_v11, %v1137_v14  ;;  %v7515_v14 = vld [vmem:[#allocation2 + $0x80] sm:$0xff] }
 0x156   : > { %v1258_v1 = vsel %vm835_vm6, %v1226_v8, %v1135_v13  ;;  %585 = vrot.lane.b32.xlu1 %v7164_v28, %s6599_s26  ;;  %v7517_v13 = vld [vmem:[#allocation2 + $0x78] sm:$0xff] }
 0x157   : > { %5813 = vmatprep.mubr.msk.f32.mxu0 %vm1289_vm7, %v1258_v1  ;;  %583 = vrot.lane.b32.xlu0 %v7150_v26, %s6599_s26 }
 0x158   : > { %5814 = vmatmul.mubr.msk.f32.gmra.mrb[4].mxu0 %vm1289_vm7, %v1259_v16  ;;  %v1013_v2 = vpop.permute.xlu1 %1012 }
 0x159   : > { %v1011_v12 = vpop.permute.xlu0 %1010  ;;  %v1229_v28 = vsel %vm329_vm0, %v7495_v7, %v1013_v2 }
 0x15a   : > { %713 = vrot.lane.b32.xlu1 %v7162_v27, %s6598_s24  ;;  %v1228_v26 = vsel %vm329_vm0, %v7497_v6, %v1011_v12 }
 0x15b   : > { %711 = vrot.lane.b32.xlu0 %v7148_v25, %s6598_s24 }
 0x15c   : > { %v1141_v5 = vpop.permute.xlu1 %1140 }
 0x15d   : > { %v1139_v9 = vpop.permute.xlu0 %1138  ;;  %v1261_v11 = vsel %vm835_vm6, %v1229_v28, %v1141_v5  ;;  %v7535_v28 = vld [vmem:[#allocation2 + $0x98] sm:$0xff] }
 0x15e   : > { %v1260_v8 = vsel %vm835_vm6, %v1228_v26, %v1139_v9  ;;  %589 = vrot.lane.b32.xlu1 %v7170_v29, %s6599_s26  ;;  %v7537_v26 = vld [vmem:[#allocation2 + $0x90] sm:$0xff] }
 0x15f   : > { %5816 = vmatprep.mubr.msk.f32.mxu0 %vm1289_vm7, %v1260_v8  ;;  %587 = vrot.lane.b32.xlu0 %v7172_v30, %s6599_s26 }
 0x160   : > { %5817 = vmatmul.mubr.msk.f32.gmra.mrb[6].mxu0 %vm1289_vm7, %v1261_v11  ;;  %v1017_v25 = vpop.permute.xlu1 %1016 }
 0x161   : > { %v1015_v27 = vpop.permute.xlu0 %1014  ;;  %v1231_v29 = vsel %vm329_vm0, %v7515_v14, %v1017_v25  ;;  %v7555_v25 = vld [vmem:[#allocation2 + $0xb0] sm:$0xff] }
 0x162   : > { %717 = vrot.lane.b32.xlu1 %v7178_v31, %s6598_s24  ;;  %v1230_v30 = vsel %vm329_vm0, %v7517_v13, %v1015_v27  ;;  %v7557_v27 = vld [vmem:[#allocation2 + $0xa8] sm:$0xff] }
 0x163   : > { %715 = vrot.lane.b32.xlu0 %v7180_v32, %s6598_s24 }
 0x164   : > { %v1145_v16 = vpop.permute.xlu1 %1144 }
 0x165   : > { %v1143_v1 = vpop.permute.xlu0 %1142  ;;  %v1263_v2 = vsel %vm835_vm6, %v1231_v29, %v1145_v16 }
 0x166   : > { %v1262_v12 = vsel %vm835_vm6, %v1230_v30, %v1143_v1  ;;  %593 = vrot.lane.b32.xlu1 %v7186_v33, %s6599_s26 }
 0x167   : > { %5819 = vmatprep.mubr.msk.f32.mxu0 %vm1289_vm7, %v1262_v12  ;;  %591 = vrot.lane.b32.xlu0 %v7188_v34, %s6599_s26  ;;  %v7577_v12 = vld [vmem:[#allocation2 + $0xc0] sm:$0xff] }
 0x168   : > { %5820 = vmatmul.mubr.msk.f32.gmra.mrb[8].mxu0 %vm1289_vm7, %v1263_v2  ;;  %v1021_v31 = vpop.permute.xlu1 %1020  ;;  %v7575_v2 = vld [vmem:[#allocation2 + $0xc8] sm:$0xff] }
 0x169   : > { %v1019_v32 = vpop.permute.xlu0 %1018  ;;  %v1233_v33 = vsel %vm329_vm0, %v7535_v28, %v1021_v31 }
 0x16a   : > { %721 = vrot.lane.b32.xlu1 %v7190_v35, %s6598_s24  ;;  %v1232_v34 = vsel %vm329_vm0, %v7537_v26, %v1019_v32 }
 0x16b   : > { %719 = vrot.lane.b32.xlu0 %v7205_v39, %s6598_s24 }
 0x16c   : > { %v1149_v5 = vpop.permute.xlu1 %1148 }
 0x16d   : > { %v1147_v9 = vpop.permute.xlu0 %1146  ;;  %v1265_v11 = vsel %vm835_vm6, %v1233_v33, %v1149_v5  ;;  %v7595_v5 = vld [vmem:[#allocation2 + $0xe0] sm:$0xff] }
 0x16e   : > { %v1264_v8 = vsel %vm835_vm6, %v1232_v34, %v1147_v9  ;;  %597 = vrot.lane.b32.xlu1 %v7247_v49, %s6599_s26  ;;  %v7597_v9 = vld [vmem:[#allocation2 + $0xd8] sm:$0xff] }
 0x16f   : > { %5822 = vmatprep.mubr.msk.f32.mxu0 %vm1289_vm7, %v1264_v8  ;;  %595 = vrot.lane.b32.xlu0 %v7249_v50, %s6599_s26 }
 0x170   : > { %5823 = vmatmul.mubr.msk.f32.gmra.mrb[10].mxu0 %vm1289_vm7, %v1265_v11  ;;  %v1025_v35 = vpop.permute.xlu1 %1024 }
 0x171   : > { %v1023_v39 = vpop.permute.xlu0 %1022  ;;  %v1235_v49 = vsel %vm329_vm0, %v7555_v25, %v1025_v35 }
 0x172   : > { %725 = vrot.lane.b32.xlu1 %v7259_v51, %s6598_s24  ;;  %v1234_v50 = vsel %vm329_vm0, %v7557_v27, %v1023_v39 }
 0x173   : > { %723 = vrot.lane.b32.xlu0 %v7261_v52, %s6598_s24 }
 0x174   : > { %v1153_v29 = vpop.permute.xlu1 %1152 }
 0x175   : > { %v1151_v30 = vpop.permute.xlu0 %1150  ;;  %v1267_v16 = vsel %vm835_vm6, %v1235_v49, %v1153_v29  ;;  %v2358_v49 = vld [vmem:[#allocation7 + $0x28] sm:$0xf] }
 0x176   : > { %v1266_v1 = vsel %vm835_vm6, %v1234_v50, %v1151_v30  ;;  %601 = vrot.lane.b32.xlu1 %v7267_v53, %s6599_s26  ;;  %v7617_v30 = vld [vmem:[#allocation2 + $0xf8] sm:$0xff] }
 0x177   : > { %5825 = vmatprep.mubr.msk.f32.mxu0 %vm1289_vm7, %v1266_v1  ;;  %599 = vrot.lane.b32.xlu0 %v7269_v54, %s6599_s26 }
 0x178   : > { %5826 = vmatmul.mubr.msk.f32.gmra.mrb[12].mxu0 %vm1289_vm7, %v1267_v16  ;;  %v1029_v51 = vpop.permute.xlu1 %1028  ;;  %v7619_v16 = vld [vmem:[#allocation2 + $0xf0] sm:$0xff] }
 0x179   : > { %v1027_v52 = vpop.permute.xlu0 %1026  ;;  %v1237_v53 = vsel %vm329_vm0, %v7575_v2, %v1029_v51 }
 0x17a   : > { %729 = vrot.lane.b32.xlu1 %v7275_v55, %s6598_s24  ;;  %v1236_v54 = vsel %vm329_vm0, %v7577_v12, %v1027_v52 }
 0x17b   : > { %727 = vrot.lane.b32.xlu0 %v7277_v56, %s6598_s24 }
 0x17c   : > { %v1157_v31 = vpop.permute.xlu1 %1156 }
 0x17d   : > { %v1155_v32 = vpop.permute.xlu0 %1154  ;;  %v1269_v33 = vsel %vm835_vm6, %v1237_v53, %v1157_v31  ;;  %v7642_v31 = vld [vmem:[#allocation2 + $0x108] sm:$0xff] }
 0x17e   : > { %v1268_v34 = vsel %vm835_vm6, %v1236_v54, %v1155_v32  ;;  %605 = vrot.lane.b32.xlu1 %v7283_v57, %s6599_s26  ;;  %v7640_v54 = vld [vmem:[#allocation2 + $0x110] sm:$0xff] }
 0x17f   : > { %5828 = vmatprep.mubr.msk.f32.mxu0 %vm1289_vm7, %v1268_v34  ;;  %603 = vrot.lane.b32.xlu0 %v7285_v58, %s6599_s26 }
 0x180   : > { %5829 = vmatmul.mubr.msk.f32.gmra.mrb[14].mxu0 %vm1289_vm7, %v1269_v33  ;;  %v1033_v55 = vpop.permute.xlu1 %1032 }
 0x181   : > { %v1031_v56 = vpop.permute.xlu0 %1030  ;;  %v1239_v57 = vsel %vm329_vm0, %v7595_v5, %v1033_v55 }
 0x182   : > { %733 = vrot.lane.b32.xlu1 %v7291_v59, %s6598_s24  ;;  %v1238_v58 = vsel %vm329_vm0, %v7597_v9, %v1031_v56  ;;  %v2357_v59 = vld [vmem:[#allocation7 + $0x20] sm:$0xff]  ;;  %v7660_v56 = vld [vmem:[#allocation2 + $0x128] sm:$0xff] }
 0x183   : > { %731 = vrot.lane.b32.xlu0 %v7293_v60, %s6598_s24  ;;  %v7615_v60 = vpack.c.bf16 %v2358_v49, %v2357_v59  ;;  %v7682_v59 = vld [vmem:[#allocation2 + $0x138] sm:$0xff] }
 0x184   : > { %v1161_v11 = vpop.permute.xlu1 %1160 }
 0x185   : > { %v1159_v8 = vpop.permute.xlu0 %1158  ;;  %v1271_v35 = vsel %vm835_vm6, %v1239_v57, %v1161_v11  ;;  %6129 = vmatprep.subr.msk.bf16.mxu0 %vm7229_vm5, %v7615_v60  ;;  %v7662_v57 = vld [vmem:[#allocation2 + $0x120] sm:$0xff] }
 0x186   : > { %v1270_v39 = vsel %vm835_vm6, %v1238_v58, %v1159_v8  ;;  %609 = vrot.lane.b32.xlu1 %v7299_v61, %s6599_s26 }
 0x187   : > { %5831 = vmatprep.mubr.msk.f32.mxu0 %vm1289_vm7, %v1270_v39  ;;  %607 = vrot.lane.b32.xlu0 %v7301_v62, %s6599_s26  ;;  %v7680_v39 = vld [vmem:[#allocation2 + $0x140] sm:$0xff] }
 0x188   : > { %5832 = vmatmul.mubr.msk.f32.gmra.mrb[16].mxu0 %vm1289_vm7, %v1271_v35  ;;  %v1037_v50 = vpop.permute.xlu1 %1036 }
 0x189   : > { %v1035_v29 = vpop.permute.xlu0 %1034  ;;  %v1241_v61 = vsel %vm329_vm0, %v7617_v30, %v1037_v50 }
 0x18a   : > { %737 = vrot.lane.b32.xlu1 %v7307_v63, %s6598_s24  ;;  %v1240_v62 = vsel %vm329_vm0, %v7619_v16, %v1035_v29 }
 0x18b   : > { %735 = vrot.lane.b32.xlu0 %v7309_v0, %s6598_s24 }
 0x18c   : > { %v1165_v1 = vpop.permute.xlu1 %1164 }
 0x18d   : > { %v1163_v51 = vpop.permute.xlu0 %1162  ;;  %v1273_v52 = vsel %vm835_vm6, %v1241_v61, %v1165_v1  ;;  %v7702_v1 = vld [vmem:[#allocation2 + $0x150] sm:$0xff] }
 0x18e   : > { %v1272_v53 = vsel %vm835_vm6, %v1240_v62, %v1163_v51  ;;  %613 = vrot.lane.b32.xlu1 %v7315_v43, %s6599_s26  ;;  %v7700_v62 = vld [vmem:[#allocation2 + $0x158] sm:$0xff] }
 0x18f   : > { %5834 = vmatprep.mubr.msk.f32.mxu0 %vm1289_vm7, %v1272_v53  ;;  %611 = vrot.lane.b32.xlu0 %v7317_v44, %s6599_s26 }
 0x190   : > { %5835 = vmatmul.mubr.msk.f32.gmra.mrb[18].mxu0 %vm1289_vm7, %v1273_v52  ;;  %v1041_v63 = vpop.permute.xlu1 %1040 }
 0x191   : > { %v1039_v0 = vpop.permute.xlu0 %1038  ;;  %v1243_v43 = vsel %vm329_vm0, %v7640_v54, %v1041_v63 }
 0x192   : > { %741 = vrot.lane.b32.xlu1 %v7323_v45, %s6598_s24  ;;  %v1242_v44 = vsel %vm329_vm0, %v7642_v31, %v1039_v0  ;;  %v7720_v0 = vld [vmem:[#allocation2 + $0x170] sm:$0xff] }
 0x193   : > { %739 = vrot.lane.b32.xlu0 %v7325_v47, %s6598_s24 }
 0x194   : > { %v1169_v32 = vpop.permute.xlu1 %1168 }
 0x195   : > { %v1167_v33 = vpop.permute.xlu0 %1166  ;;  %v1275_v34 = vsel %vm835_vm6, %v1243_v43, %v1169_v32  ;;  %v7722_v43 = vld [vmem:[#allocation2 + $0x168] sm:$0xff] }
 0x196   : > { %v1274_v55 = vsel %vm835_vm6, %v1242_v44, %v1167_v33  ;;  %617 = vrot.lane.b32.xlu1 %v7331_v48, %s6599_s26 }
 0x197   : > { %5837 = vmatprep.mubr.msk.f32.mxu0 %vm1289_vm7, %v1274_v55  ;;  %615 = vrot.lane.b32.xlu0 %v7333_v41, %s6599_s26  ;;  %v9237_v55 = vld [vmem:[#allocation50_spill] sm:$0xff] }
 0x198   : > { %5838 = vmatmul.mubr.msk.f32.gmra.mrb[20].mxu0 %vm1289_vm7, %v1275_v34  ;;  %v1045_v47 = vpop.permute.xlu1 %1044 }
 0x199   : > { %v1043_v45 = vpop.permute.xlu0 %1042  ;;  %v1245_v48 = vsel %vm329_vm0, %v7660_v56, %v1045_v47 }
 0x19a   : > { %745 = vrot.lane.b32.xlu1 %v7339_v42, %s6598_s24  ;;  %v1244_v41 = vsel %vm329_vm0, %v7662_v57, %v1043_v45  ;;  %v901_v45 = vld [vmem:[#allocation2 + $0x188] sm:$0xff] }
 0x19b   : > { %743 = vrot.lane.b32.xlu0 %v7341_v38, %s6598_s24 }
 0x19c   : > { %v1173_v58 = vpop.permute.xlu1 %1172 }
 0x19d   : > { %v1171_v11 = vpop.permute.xlu0 %1170  ;;  %v1277_v8 = vsel %vm835_vm6, %v1245_v48, %v1173_v58  ;;  %v900_v48 = vld [vmem:[#allocation2 + $0x180] sm:$0xff]  ;;  %v9240_v58 = vld [vmem:[#allocation53_spill] sm:$0xff] }
 0x19e   : > { %v1276_v35 = vsel %vm835_vm6, %v1244_v41, %v1171_v11  ;;  %621 = vrot.lane.b32.xlu1 %v7347_v40, %s6599_s26  ;;  %v9239_v41 = vld [vmem:[#allocation52_spill] sm:$0xff] }
 0x19f   : > { %5840 = vmatprep.mubr.msk.f32.mxu0 %vm1289_vm7, %v1276_v35  ;;  %619 = vrot.lane.b32.xlu0 %v7349_v36, %s6599_s26 }
 0x1a0   : > { %5841 = vmatmul.mubr.msk.f32.gmra.mrb[22].mxu0 %vm1289_vm7, %v1277_v8  ;;  %v1049_v38 = vpop.permute.xlu1 %1048 }
 0x1a1   : > { %v1047_v42 = vpop.permute.xlu0 %1046  ;;  %v1247_v40 = vsel %vm329_vm0, %v7680_v39, %v1049_v38 }
 0x1a2   : > { %749 = vrot.lane.b32.xlu1 %v7355_v37, %s6598_s24  ;;  %v1246_v36 = vsel %vm329_vm0, %v7682_v59, %v1047_v42 }
 0x1a3   : > { %747 = vrot.lane.b32.xlu0 %v7357_v23, %s6598_s24 }
 0x1a4   : > { %v1177_v49 = vpop.permute.xlu1 %1176 }
 0x1a5   : > { %v1175_v50 = vpop.permute.xlu0 %1174  ;;  %v1279_v29 = vsel %vm835_vm6, %v1247_v40, %v1177_v49  ;;  %v9242_v49 = vld [vmem:[#allocation55_spill] sm:$0xff] }
 0x1a6   : > { %v1278_v61 = vsel %vm835_vm6, %v1246_v36, %v1175_v50  ;;  %625 = vrot.lane.b32.xlu1 %v7363_v24, %s6599_s26  ;;  %v9241_v36 = vld [vmem:[#allocation54_spill] sm:$0xff] }
 0x1a7   : > { %5843 = vmatprep.mubr.msk.f32.mxu0 %vm1289_vm7, %v1278_v61  ;;  %623 = vrot.lane.b32.xlu0 %v7365_v21, %s6599_s26  ;;  %v452_v61 = vld [vmem:[#allocation2 + $0x8] sm:$0xff] }
 0x1a8   : > { %5844 = vmatmul.mubr.msk.f32.gmra.mrb[24].mxu0 %vm1289_vm7, %v1279_v29  ;;  %v1053_v23 = vpop.permute.xlu1 %1052 }
 0x1a9   : > { %v1051_v37 = vpop.permute.xlu0 %1050  ;;  %v1249_v24 = vsel %vm329_vm0, %v7700_v62, %v1053_v23  ;;  %v451_v23 = vld [vmem:[#allocation2] sm:$0xff] }
 0x1aa   : > { %753 = vrot.lane.b32.xlu1 %v7371_v22, %s6598_s24  ;;  %v1248_v21 = vsel %vm329_vm0, %v7702_v1, %v1051_v37  ;;  %v9243_v37 = vld [vmem:[#allocation56_spill] sm:$0xff] }
 0x1ab   : > { %751 = vrot.lane.b32.xlu0 %v7373_v19, %s6598_s24 }
 0x1ac   : > { %v1181_v51 = vpop.permute.xlu1 %1180 }
 0x1ad   : > { %v1179_v52 = vpop.permute.xlu0 %1178  ;;  %v1281_v53 = vsel %vm835_vm6, %v1249_v24, %v1181_v51  ;;  %v9244_v24 = vld [vmem:[#allocation57_spill] sm:$0xff] }
 0x1ae   : > { %v1280_v63 = vsel %vm835_vm6, %v1248_v21, %v1179_v52  ;;  %629 = vrot.lane.b32.xlu1 %v7379_v20, %s6599_s26 }
 0x1af   : > { %5846 = vmatprep.mubr.msk.f32.mxu0 %vm1289_vm7, %v1280_v63  ;;  %627 = vrot.lane.b32.xlu0 %v7381_v17, %s6599_s26 }
 0x1b0   : > { %5847 = vmatmul.mubr.msk.f32.gmra.mrb[26].mxu0 %vm1289_vm7, %v1281_v53  ;;  %v1057_v19 = vpop.permute.xlu1 %1056 }
 0x1b1   : > { %v1055_v22 = vpop.permute.xlu0 %1054  ;;  %v1251_v20 = vsel %vm329_vm0, %v7720_v0, %v1057_v19 }
 0x1b2   : > { %757 = vrot.lane.b32.xlu1 %v7387_v18, %s6598_s24  ;;  %v1250_v17 = vsel %vm329_vm0, %v7722_v43, %v1055_v22  ;;  %v9238_v18 = vld [vmem:[#allocation51_spill] sm:$0xff]  ;;  %v9245_v22 = vld [vmem:[#allocation58_spill] sm:$0xff] }
 0x1b3   : > { %755 = vrot.lane.b32.xlu0 %v7389_v15, %s6598_s24 }
 0x1b4   : > { %v1185_v44 = vpop.permute.xlu1 %1184 }
 0x1b5   : > { %v1183_v32 = vpop.permute.xlu0 %1182  ;;  %v1283_v33 = vsel %vm835_vm6, %v1251_v20, %v1185_v44  ;;  %v9246_v20 = vld [vmem:[#allocation59_spill] sm:$0xff] }
 0x1b6   : > { %v1282_v34 = vsel %vm835_vm6, %v1250_v17, %v1183_v32  ;;  %633 = vrot.lane.b32.xlu1 %v9237_v55, %s6599_s26  ;;  %v9247_v32 = vld [vmem:[#allocation61_spill] sm:$0xff]  ;;  %v9249_v55 = vld [vmem:[#allocation63_spill] sm:$0xff] }
 0x1b7   : > { %5849 = vmatprep.mubr.msk.f32.mxu0 %vm1289_vm7, %v1282_v34  ;;  %631 = vrot.lane.b32.xlu0 %v9238_v18, %s6599_s26  ;;  %v1973_v34 = vld [vmem:[#allocation2 + $0x39] sm:$0xff] }
 0x1b8   : > { %5850 = vmatmul.mubr.msk.f32.gmra.mrb[28].mxu0 %vm1289_vm7, %v1283_v33  ;;  %v1061_v15 = vpop.permute.xlu1 %1060  ;;  %v9248_v33 = vld [vmem:[#allocation62_spill] sm:$0xff] }
 0x1b9   : > { %v1059_v47 = vpop.permute.xlu0 %1058  ;;  %v1253_v11 = vsel %vm329_vm0, %v901_v45, %v1061_v15  ;;  %v9250_v45 = vld [vmem:[#allocation60_spill] sm:$0xff] }
 0x1ba   : > { %761 = vrot.lane.b32.xlu1 %v9239_v41, %s6598_s24  ;;  %v1252_v8 = vsel %vm329_vm0, %v900_v48, %v1059_v47  ;;  %v1972_v47 = vld [vmem:[#allocation2 + $0x31] sm:$0xff] }
 0x1bb   : > { %759 = vrot.lane.b32.xlu0 %v9240_v58, %s6598_s24 }
 0x1bc   : > { %v1189_v35 = vpop.permute.xlu1 %1188 }
 0x1bd   : > { %v1187_v38 = vpop.permute.xlu0 %1186  ;;  %v1285_v42 = vsel %vm835_vm6, %v1253_v11, %v1189_v35  ;;  %v2005_v11 = vld [vmem:[#allocation2 + $0x3a] sm:$0xff]  ;;  %v2004_v35 = vld [vmem:[#allocation2 + $0x32] sm:$0xff] }
 0x1be   : > { %v1284_v40 = vsel %vm835_vm6, %v1252_v8, %v1187_v38  ;;  %637 = vrot.lane.b32.xlu1 %v9241_v36, %s6599_s26 }
 0x1bf   : > { %5852 = vmatprep.mubr.msk.f32.mxu0 %vm1289_vm7, %v1284_v40  ;;  %635 = vrot.lane.b32.xlu0 %v9242_v49, %s6599_s26  ;;  %v9251_v40 = vld [vmem:[#allocation64_spill] sm:$0xff] }
 0x1c0   : > { %5853 = vmatmul.mubr.msk.f32.gmra.mrb[30].mxu0 %vm1289_vm7, %v1285_v42  ;;  %v582_v50 = vpop.permute.xlu1 %581  ;;  %v1975_v42 = vld [vmem:[#allocation2 + $0x51] sm:$0xff] }
 0x1c1   : > { %v580_v29 = vpop.permute.xlu0 %579  ;;  %v804_v21 = vsel %vm329_vm0, %v452_v61, %v582_v50  ;;  %v1974_v50 = vld [vmem:[#allocation2 + $0x49] sm:$0xff] }
 0x1c2   : > { %765 = vrot.lane.b32.xlu1 %v9243_v37, %s6598_s24  ;;  %v803_v51 = vsel %vm329_vm0, %v451_v23, %v580_v29 }
 0x1c3   : > { %763 = vrot.lane.b32.xlu0 %v9244_v24, %s6598_s24  ;;  %v2007_v24 = vld [vmem:[#allocation2 + $0x52] sm:$0xff] }
 0x1c4   : > { %v710_v52 = vpop.permute.xlu1 %709 }
 0x1c5   : > { %v708_v53 = vpop.permute.xlu0 %707  ;;  %v837_v63 = vsel %vm835_vm6, %v804_v21, %v710_v52 }
 0x1c6   : > { %v836_v19 = vsel %vm835_vm6, %v803_v51, %v708_v53  ;;  %641 = vrot.lane.b32.xlu1 %v9245_v22, %s6599_s26  ;;  %v2006_v51 = vld [vmem:[#allocation2 + $0x4a] sm:$0xff] }
 0x1c7   : > { %5859 = vmatprep.mubr.msk.f32.mxu0 %vm1289_vm7, %v836_v19  ;;  %639 = vrot.lane.b32.xlu0 %v9246_v20, %s6599_s26  ;;  %v1976_v19 = vld [vmem:[#allocation2 + $0x61] sm:$0xff] }
 0x1c8   : > { %5860 = vmatmul.mubr.msk.f32.vlgmr.msra.gmra.mrb[0].mxu0 %vm1289_vm7, %v837_v63  ;;  %v586_v17 = vpop.permute.xlu1 %585 }
 0x1c9   : > { %6132 = vmatpush3.bf16.msk.msra.mxu0 %vm7229_vm5, %v7615_v60  ;;  %v584_v44 = vpop.permute.xlu0 %583  ;;  %v806_v18 = vsel %vm329_vm0, %v9249_v55, %v586_v17 }
 0x1ca   : > { %769 = vrot.lane.b32.xlu1 %v9247_v32, %s6598_s24  ;;  %v805_v48 = vsel %vm329_vm0, %v9250_v45, %v584_v44  ;;  %v2009_v32 = vld [vmem:[#allocation2 + $0x6a] sm:$0xff] }
 0x1cb   : > { %767 = vrot.lane.b32.xlu0 %v9248_v33, %s6598_s24  ;;  %v2008_v33 = vld [vmem:[#allocation2 + $0x62] sm:$0xff] }
 0x1cc   : > { %v714_v15 = vpop.permute.xlu1 %713 }
 0x1cd   : > { %v839_v41 = vsel %vm835_vm6, %v806_v18, %v714_v15  ;;  %v712_v58 = vpop.permute.xlu0 %711  ;;  %v1978_v15 = vld [vmem:[#allocation2 + $0x79] sm:$0xff] }
 0x1ce   : > { %v838_v60 = vsel %vm835_vm6, %v805_v48, %v712_v58  ;;  %2070 = vrot.lane.b32.xlu1 %v1973_v34, %s6599_s26  ;;  %v2011_v58 = vld [vmem:[#allocation2 + $0x82] sm:$0xff] }
 0x1cf   : > { %2068 = vrot.lane.b32.xlu0 %v1972_v47, %s6599_s26  ;;  %5862 = vmatprep.mubr.msk.f32.mxu0 %vm1289_vm7, %v838_v60  ;;  %v2010_v60 = vld [vmem:[#allocation2 + $0x7a] sm:$0xff] }
 0x1d0   : > { %5863 = vmatmul.mubr.msk.f32.gmra.mrb[2].mxu0 %vm1289_vm7, %v839_v41  ;;  %v590_v8 = vpop.permute.xlu1 %589 }
 0x1d1   : > { %v588_v38 = vpop.permute.xlu0 %587  ;;  %v808_v36 = vsel %vm329_vm0, %v9251_v40, %v590_v8 }
 0x1d2   : > { %2198 = vrot.lane.b32.xlu1 %v2005_v11, %s6598_s24  ;;  %v807_v29 = vsel %vm329_vm0, %v7463_v4, %v588_v38  ;;  %v1977_v4 = vld [vmem:[#allocation2 + $0x69] sm:$0xff]  ;;  %v1980_v38 = vld [vmem:[#allocation2 + $0x91] sm:$0xff] }
 0x1d3   : > { %2196 = vrot.lane.b32.xlu0 %v2004_v35, %s6598_s24 }
 0x1d4   : > { %v718_v49 = vpop.permute.xlu1 %717 }
 0x1d5   : > { %v841_v61 = vsel %vm835_vm6, %v808_v36, %v718_v49  ;;  %v716_v23 = vpop.permute.xlu0 %715 }
 0x1d6   : > { %v840_v37 = vsel %vm835_vm6, %v807_v29, %v716_v23  ;;  %2074 = vrot.lane.b32.xlu1 %v1975_v42, %s6599_s26  ;;  %v2012_v29 = vld [vmem:[#allocation2 + $0x92] sm:$0xff] }
 0x1d7   : > { %2072 = vrot.lane.b32.xlu0 %v1974_v50, %s6599_s26  ;;  %5865 = vmatprep.mubr.msk.f32.mxu0 %vm1289_vm7, %v840_v37  ;;  %v2013_v50 = vld [vmem:[#allocation2 + $0x9a] sm:$0xff] }
 0x1d8   : > { %5866 = vmatmul.mubr.msk.f32.gmra.mrb[4].mxu0 %vm1289_vm7, %v841_v61  ;;  %v594_v21 = vpop.permute.xlu1 %593 }
 0x1d9   : > { %v592_v52 = vpop.permute.xlu0 %591  ;;  %v810_v53 = vsel %vm329_vm0, %v7477_v3, %v594_v21 }
 0x1da   : > { %2202 = vrot.lane.b32.xlu1 %v2007_v24, %s6598_s24  ;;  %v809_v22 = vsel %vm329_vm0, %v7479_v10, %v592_v52  ;;  %v1979_v10 = vld [vmem:[#allocation2 + $0x81] sm:$0xff]  ;;  %v1982_v24 = vld [vmem:[#allocation2 + $0xa9] sm:$0xff] }
 0x1db   : > { %2200 = vrot.lane.b32.xlu0 %v2006_v51, %s6598_s24 }
 0x1dc   : > { %v722_v63 = vpop.permute.xlu1 %721 }
 0x1dd   : > { %v843_v20 = vsel %vm835_vm6, %v810_v53, %v722_v63  ;;  %v720_v17 = vpop.permute.xlu0 %719  ;;  %v2015_v53 = vld [vmem:[#allocation2 + $0xb2] sm:$0xff]  ;;  %v2014_v63 = vld [vmem:[#allocation2 + $0xaa] sm:$0xff] }
 0x1de   : > { %v842_v44 = vsel %vm835_vm6, %v809_v22, %v720_v17  ;;  %2078 = vrot.lane.b32.xlu1 %v1977_v4, %s6599_s26  ;;  %v1984_v17 = vld [vmem:[#allocation2 + $0xc1] sm:$0xff] }
 0x1df   : > { %2076 = vrot.lane.b32.xlu0 %v1976_v19, %s6599_s26  ;;  %5868 = vmatprep.mubr.msk.f32.mxu0 %vm1289_vm7, %v842_v44 }
 0x1e0   : > { %5869 = vmatmul.mubr.msk.f32.gmra.mrb[6].mxu0 %vm1289_vm7, %v843_v20  ;;  %v598_v3 = vpop.permute.xlu1 %597 }
 0x1e1   : > { %v596_v34 = vpop.permute.xlu0 %595  ;;  %v812_v55 = vsel %vm329_vm0, %v7495_v7, %v598_v3 }
 0x1e2   : > { %2206 = vrot.lane.b32.xlu1 %v2009_v32, %s6598_s24  ;;  %v811_v47 = vsel %vm329_vm0, %v7497_v6, %v596_v34  ;;  %v1981_v6 = vld [vmem:[#allocation2 + $0x99] sm:$0xff]  ;;  %v2017_v34 = vld [vmem:[#allocation2 + $0xca] sm:$0xff] }
 0x1e3   : > { %2204 = vrot.lane.b32.xlu0 %v2008_v33, %s6598_s24 }
 0x1e4   : > { %v726_v18 = vpop.permute.xlu1 %725 }
 0x1e5   : > { %v845_v45 = vsel %vm835_vm6, %v812_v55, %v726_v18  ;;  %v724_v48 = vpop.permute.xlu0 %723 }
 0x1e6   : > { %v844_v41 = vsel %vm835_vm6, %v811_v47, %v724_v48  ;;  %2082 = vrot.lane.b32.xlu1 %v1979_v10, %s6599_s26  ;;  %v2016_v10 = vld [vmem:[#allocation2 + $0xc2] sm:$0xff]  ;;  %v1986_v47 = vld [vmem:[#allocation2 + $0xd9] sm:$0xff] }
 0x1e7   : > { %2080 = vrot.lane.b32.xlu0 %v1978_v15, %s6599_s26  ;;  %5871 = vmatprep.mubr.msk.f32.mxu0 %vm1289_vm7, %v844_v41 }
 0x1e8   : > { %5872 = vmatmul.mubr.msk.f32.gmra.mrb[8].mxu0 %vm1289_vm7, %v845_v45  ;;  %v602_v7 = vpop.permute.xlu1 %601 }
 0x1e9   : > { %v600_v11 = vpop.permute.xlu0 %599  ;;  %v814_v8 = vsel %vm329_vm0, %v7515_v14, %v602_v7  ;;  %v2019_v7 = vld [vmem:[#allocation2 + $0xe2] sm:$0xff] }
 0x1ea   : > { %2210 = vrot.lane.b32.xlu1 %v2011_v58, %s6598_s24  ;;  %v813_v42 = vsel %vm329_vm0, %v7517_v13, %v600_v11  ;;  %v1983_v13 = vld [vmem:[#allocation2 + $0xb1] sm:$0xff] }
 0x1eb   : > { %2208 = vrot.lane.b32.xlu0 %v2010_v60, %s6598_s24  ;;  %v2018_v60 = vld [vmem:[#allocation2 + $0xda] sm:$0xff] }
 0x1ec   : > { %v730_v35 = vpop.permute.xlu1 %729 }
 0x1ed   : > { %v847_v40 = vsel %vm835_vm6, %v814_v8, %v730_v35  ;;  %v728_v36 = vpop.permute.xlu0 %727  ;;  %v1988_v35 = vld [vmem:[#allocation2 + $0xf1] sm:$0xff] }
 0x1ee   : > { %v846_v49 = vsel %vm835_vm6, %v813_v42, %v728_v36  ;;  %2086 = vrot.lane.b32.xlu1 %v1981_v6, %s6599_s26 }
 0x1ef   : > { %2084 = vrot.lane.b32.xlu0 %v1980_v38, %s6599_s26  ;;  %5874 = vmatprep.mubr.msk.f32.mxu0 %vm1289_vm7, %v846_v49  ;;  %v2021_v49 = vld [vmem:[#allocation2 + $0xfa] sm:$0xff] }
 0x1f0   : > { %5875 = vmatmul.mubr.msk.f32.gmra.mrb[10].mxu0 %vm1289_vm7, %v847_v40  ;;  %v606_v14 = vpop.permute.xlu1 %605 }
 0x1f1   : > { %v604_v61 = vpop.permute.xlu0 %603  ;;  %v816_v23 = vsel %vm329_vm0, %v7535_v28, %v606_v14 }
 0x1f2   : > { %2214 = vrot.lane.b32.xlu1 %v2013_v50, %s6598_s24  ;;  %v815_v21 = vsel %vm329_vm0, %v7537_v26, %v604_v61  ;;  %v1985_v26 = vld [vmem:[#allocation2 + $0xc9] sm:$0xff]  ;;  %v2020_v50 = vld [vmem:[#allocation2 + $0xf2] sm:$0xff] }
 0x1f3   : > { %2212 = vrot.lane.b32.xlu0 %v2012_v29, %s6598_s24 }
 0x1f4   : > { %v734_v37 = vpop.permute.xlu1 %733 }
 0x1f5   : > { %v849_v51 = vsel %vm835_vm6, %v816_v23, %v734_v37  ;;  %v732_v52 = vpop.permute.xlu0 %731 }
 0x1f6   : > { %v848_v4 = vsel %vm835_vm6, %v815_v21, %v732_v52  ;;  %2090 = vrot.lane.b32.xlu1 %v1983_v13, %s6599_s26  ;;  %v1990_v13 = vld [vmem:[#allocation2 + $0x109] sm:$0xff] }
 0x1f7   : > { %2088 = vrot.lane.b32.xlu0 %v1982_v24, %s6599_s26  ;;  %5877 = vmatprep.mubr.msk.f32.mxu0 %vm1289_vm7, %v848_v4  ;;  %v2022_v52 = vld [vmem:[#allocation2 + $0x10a] sm:$0xff] }
 0x1f8   : > { %5878 = vmatmul.mubr.msk.f32.gmra.mrb[12].mxu0 %vm1289_vm7, %v849_v51  ;;  %v610_v28 = vpop.permute.xlu1 %609  ;;  %v2023_v51 = vld [vmem:[#allocation2 + $0x112] sm:$0xff] }
 0x1f9   : > { %v608_v19 = vpop.permute.xlu0 %607  ;;  %v818_v22 = vsel %vm329_vm0, %v7555_v25, %v610_v28 }
 0x1fa   : > { %2218 = vrot.lane.b32.xlu1 %v2015_v53, %s6598_s24  ;;  %v817_v44 = vsel %vm329_vm0, %v7557_v27, %v608_v19  ;;  %v1987_v27 = vld [vmem:[#allocation2 + $0xe1] sm:$0xff] }
 0x1fb   : > { %2216 = vrot.lane.b32.xlu0 %v2014_v63, %s6598_s24  ;;  %v1992_v63 = vld [vmem:[#allocation2 + $0x121] sm:$0xff] }
 0x1fc   : > { %v738_v20 = vpop.permute.xlu1 %737 }
 0x1fd   : > { %v851_v32 = vsel %vm835_vm6, %v818_v22, %v738_v20  ;;  %v736_v3 = vpop.permute.xlu0 %735 }
 0x1fe   : > { %v850_v33 = vsel %vm835_vm6, %v817_v44, %v736_v3  ;;  %2094 = vrot.lane.b32.xlu1 %v1985_v26, %s6599_s26  ;;  %v2024_v44 = vld [vmem:[#allocation2 + $0x122] sm:$0xff] }
 0x1ff   : > { %2092 = vrot.lane.b32.xlu0 %v1984_v17, %s6599_s26  ;;  %5880 = vmatprep.mubr.msk.f32.mxu0 %vm1289_vm7, %v850_v33  ;;  %v2025_v17 = vld [vmem:[#allocation2 + $0x12a] sm:$0xff] }
 0x200   : > { %5881 = vmatmul.mubr.msk.f32.gmra.mrb[14].mxu0 %vm1289_vm7, %v851_v32  ;;  %v614_v25 = vpop.permute.xlu1 %613 }
 0x201   : > { %v612_v55 = vpop.permute.xlu0 %611  ;;  %v820_v18 = vsel %vm329_vm0, %v7575_v2, %v614_v25 }
 0x202   : > { %2222 = vrot.lane.b32.xlu1 %v2017_v34, %s6598_s24  ;;  %v819_v45 = vsel %vm329_vm0, %v7577_v12, %v612_v55  ;;  %v1989_v12 = vld [vmem:[#allocation2 + $0xf9] sm:$0xff] }
 0x203   : > { %2220 = vrot.lane.b32.xlu0 %v2016_v10, %s6598_s24  ;;  %v1994_v34 = vld [vmem:[#allocation2 + $0x139] sm:$0xff] }
 0x204   : > { %v742_v15 = vpop.permute.xlu1 %741 }
 0x205   : > { %v853_v48 = vsel %vm835_vm6, %v820_v18, %v742_v15  ;;  %v740_v41 = vpop.permute.xlu0 %739  ;;  %v2027_v18 = vld [vmem:[#allocation2 + $0x142] sm:$0xff]  ;;  %v2026_v15 = vld [vmem:[#allocation2 + $0x13a] sm:$0xff] }
 0x206   : > { %v852_v58 = vsel %vm835_vm6, %v819_v45, %v740_v41  ;;  %2098 = vrot.lane.b32.xlu1 %v1987_v27, %s6599_s26  ;;  %v1996_v41 = vld [vmem:[#allocation2 + $0x151] sm:$0xff] }
 0x207   : > { %2096 = vrot.lane.b32.xlu0 %v1986_v47, %s6599_s26  ;;  %5883 = vmatprep.mubr.msk.f32.mxu0 %vm1289_vm7, %v852_v58 }
 0x208   : > { %5884 = vmatmul.mubr.msk.f32.gmra.mrb[16].mxu0 %vm1289_vm7, %v853_v48  ;;  %v618_v2 = vpop.permute.xlu1 %617 }
 0x209   : > { %v616_v11 = vpop.permute.xlu0 %615  ;;  %v822_v6 = vsel %vm329_vm0, %v7595_v5, %v618_v2 }
 0x20a   : > { %2226 = vrot.lane.b32.xlu1 %v2019_v7, %s6598_s24  ;;  %v821_v38 = vsel %vm329_vm0, %v7597_v9, %v616_v11  ;;  %v1991_v9 = vld [vmem:[#allocation2 + $0x111] sm:$0xff]  ;;  %v2029_v11 = vld [vmem:[#allocation2 + $0x15a] sm:$0xff] }
 0x20b   : > { %2224 = vrot.lane.b32.xlu0 %v2018_v60, %s6598_s24 }
 0x20c   : > { %v746_v8 = vpop.permute.xlu1 %745 }
 0x20d   : > { %v855_v42 = vsel %vm835_vm6, %v822_v6, %v746_v8  ;;  %v744_v40 = vpop.permute.xlu0 %743 }
 0x20e   : > { %v854_v36 = vsel %vm835_vm6, %v821_v38, %v744_v40  ;;  %2102 = vrot.lane.b32.xlu1 %v1989_v12, %s6599_s26  ;;  %v2028_v12 = vld [vmem:[#allocation2 + $0x152] sm:$0xff]  ;;  %v1998_v38 = vld [vmem:[#allocation2 + $0x169] sm:$0xff] }
 0x20f   : > { %2100 = vrot.lane.b32.xlu0 %v1988_v35, %s6599_s26  ;;  %5886 = vmatprep.mubr.msk.f32.mxu0 %vm1289_vm7, %v854_v36 }
 0x210   : > { %5887 = vmatmul.mubr.msk.f32.gmra.mrb[18].mxu0 %vm1289_vm7, %v855_v42  ;;  %v622_v5 = vpop.permute.xlu1 %621 }
 0x211   : > { %v620_v14 = vpop.permute.xlu0 %619  ;;  %v824_v29 = vsel %vm329_vm0, %v7617_v30, %v622_v5  ;;  %v2031_v5 = vld [vmem:[#allocation2 + $0x172] sm:$0xff] }
 0x212   : > { %2230 = vrot.lane.b32.xlu1 %v2021_v49, %s6598_s24  ;;  %v823_v23 = vsel %vm329_vm0, %v7619_v16, %v620_v14  ;;  %v1993_v16 = vld [vmem:[#allocation2 + $0x129] sm:$0xff] }
 0x213   : > { %2228 = vrot.lane.b32.xlu0 %v2020_v50, %s6598_s24  ;;  %v2030_v50 = vld [vmem:[#allocation2 + $0x16a] sm:$0xff] }
 0x214   : > { %v750_v61 = vpop.permute.xlu1 %749 }
 0x215   : > { %v857_v37 = vsel %vm835_vm6, %v824_v29, %v750_v61  ;;  %v748_v24 = vpop.permute.xlu0 %747  ;;  %v2000_v61 = vld [vmem:[#allocation2 + $0x181] sm:$0xff] }
 0x216   : > { %v856_v21 = vsel %vm835_vm6, %v823_v23, %v748_v24  ;;  %2106 = vrot.lane.b32.xlu1 %v1991_v9, %s6599_s26 }
 0x217   : > { %2104 = vrot.lane.b32.xlu0 %v1990_v13, %s6599_s26  ;;  %5889 = vmatprep.mubr.msk.f32.mxu0 %vm1289_vm7, %v856_v21  ;;  %v2033_v21 = vld [vmem:[#allocation2 + $0x18a] sm:$0xff] }
 0x218   : > { %5890 = vmatmul.mubr.msk.f32.gmra.mrb[20].mxu0 %vm1289_vm7, %v857_v37  ;;  %v626_v30 = vpop.permute.xlu1 %625 }
 0x219   : > { %v624_v4 = vpop.permute.xlu0 %623  ;;  %v826_v53 = vsel %vm329_vm0, %v7640_v54, %v626_v30  ;;  %v1941_v30 = vld [vmem:[#allocation2 + $0x38] sm:$0xff] }
 0x21a   : > { %2234 = vrot.lane.b32.xlu1 %v2023_v51, %s6598_s24  ;;  %v825_v19 = vsel %vm329_vm0, %v7642_v31, %v624_v4  ;;  %v1995_v31 = vld [vmem:[#allocation2 + $0x141] sm:$0xff]  ;;  %v1940_v4 = vld [vmem:[#allocation2 + $0x30] sm:$0xff] }
 0x21b   : > { %2232 = vrot.lane.b32.xlu0 %v2022_v52, %s6598_s24  ;;  %v2032_v51 = vld [vmem:[#allocation2 + $0x182] sm:$0xff] }
 0x21c   : > { %v754_v28 = vpop.permute.xlu1 %753 }
 0x21d   : > { %v859_v26 = vsel %vm835_vm6, %v826_v53, %v754_v28  ;;  %v752_v22 = vpop.permute.xlu0 %751  ;;  %v2002_v28 = vld [vmem:[#allocation2 + $0x199] sm:$0xff] }
 0x21e   : > { %v858_v20 = vsel %vm835_vm6, %v825_v19, %v752_v22  ;;  %2110 = vrot.lane.b32.xlu1 %v1993_v16, %s6599_s26 }
 0x21f   : > { %2108 = vrot.lane.b32.xlu0 %v1992_v63, %s6599_s26  ;;  %5892 = vmatprep.mubr.msk.f32.mxu0 %vm1289_vm7, %v858_v20  ;;  %v1943_v20 = vld [vmem:[#allocation2 + $0x50] sm:$0xff] }
 0x220   : > { %5893 = vmatmul.mubr.msk.f32.gmra.mrb[22].mxu0 %vm1289_vm7, %v859_v26  ;;  %v630_v54 = vpop.permute.xlu1 %629 }
 0x221   : > { %v628_v32 = vpop.permute.xlu0 %627  ;;  %v828_v3 = vsel %vm329_vm0, %v7660_v56, %v630_v54  ;;  %v1942_v54 = vld [vmem:[#allocation2 + $0x48] sm:$0xff] }
 0x222   : > { %2238 = vrot.lane.b32.xlu1 %v2025_v17, %s6598_s24  ;;  %v827_v25 = vsel %vm329_vm0, %v7662_v57, %v628_v32  ;;  %v1997_v57 = vld [vmem:[#allocation2 + $0x159] sm:$0xff]  ;;  %v2035_v17 = vld [vmem:[#allocation2 + $0x1a2] sm:$0xff] }
 0x223   : > { %2236 = vrot.lane.b32.xlu0 %v2024_v44, %s6598_s24  ;;  %v2034_v32 = vld [vmem:[#allocation2 + $0x19a] sm:$0xff] }
 0x224   : > { %v758_v33 = vpop.permute.xlu1 %757 }
 0x225   : > { %v861_v10 = vsel %vm835_vm6, %v828_v3, %v758_v33  ;;  %v756_v55 = vpop.permute.xlu0 %755 }
 0x226   : > { %v860_v27 = vsel %vm835_vm6, %v827_v25, %v756_v55  ;;  %2114 = vrot.lane.b32.xlu1 %v1995_v31, %s6599_s26 }
 0x227   : > { %2112 = vrot.lane.b32.xlu0 %v1994_v34, %s6599_s26  ;;  %5895 = vmatprep.mubr.msk.f32.mxu0 %vm1289_vm7, %v860_v27  ;;  %v1945_v27 = vld [vmem:[#allocation2 + $0x68] sm:$0xff] }
 0x228   : > { %5896 = vmatmul.mubr.msk.f32.gmra.mrb[24].mxu0 %vm1289_vm7, %v861_v10  ;;  %v634_v56 = vpop.permute.xlu1 %633 }
 0x229   : > { %v632_v47 = vpop.permute.xlu0 %631  ;;  %v830_v45 = vsel %vm329_vm0, %v7680_v39, %v634_v56 }
 0x22a   : > { %2242 = vrot.lane.b32.xlu1 %v2027_v18, %s6598_s24  ;;  %v829_v58 = vsel %vm329_vm0, %v7682_v59, %v632_v47  ;;  %v1999_v59 = vld [vmem:[#allocation2 + $0x171] sm:$0xff]  ;;  %v1944_v18 = vld [vmem:[#allocation2 + $0x60] sm:$0xff] }
 0x22b   : > { %2240 = vrot.lane.b32.xlu0 %v2026_v15, %s6598_s24 }
 0x22c   : > { %v762_v48 = vpop.permute.xlu1 %761 }
 0x22d   : > { %v863_v7 = vsel %vm835_vm6, %v830_v45, %v762_v48  ;;  %v760_v2 = vpop.permute.xlu0 %759 }
 0x22e   : > { %v862_v60 = vsel %vm835_vm6, %v829_v58, %v760_v2  ;;  %2118 = vrot.lane.b32.xlu1 %v1997_v57, %s6599_s26  ;;  %v1946_v2 = vld [vmem:[#allocation2 + $0x78] sm:$0xff] }
 0x22f   : > { %2116 = vrot.lane.b32.xlu0 %v1996_v41, %s6599_s26  ;;  %5898 = vmatprep.mubr.msk.f32.mxu0 %vm1289_vm7, %v862_v60 }
 0x230   : > { %5899 = vmatmul.mubr.msk.f32.gmra.mrb[26].mxu0 %vm1289_vm7, %v863_v7  ;;  %v638_v39 = vpop.permute.xlu1 %637  ;;  %v1947_v7 = vld [vmem:[#allocation2 + $0x80] sm:$0xff] }
 0x231   : > { %v636_v6 = vpop.permute.xlu0 %635  ;;  %v832_v8 = vsel %vm329_vm0, %v7700_v62, %v638_v39 }
 0x232   : > { %2246 = vrot.lane.b32.xlu1 %v2029_v11, %s6598_s24  ;;  %v831_v42 = vsel %vm329_vm0, %v7702_v1, %v636_v6  ;;  %v2001_v1 = vld [vmem:[#allocation2 + $0x189] sm:$0xff] }
 0x233   : > { %2244 = vrot.lane.b32.xlu0 %v2028_v12, %s6598_s24 }
 0x234   : > { %v766_v35 = vpop.permute.xlu1 %765 }
 0x235   : > { %v865_v40 = vsel %vm835_vm6, %v832_v8, %v766_v35  ;;  %v764_v36 = vpop.permute.xlu0 %763 }
 0x236   : > { %v864_v49 = vsel %vm835_vm6, %v831_v42, %v764_v36  ;;  %2122 = vrot.lane.b32.xlu1 %v1999_v59, %s6599_s26  ;;  %v1948_v42 = vld [vmem:[#allocation2 + $0x90] sm:$0xff] }
 0x237   : > { %2120 = vrot.lane.b32.xlu0 %v1998_v38, %s6599_s26  ;;  %5901 = vmatprep.mubr.msk.f32.mxu0 %vm1289_vm7, %v864_v49  ;;  %v1949_v38 = vld [vmem:[#allocation2 + $0x98] sm:$0xff] }
 0x238   : > { %5902 = vmatmul.mubr.msk.f32.gmra.mrb[28].mxu0 %vm1289_vm7, %v865_v40  ;;  %v642_v62 = vpop.permute.xlu1 %641 }
 0x239   : > { %v640_v14 = vpop.permute.xlu0 %639  ;;  %v834_v9 = vsel %vm329_vm0, %v7720_v0, %v642_v62 }
 0x23a   : > { %2250 = vrot.lane.b32.xlu1 %v2031_v5, %s6598_s24  ;;  %v833_v13 = vsel %vm329_vm0, %v7722_v43, %v640_v14  ;;  %v2003_v43 = vld [vmem:[#allocation2 + $0x1a1] sm:$0xff] }
 0x23b   : > { %2248 = vrot.lane.b32.xlu0 %v2030_v50, %s6598_s24 }
 0x23c   : > { %v770_v29 = vpop.permute.xlu1 %769 }
 0x23d   : > { %v867_v23 = vsel %vm835_vm6, %v834_v9, %v770_v29  ;;  %v768_v37 = vpop.permute.xlu0 %767  ;;  %v1951_v9 = vld [vmem:[#allocation2 + $0xb0] sm:$0xff]  ;;  %v1950_v29 = vld [vmem:[#allocation2 + $0xa8] sm:$0xff] }
 0x23e   : > { %v866_v24 = vsel %vm835_vm6, %v833_v13, %v768_v37  ;;  %2126 = vrot.lane.b32.xlu1 %v2001_v1, %s6599_s26 }
 0x23f   : > { %2124 = vrot.lane.b32.xlu0 %v2000_v61, %s6599_s26  ;;  %5904 = vmatprep.mubr.msk.f32.mxu0 %vm1289_vm7, %v866_v24 }
 0x240   : > { %5905 = vmatmul.mubr.msk.f32.gmra.mrb[30].mxu0 %vm1289_vm7, %v867_v23  ;;  %v2071_v0 = vpop.permute.xlu1 %2070 }
 0x241   : > { %v2069_v52 = vpop.permute.xlu0 %2068  ;;  %v2293_v16 = vsel %vm329_vm0, %v1941_v30, %v2071_v0  ;;  %v1953_v30 = vld [vmem:[#allocation2 + $0xc8] sm:$0xff] }
 0x242   : > { %2254 = vrot.lane.b32.xlu1 %v2033_v21, %s6598_s24  ;;  %v2292_v63 = vsel %vm329_vm0, %v1940_v4, %v2069_v52  ;;  %v1952_v52 = vld [vmem:[#allocation2 + $0xc0] sm:$0xff] }
 0x243   : > { %2252 = vrot.lane.b32.xlu0 %v2032_v51, %s6598_s24 }
 0x244   : > { %v2199_v53 = vpop.permute.xlu1 %2198 }
 0x245   : > { %v2325_v19 = vsel %vm835_vm6, %v2293_v16, %v2199_v53  ;;  %v2197_v26 = vpop.permute.xlu0 %2196 }
 0x246   : > { %v2324_v22 = vsel %vm835_vm6, %v2292_v63, %v2197_v26  ;;  %2130 = vrot.lane.b32.xlu1 %v2003_v43, %s6599_s26 }
 0x247   : > { %2128 = vrot.lane.b32.xlu0 %v2002_v28, %s6599_s26  ;;  %5911 = vmatprep.mubr.msk.f32.mxu0 %vm1289_vm7, %v2324_v22  ;;  %v1955_v22 = vld [vmem:[#allocation2 + $0xe0] sm:$0xff] }
 0x248   : > { %5912 = vmatmul.mubr.msk.f32.vlgmr.msra.gmra.mrb[0].mxu0 %vm1289_vm7, %v2325_v19  ;;  %v2075_v44 = vpop.permute.xlu1 %2074 }
 0x249   : > { %v2073_v31 = vpop.permute.xlu0 %2072  ;;  %v2295_v3 = vsel %vm329_vm0, %v1943_v20, %v2075_v44  ;;  %v1954_v20 = vld [vmem:[#allocation2 + $0xd8] sm:$0xff] }
 0x24a   : > { %2258 = vrot.lane.b32.xlu1 %v2035_v17, %s6598_s24  ;;  %v2294_v33 = vsel %vm329_vm0, %v1942_v54, %v2073_v31 }
 0x24b   : > { %2256 = vrot.lane.b32.xlu0 %v2034_v32, %s6598_s24 }
 0x24c   : > { %v2203_v34 = vpop.permute.xlu1 %2202 }
 0x24d   : > { %v2201_v25 = vpop.permute.xlu0 %2200  ;;  %v2327_v10 = vsel %vm835_vm6, %v2295_v3, %v2203_v34 }
 0x24e   : > { %v2326_v55 = vsel %vm835_vm6, %v2294_v33, %v2201_v25  ;;  %v1957_v25 = vld [vmem:[#allocation2 + $0xf8] sm:$0xff] }
 0x24f   : > { %5914 = vmatprep.mubr.msk.f32.mxu0 %vm1289_vm7, %v2326_v55 }
 0x250   : > { %5915 = vmatmul.mubr.msk.f32.gmra.mrb[2].mxu0 %vm1289_vm7, %v2327_v10  ;;  %v2079_v56 = vpop.permute.xlu1 %2078  ;;  %v1956_v10 = vld [vmem:[#allocation2 + $0xf0] sm:$0xff] }
 0x251   : > { %v2077_v15 = vpop.permute.xlu0 %2076  ;;  %v2297_v47 = vsel %vm329_vm0, %v1945_v27, %v2079_v56 }
 0x252   : > { %v2296_v57 = vsel %vm329_vm0, %v1944_v18, %v2077_v15 }
 0x254   : > { %v2207_v45 = vpop.permute.xlu1 %2206 }
 0x255   : > { %v2205_v48 = vpop.permute.xlu0 %2204  ;;  %v2329_v41 = vsel %vm835_vm6, %v2297_v47, %v2207_v45 }
 0x256   : > { %v2328_v58 = vsel %vm835_vm6, %v2296_v57, %v2205_v48  ;;  %v1959_v48 = vld [vmem:[#allocation2 + $0x110] sm:$0xff] }
 0x257   : > { %5917 = vmatprep.mubr.msk.f32.mxu0 %vm1289_vm7, %v2328_v58 }
 0x258   : > { %5918 = vmatmul.mubr.msk.f32.gmra.mrb[4].mxu0 %vm1289_vm7, %v2329_v41  ;;  %v2083_v60 = vpop.permute.xlu1 %2082  ;;  %v1958_v41 = vld [vmem:[#allocation2 + $0x108] sm:$0xff] }
 0x259   : > { %v2081_v11 = vpop.permute.xlu0 %2080  ;;  %v2299_v39 = vsel %vm329_vm0, %v1947_v7, %v2083_v60 }
 0x25a   : > { %v2298_v12 = vsel %vm329_vm0, %v1946_v2, %v2081_v11 }
 0x25c   : > { %v2211_v6 = vpop.permute.xlu1 %2210 }
 0x25d   : > { %v2209_v59 = vpop.permute.xlu0 %2208  ;;  %v2331_v8 = vsel %vm835_vm6, %v2299_v39, %v2211_v6 }
 0x25e   : > { %v2330_v35 = vsel %vm835_vm6, %v2298_v12, %v2209_v59  ;;  %v1961_v59 = vld [vmem:[#allocation2 + $0x128] sm:$0xff] }
 0x25f   : > { %5920 = vmatprep.mubr.msk.f32.mxu0 %vm1289_vm7, %v2330_v35 }
 0x260   : > { %5921 = vmatmul.mubr.msk.f32.gmra.mrb[6].mxu0 %vm1289_vm7, %v2331_v8  ;;  %v2087_v40 = vpop.permute.xlu1 %2086  ;;  %v1960_v8 = vld [vmem:[#allocation2 + $0x120] sm:$0xff] }
 0x261   : > { %v2085_v36 = vpop.permute.xlu0 %2084  ;;  %v2301_v49 = vsel %vm329_vm0, %v1949_v38, %v2087_v40 }
 0x262   : > { %v2300_v5 = vsel %vm329_vm0, %v1948_v42, %v2085_v36 }
 0x264   : > { %v2215_v62 = vpop.permute.xlu1 %2214 }
 0x265   : > { %v2213_v50 = vpop.permute.xlu0 %2212  ;;  %v2333_v14 = vsel %vm835_vm6, %v2301_v49, %v2215_v62 }
 0x266   : > { %v2332_v1 = vsel %vm835_vm6, %v2300_v5, %v2213_v50  ;;  %v1963_v50 = vld [vmem:[#allocation2 + $0x140] sm:$0xff] }
 0x267   : > { %5923 = vmatprep.mubr.msk.f32.mxu0 %vm1289_vm7, %v2332_v1 }
 0x268   : > { %5924 = vmatmul.mubr.msk.f32.gmra.mrb[8].mxu0 %vm1289_vm7, %v2333_v14  ;;  %v2091_v61 = vpop.permute.xlu1 %2090  ;;  %v1962_v14 = vld [vmem:[#allocation2 + $0x138] sm:$0xff] }
 0x269   : > { %v2089_v13 = vpop.permute.xlu0 %2088  ;;  %v2303_v23 = vsel %vm329_vm0, %v1951_v9, %v2091_v61 }
 0x26a   : > { %v2302_v37 = vsel %vm329_vm0, %v1950_v29, %v2089_v13 }
 0x26c   : > { %v2219_v24 = vpop.permute.xlu1 %2218 }
 0x26d   : > { %v2217_v21 = vpop.permute.xlu0 %2216  ;;  %v2335_v0 = vsel %vm835_vm6, %v2303_v23, %v2219_v24  ;;  %v2851_v24 = vld [vmem:[#allocation3 + $0x1] sm:$0xff] }
 0x26e   : > { %v2334_v51 = vsel %vm835_vm6, %v2302_v37, %v2217_v21  ;;  %2947 = vrot.lane.b32.xlu0 %v2851_v24, %s6599_s26 }
 0x26f   : > { %5926 = vmatprep.mubr.msk.f32.mxu0 %vm1289_vm7, %v2334_v51  ;;  %v1965_v51 = vld [vmem:[#allocation2 + $0x158] sm:$0xff] }
 0x270   : > { %5927 = vmatmul.mubr.msk.f32.gmra.mrb[10].mxu0 %vm1289_vm7, %v2335_v0  ;;  %v2095_v4 = vpop.permute.xlu1 %2094  ;;  %v2852_v0 = vld [vmem:[#allocation3 + $0x9] sm:$0xff] }
 0x271   : > { %v2093_v43 = vpop.permute.xlu0 %2092  ;;  %v2305_v16 = vsel %vm329_vm0, %v1953_v30, %v2095_v4  ;;  %2949 = vrot.lane.b32.xlu1 %v2852_v0, %s6599_s26  ;;  %v1964_v30 = vld [vmem:[#allocation2 + $0x150] sm:$0xff] }
 0x272   : > { %v2304_v53 = vsel %vm329_vm0, %v1952_v52, %v2093_v43  ;;  %v2883_v43 = vld [vmem:[#allocation3 + $0x2] sm:$0xff] }
 0x273   : > { %3075 = vrot.lane.b32.xlu0 %v2883_v43, %s6598_s24 }
 0x274   : > { %v2223_v28 = vpop.permute.xlu1 %2222 }
 0x275   : > { %v2221_v63 = vpop.permute.xlu0 %2220  ;;  %v2337_v19 = vsel %vm835_vm6, %v2305_v16, %v2223_v28  ;;  %v2884_v16 = vld [vmem:[#allocation3 + $0xa] sm:$0xff] }
 0x276   : > { %v2336_v26 = vsel %vm835_vm6, %v2304_v53, %v2221_v63  ;;  %3077 = vrot.lane.b32.xlu1 %v2884_v16, %s6598_s24 }
 0x277   : > { %5929 = vmatprep.mubr.msk.f32.mxu0 %vm1289_vm7, %v2336_v26 }
 0x278   : > { %5930 = vmatmul.mubr.msk.f32.gmra.mrb[12].mxu0 %vm1289_vm7, %v2337_v19  ;;  %v2099_v17 = vpop.permute.xlu1 %2098 }
 0x279   : > { %v2097_v54 = vpop.permute.xlu0 %2096  ;;  %v2307_v44 = vsel %vm329_vm0, %v1955_v22, %v2099_v17  ;;  %v1966_v17 = vld [vmem:[#allocation2 + $0x168] sm:$0xff] }
 0x27a   : > { %v2306_v32 = vsel %vm329_vm0, %v1954_v20, %v2097_v54  ;;  %v1967_v20 = vld [vmem:[#allocation2 + $0x170] sm:$0xff] }
 0x27c   : > { %v2227_v31 = vpop.permute.xlu1 %2226 }
 0x27d   : > { %v2225_v3 = vpop.permute.xlu0 %2224  ;;  %v2339_v33 = vsel %vm835_vm6, %v2307_v44, %v2227_v31 }
 0x27e   : > { %v2338_v34 = vsel %vm835_vm6, %v2306_v32, %v2225_v3 }
 0x27f   : > { %5932 = vmatprep.mubr.msk.f32.mxu0 %vm1289_vm7, %v2338_v34 }
 0x280   : > { %5933 = vmatmul.mubr.msk.f32.gmra.mrb[14].mxu0 %vm1289_vm7, %v2339_v33  ;;  %v2103_v55 = vpop.permute.xlu1 %2102 }
 0x281   : > { %v2101_v27 = vpop.permute.xlu0 %2100  ;;  %v2309_v18 = vsel %vm329_vm0, %v1957_v25, %v2103_v55  ;;  %v1968_v55 = vld [vmem:[#allocation2 + $0x180] sm:$0xff] }
 0x282   : > { %v2308_v56 = vsel %vm329_vm0, %v1956_v10, %v2101_v27  ;;  %v1969_v10 = vld [vmem:[#allocation2 + $0x188] sm:$0xff] }
 0x284   : > { %v2231_v15 = vpop.permute.xlu1 %2230 }
 0x285   : > { %v2229_v47 = vpop.permute.xlu0 %2228  ;;  %v2341_v57 = vsel %vm835_vm6, %v2309_v18, %v2231_v15 }
 0x286   : > { %v2340_v45 = vsel %vm835_vm6, %v2308_v56, %v2229_v47 }
 0x287   : > { %5935 = vmatprep.mubr.msk.f32.mxu0 %vm1289_vm7, %v2340_v45 }
 0x288   : > { %5936 = vmatmul.mubr.msk.f32.gmra.mrb[16].mxu0 %vm1289_vm7, %v2341_v57  ;;  %v2107_v58 = vpop.permute.xlu1 %2106 }
 0x289   : > { %v2105_v7 = vpop.permute.xlu0 %2104  ;;  %v2311_v2 = vsel %vm329_vm0, %v1959_v48, %v2107_v58  ;;  %v1970_v58 = vld [vmem:[#allocation2 + $0x198] sm:$0xff] }
 0x28a   : > { %v2310_v60 = vsel %vm329_vm0, %v1958_v41, %v2105_v7  ;;  %v1971_v41 = vld [vmem:[#allocation2 + $0x1a0] sm:$0xff] }
 0x28c   : > { %v2235_v11 = vpop.permute.xlu1 %2234 }
 0x28d   : > { %v2233_v39 = vpop.permute.xlu0 %2232  ;;  %v2343_v12 = vsel %vm835_vm6, %v2311_v2, %v2235_v11 }
 0x28e   : > { %v2342_v6 = vsel %vm835_vm6, %v2310_v60, %v2233_v39 }
 0x28f   : > { %5938 = vmatprep.mubr.msk.f32.mxu0 %vm1289_vm7, %v2342_v6 }
 0x290   : > { %5939 = vmatmul.mubr.msk.f32.gmra.mrb[18].mxu0 %vm1289_vm7, %v2343_v12  ;;  %v2111_v35 = vpop.permute.xlu1 %2110 }
 0x291   : > { %v2109_v38 = vpop.permute.xlu0 %2108  ;;  %v2313_v42 = vsel %vm329_vm0, %v1961_v59, %v2111_v35 }
 0x292   : > { %v2312_v40 = vsel %vm329_vm0, %v1960_v8, %v2109_v38  ;;  %v8059_v8 = vld [vmem:[#allocation9] ss:$0 sm:$0xff] }
 0x294   : > { %v2239_v36 = vpop.permute.xlu1 %2238 }
 0x295   : > { %v2237_v49 = vpop.permute.xlu0 %2236  ;;  %v2345_v5 = vsel %vm835_vm6, %v2313_v42, %v2239_v36  ;;  %v3655_v36 = vld [vmem:[#allocation10 + $0x18] sm:$0xf] }
 0x296   : > { %v2344_v62 = vsel %vm835_vm6, %v2312_v40, %v2237_v49  ;;  %v3654_v40 = vld [vmem:[#allocation10 + $0x10] sm:$0xff] }
 0x297   : > { %5941 = vmatprep.mubr.msk.f32.mxu0 %vm1289_vm7, %v2344_v62 }
 0x298   : > { %5942 = vmatmul.mubr.msk.f32.gmra.mrb[20].mxu0 %vm1289_vm7, %v2345_v5  ;;  %v2115_v1 = vpop.permute.xlu1 %2114  ;;  %v6133_v5 = vpack.c.bf16 %v3655_v36, %v3654_v40 }
 0x299   : > { %v2113_v9 = vpop.permute.xlu0 %2112  ;;  %v2315_v29 = vsel %vm329_vm0, %v1963_v50, %v2115_v1 }
 0x29a   : > { %v2314_v61 = vsel %vm329_vm0, %v1962_v14, %v2113_v9  ;;  %6135 = vmatprep.subr.msk.bf16.mxu1 %vm7229_vm5, %v6133_v5 }
 0x29b   : > { %6138 = vmatpush3.bf16.msk.msra.mxu1 %vm7229_vm5, %v6133_v5 }
 0x29c   : > { %v2243_v13 = vpop.permute.xlu1 %2242 }
 0x29d   : > { %v2241_v23 = vpop.permute.xlu0 %2240  ;;  %v2347_v37 = vsel %vm835_vm6, %v2315_v29, %v2243_v13 }
 0x29e   : > { %v2346_v21 = vsel %vm835_vm6, %v2314_v61, %v2241_v23 }
 0x29f   : > { %5944 = vmatprep.mubr.msk.f32.mxu0 %vm1289_vm7, %v2346_v21 }
 0x2a0   : > { %5945 = vmatmul.mubr.msk.f32.gmra.mrb[22].mxu0 %vm1289_vm7, %v2347_v37  ;;  %v2119_v52 = vpop.permute.xlu1 %2118 }
 0x2a1   : > { %v2117_v4 = vpop.permute.xlu0 %2116  ;;  %v2317_v53 = vsel %vm329_vm0, %v1965_v51, %v2119_v52 }
 0x2a2   : > { %v2316_v28 = vsel %vm329_vm0, %v1964_v30, %v2117_v4 }
 0x2a4   : > { %v2247_v63 = vpop.permute.xlu1 %2246 }
 0x2a5   : > { %v2245_v19 = vpop.permute.xlu0 %2244  ;;  %v2349_v26 = vsel %vm835_vm6, %v2317_v53, %v2247_v63 }
 0x2a6   : > { %v2348_v22 = vsel %vm835_vm6, %v2316_v28, %v2245_v19 }
 0x2a7   : > { %5947 = vmatprep.mubr.msk.f32.mxu0 %vm1289_vm7, %v2348_v22 }
 0x2a8   : > { %5948 = vmatmul.mubr.msk.f32.gmra.mrb[24].mxu0 %vm1289_vm7, %v2349_v26  ;;  %v2123_v54 = vpop.permute.xlu1 %2122 }
 0x2a9   : > { %v2121_v44 = vpop.permute.xlu0 %2120  ;;  %v2319_v32 = vsel %vm329_vm0, %v1967_v20, %v2123_v54 }
 0x2aa   : > { %v2318_v31 = vsel %vm329_vm0, %v1966_v17, %v2121_v44 }
 0x2ac   : > { %v2251_v3 = vpop.permute.xlu1 %2250 }
 0x2ad   : > { %v2249_v33 = vpop.permute.xlu0 %2248  ;;  %v2351_v34 = vsel %vm835_vm6, %v2319_v32, %v2251_v3 }
 0x2ae   : > { %v2350_v25 = vsel %vm835_vm6, %v2318_v31, %v2249_v33 }
 0x2af   : > { %5950 = vmatprep.mubr.msk.f32.mxu0 %vm1289_vm7, %v2350_v25 }
 0x2b0   : > { %5951 = vmatmul.mubr.msk.f32.gmra.mrb[26].mxu0 %vm1289_vm7, %v2351_v34  ;;  %v2127_v27 = vpop.permute.xlu1 %2126 }
 0x2b1   : > { %v2125_v18 = vpop.permute.xlu0 %2124  ;;  %v2321_v56 = vsel %vm329_vm0, %v1969_v10, %v2127_v27 }
 0x2b2   : > { %v2320_v15 = vsel %vm329_vm0, %v1968_v55, %v2125_v18 }
 0x2b4   : > { %v2255_v47 = vpop.permute.xlu1 %2254 }
 0x2b5   : > { %v2253_v57 = vpop.permute.xlu0 %2252  ;;  %v2353_v45 = vsel %vm835_vm6, %v2321_v56, %v2255_v47 }
 0x2b6   : > { %v2352_v48 = vsel %vm835_vm6, %v2320_v15, %v2253_v57 }
 0x2b7   : > { %5953 = vmatprep.mubr.msk.f32.mxu0 %vm1289_vm7, %v2352_v48 }
 0x2b8   : > { %5954 = vmatmul.mubr.msk.f32.gmra.mrb[28].mxu0 %vm1289_vm7, %v2353_v45  ;;  %v2131_v7 = vpop.permute.xlu1 %2130 }
 0x2b9   : > { %v2129_v2 = vpop.permute.xlu0 %2128  ;;  %v2323_v60 = vsel %vm329_vm0, %v1971_v41, %v2131_v7 }
 0x2ba   : > { %v2322_v11 = vsel %vm329_vm0, %v1970_v58, %v2129_v2 }
 0x2bc   : > { %v2259_v39 = vpop.permute.xlu1 %2258 }
 0x2bd   : > { %v2257_v12 = vpop.permute.xlu0 %2256  ;;  %v2355_v6 = vsel %vm835_vm6, %v2323_v60, %v2259_v39 }
 0x2be   : > { %v2354_v59 = vsel %vm835_vm6, %v2322_v11, %v2257_v12 }
 0x2bf   : > { %5956 = vmatprep.mubr.msk.f32.mxu0 %vm1289_vm7, %v2354_v59 }
 0x2c0   : > { %5957 = vmatmul.mubr.msk.f32.gmra.mrb[30].mxu0 %vm1289_vm7, %v2355_v6 }
 0x31b   : > { %v5913_v35 = vpop.f32.mrb[0].mxu0 }
 0x31c   : > { %v2723_v38 = vadd.f32 %v5913_v35, %v8059_v8  ;;  %v2524_v42 = vpop.f32.mrb[1].mxu0 }
 0x31d   : > { %v2722_v49 = vadd.f32 %v8059_v8, %v2524_v42 }
 0x31e   : > { %v2755_v62 = vmax.f32 %v2723_v38, 0.0 }
 0x31f   : > { %v2754_v50 = vmax.f32 %v2722_v49, 0.0 }
 0x320   : > { %2788 = vst.msk [vmem:[#allocation3 + $0x21] sm:$0xff] %vm329_vm0, %v2755_v62 }
 0x321   : > { %2787 = vst.msk [vmem:[#allocation3 + $0x19] sm:$0xff] %vm329_vm0, %v2754_v50 }
 0x323   : > { %v5916_v14 = vpop.f32.mrb[2].mxu0 }
 0x324   : > { %v2725_v1 = vadd.f32 %v5916_v14, %v8059_v8  ;;  %v2534_v9 = vpop.f32.mrb[3].mxu0 }
 0x325   : > { %v2724_v29 = vadd.f32 %v8059_v8, %v2534_v9 }
 0x326   : > { %v2757_v61 = vmax.f32 %v2725_v1, 0.0 }
 0x327   : > { %v2756_v13 = vmax.f32 %v2724_v29, 0.0  ;;  %v3270_v23 = vld [vmem:[#allocation3 + $0x21] sm:$0xff] }
 0x328   : > { %2790 = vst.msk [vmem:[#allocation3 + $0x39] sm:$0xff] %vm329_vm0, %v2757_v61  ;;  %3367 = vrot.lane.b32.xlu1 %v3270_v23, %s6599_s26  ;;  %v3269_v37 = vld [vmem:[#allocation3 + $0x19] sm:$0xff]  ;;  %v3302_v21 = vld [vmem:[#allocation3 + $0x22] sm:$0xff] }
 0x329   : > { %2789 = vst.msk [vmem:[#allocation3 + $0x31] sm:$0xff] %vm329_vm0, %v2756_v13  ;;  %3365 = vrot.lane.b32.xlu0 %v3269_v37, %s6599_s26  ;;  %v3301_v30 = vld [vmem:[#allocation3 + $0x1a] sm:$0xff] }
 0x32b   : > { %v5919_v24 = vpop.f32.mrb[4].mxu0 }
 0x32c   : > { %v2727_v0 = vadd.f32 %v5919_v24, %v8059_v8  ;;  %3495 = vrot.lane.b32.xlu1 %v3302_v21, %s6598_s24  ;;  %v2544_v51 = vpop.f32.mrb[5].mxu0 }
 0x32d   : > { %v2726_v52 = vadd.f32 %v8059_v8, %v2544_v51  ;;  %3493 = vrot.lane.b32.xlu0 %v3301_v30, %s6598_s24 }
 0x32e   : > { %v2759_v4 = vmax.f32 %v2727_v0, 0.0 }
 0x32f   : > { %v2758_v43 = vmax.f32 %v2726_v52, 0.0  ;;  %v3272_v22 = vld [vmem:[#allocation3 + $0x39] sm:$0xff] }
 0x330   : > { %2792 = vst.msk [vmem:[#allocation3 + $0x51] sm:$0xff] %vm329_vm0, %v2759_v4  ;;  %2953 = vrot.lane.b32.xlu1 %v3270_v23, %s6599_s26  ;;  %v3271_v20 = vld [vmem:[#allocation3 + $0x31] sm:$0xff]  ;;  %v3304_v54 = vld [vmem:[#allocation3 + $0x3a] sm:$0xff] }
 0x331   : > { %2791 = vst.msk [vmem:[#allocation3 + $0x49] sm:$0xff] %vm329_vm0, %v2758_v43  ;;  %2951 = vrot.lane.b32.xlu0 %v3269_v37, %s6599_s26  ;;  %v3303_v31 = vld [vmem:[#allocation3 + $0x32] sm:$0xff] }
 0x333   : > { %v5922_v16 = vpop.f32.mrb[6].mxu0 }
 0x334   : > { %v2729_v53 = vadd.f32 %v5922_v16, %v8059_v8  ;;  %3081 = vrot.lane.b32.xlu1 %v3302_v21, %s6598_s24  ;;  %v2554_v28 = vpop.f32.mrb[7].mxu0 }
 0x335   : > { %v2728_v63 = vadd.f32 %v8059_v8, %v2554_v28  ;;  %3079 = vrot.lane.b32.xlu0 %v3301_v30, %s6598_s24 }
 0x336   : > { %v2761_v19 = vmax.f32 %v2729_v53, 0.0 }
 0x337   : > { %v2760_v26 = vmax.f32 %v2728_v63, 0.0  ;;  %v3274_v15 = vld [vmem:[#allocation3 + $0x51] sm:$0xff] }
 0x338   : > { %2794 = vst.msk [vmem:[#allocation3 + $0x69] sm:$0xff] %vm329_vm0, %v2761_v19  ;;  %3371 = vrot.lane.b32.xlu1 %v3272_v22, %s6599_s26  ;;  %v3273_v47 = vld [vmem:[#allocation3 + $0x49] sm:$0xff]  ;;  %v3306_v45 = vld [vmem:[#allocation3 + $0x52] sm:$0xff] }
 0x339   : > { %2793 = vst.msk [vmem:[#allocation3 + $0x61] sm:$0xff] %vm329_vm0, %v2760_v26  ;;  %3369 = vrot.lane.b32.xlu0 %v3271_v20, %s6599_s26  ;;  %v3305_v58 = vld [vmem:[#allocation3 + $0x4a] sm:$0xff] }
 0x33b   : > { %v5925_v17 = vpop.f32.mrb[8].mxu0 }
 0x33c   : > { %v2731_v44 = vadd.f32 %v5925_v17, %v8059_v8  ;;  %3499 = vrot.lane.b32.xlu1 %v3304_v54, %s6598_s24  ;;  %v2564_v32 = vpop.f32.mrb[9].mxu0 }
 0x33d   : > { %v2730_v3 = vadd.f32 %v8059_v8, %v2564_v32  ;;  %3497 = vrot.lane.b32.xlu0 %v3303_v31, %s6598_s24 }
 0x33e   : > { %v2763_v33 = vmax.f32 %v2731_v44, 0.0 }
 0x33f   : > { %v2762_v34 = vmax.f32 %v2730_v3, 0.0  ;;  %v3276_v38 = vld [vmem:[#allocation3 + $0x69] sm:$0xff] }
 0x340   : > { %2796 = vst.msk [vmem:[#allocation3 + $0x81] sm:$0xff] %vm329_vm0, %v2763_v33  ;;  %2957 = vrot.lane.b32.xlu1 %v3272_v22, %s6599_s26  ;;  %v3275_v42 = vld [vmem:[#allocation3 + $0x61] sm:$0xff]  ;;  %v8123_v36 = vld [vmem:[#allocation3 + $0x6a] sm:$0xff] }
 0x341   : > { %2795 = vst.msk [vmem:[#allocation3 + $0x79] sm:$0xff] %vm329_vm0, %v2762_v34  ;;  %2955 = vrot.lane.b32.xlu0 %v3271_v20, %s6599_s26  ;;  %v8128_v62 = vld [vmem:[#allocation3 + $0x62] sm:$0xff] }
 0x343   : > { %v5928_v25 = vpop.f32.mrb[10].mxu0 }
 0x344   : > { %v2733_v10 = vadd.f32 %v5928_v25, %v8059_v8  ;;  %3085 = vrot.lane.b32.xlu1 %v3304_v54, %s6598_s24  ;;  %v2574_v55 = vpop.f32.mrb[11].mxu0 }
 0x345   : > { %v2732_v27 = vadd.f32 %v8059_v8, %v2574_v55  ;;  %3083 = vrot.lane.b32.xlu0 %v3303_v31, %s6598_s24 }
 0x346   : > { %v2765_v18 = vmax.f32 %v2733_v10, 0.0 }
 0x347   : > { %v2764_v56 = vmax.f32 %v2732_v27, 0.0  ;;  %v8137_v29 = vld [vmem:[#allocation3 + $0x81] sm:$0xff] }
 0x348   : > { %2798 = vst.msk [vmem:[#allocation3 + $0x99] sm:$0xff] %vm329_vm0, %v2765_v18  ;;  %3375 = vrot.lane.b32.xlu1 %v3274_v15, %s6599_s26  ;;  %v8142_v23 = vld [vmem:[#allocation3 + $0x79] sm:$0xff]  ;;  %v8147_v0 = vld [vmem:[#allocation3 + $0x82] sm:$0xff] }
 0x349   : > { %2797 = vst.msk [vmem:[#allocation3 + $0x91] sm:$0xff] %vm329_vm0, %v2764_v56  ;;  %3373 = vrot.lane.b32.xlu0 %v3273_v47, %s6599_s26  ;;  %v8152_v51 = vld [vmem:[#allocation3 + $0x7a] sm:$0xff] }
 0x34b   : > { %v5931_v57 = vpop.f32.mrb[12].mxu0 }
 0x34c   : > { %v2735_v48 = vadd.f32 %v5931_v57, %v8059_v8  ;;  %3503 = vrot.lane.b32.xlu1 %v3306_v45, %s6598_s24  ;;  %v2584_v41 = vpop.f32.mrb[13].mxu0 }
 0x34d   : > { %v2734_v7 = vadd.f32 %v8059_v8, %v2584_v41  ;;  %3501 = vrot.lane.b32.xlu0 %v3305_v58, %s6598_s24 }
 0x34e   : > { %v2767_v2 = vmax.f32 %v2735_v48, 0.0 }
 0x34f   : > { %v2766_v60 = vmax.f32 %v2734_v7, 0.0  ;;  %v8157_v52 = vld [vmem:[#allocation3 + $0x99] sm:$0xff] }
 0x350   : > { %2800 = vst.msk [vmem:[#allocation3 + $0xb1] sm:$0xff] %vm329_vm0, %v2767_v2  ;;  %2961 = vrot.lane.b32.xlu1 %v3274_v15, %s6599_s26  ;;  %v8162_v16 = vld [vmem:[#allocation3 + $0x91] sm:$0xff]  ;;  %v8167_v19 = vld [vmem:[#allocation3 + $0x9a] sm:$0xff] }
 0x351   : > { %2799 = vst.msk [vmem:[#allocation3 + $0xa9] sm:$0xff] %vm329_vm0, %v2766_v60  ;;  %2959 = vrot.lane.b32.xlu0 %v3273_v47, %s6599_s26  ;;  %v8172_v26 = vld [vmem:[#allocation3 + $0x92] sm:$0xff] }
 0x353   : > { %v5934_v11 = vpop.f32.mrb[14].mxu0 }
 0x354   : > { %v2737_v39 = vadd.f32 %v5934_v11, %v8059_v8  ;;  %3089 = vrot.lane.b32.xlu1 %v3306_v45, %s6598_s24  ;;  %v2594_v12 = vpop.f32.mrb[15].mxu0 }
 0x355   : > { %v2736_v6 = vadd.f32 %v8059_v8, %v2594_v12  ;;  %3087 = vrot.lane.b32.xlu0 %v3305_v58, %s6598_s24 }
 0x356   : > { %v2769_v59 = vmax.f32 %v2737_v39, 0.0 }
 0x357   : > { %v2768_v35 = vmax.f32 %v2736_v6, 0.0  ;;  %v8177_v20 = vld [vmem:[#allocation3 + $0xb1] sm:$0xff] }
 0x358   : > { %2802 = vst.msk [vmem:[#allocation3 + $0xc9] sm:$0xff] %vm329_vm0, %v2769_v59  ;;  %3379 = vrot.lane.b32.xlu1 %v3276_v38, %s6599_s26  ;;  %v8182_v44 = vld [vmem:[#allocation3 + $0xa9] sm:$0xff]  ;;  %v8187_v33 = vld [vmem:[#allocation3 + $0xb2] sm:$0xff] }
 0x359   : > { %2801 = vst.msk [vmem:[#allocation3 + $0xc1] sm:$0xff] %vm329_vm0, %v2768_v35  ;;  %3377 = vrot.lane.b32.xlu0 %v3275_v42, %s6599_s26  ;;  %v8192_v34 = vld [vmem:[#allocation3 + $0xaa] sm:$0xff] }
 0x35b   : > { %v5937_v40 = vpop.f32.mrb[16].mxu0 }
 0x35c   : > { %v2739_v49 = vadd.f32 %v5937_v40, %v8059_v8  ;;  %3507 = vrot.lane.b32.xlu1 %v8123_v36, %s6598_s24  ;;  %v2604_v5 = vpop.f32.mrb[17].mxu0 }
 0x35d   : > { %v2738_v50 = vadd.f32 %v8059_v8, %v2604_v5  ;;  %3505 = vrot.lane.b32.xlu0 %v8128_v62, %s6598_s24 }
 0x35e   : > { %v2771_v14 = vmax.f32 %v2739_v49, 0.0 }
 0x35f   : > { %v2770_v1 = vmax.f32 %v2738_v50, 0.0  ;;  %v8197_v10 = vld [vmem:[#allocation3 + $0xc9] sm:$0xff]  ;;  %v8247_v50 = vpop.permute.xlu1 %2949 }
 0x360   : > { %2804 = vst.msk [vmem:[#allocation3 + $0xe1] sm:$0xff] %vm329_vm0, %v2771_v14  ;;  %2965 = vrot.lane.b32.xlu1 %v3276_v38, %s6599_s26  ;;  %v8202_v18 = vld [vmem:[#allocation3 + $0xc1] sm:$0xff]  ;;  %v8207_v57 = vld [vmem:[#allocation3 + $0xca] sm:$0xff] }
 0x361   : > { %2803 = vst.msk [vmem:[#allocation3 + $0xd9] sm:$0xff] %vm329_vm0, %v2770_v1  ;;  %2963 = vrot.lane.b32.xlu0 %v3275_v42, %s6599_s26  ;;  %v8212_v45 = vld [vmem:[#allocation3 + $0xc2] sm:$0xff] }
 0x363   : > { %v5940_v9 = vpop.f32.mrb[18].mxu0 }
 0x364   : > { %v2741_v61 = vadd.f32 %v5940_v9, %v8059_v8  ;;  %3383 = vrot.lane.b32.xlu1 %v8137_v29, %s6599_s26  ;;  %v2614_v13 = vpop.f32.mrb[19].mxu0 }
 0x365   : > { %v2740_v37 = vadd.f32 %v8059_v8, %v2614_v13  ;;  %3381 = vrot.lane.b32.xlu0 %v8142_v23, %s6599_s26 }
 0x366   : > { %v2773_v24 = vmax.f32 %v2741_v61, 0.0  ;;  %v8257_v61 = vpop.permute.xlu0 %2947 }
 0x367   : > { %v2772_v21 = vmax.f32 %v2740_v37, 0.0  ;;  %v8217_v41 = vld [vmem:[#allocation3 + $0xe1] sm:$0xff] }
 0x368   : > { %2806 = vst.msk [vmem:[#allocation3 + $0xf9] sm:$0xff] %vm329_vm0, %v2773_v24  ;;  %3511 = vrot.lane.b32.xlu1 %v8147_v0, %s6598_s24  ;;  %v8222_v2 = vld [vmem:[#allocation3 + $0xd9] sm:$0xff]  ;;  %v8227_v12 = vld [vmem:[#allocation3 + $0xe2] sm:$0xff] }
 0x369   : > { %2805 = vst.msk [vmem:[#allocation3 + $0xf1] sm:$0xff] %vm329_vm0, %v2772_v21  ;;  %3509 = vrot.lane.b32.xlu0 %v8152_v51, %s6598_s24  ;;  %v8232_v6 = vld [vmem:[#allocation3 + $0xda] sm:$0xff] }
 0x36b   : > { %v5943_v30 = vpop.f32.mrb[20].mxu0 }
 0x36c   : > { %v2743_v4 = vadd.f32 %v5943_v30, %v8059_v8  ;;  %3387 = vrot.lane.b32.xlu1 %v8157_v52, %s6599_s26  ;;  %v2624_v43 = vpop.f32.mrb[21].mxu0  ;;  %v8266_v30 = vpop.permute.xlu1 %3077 }
 0x36d   : > { %v2742_v53 = vadd.f32 %v8059_v8, %v2624_v43  ;;  %3385 = vrot.lane.b32.xlu0 %v8162_v16, %s6599_s26 }
 0x36e   : > { %v2775_v28 = vmax.f32 %v2743_v4, 0.0 }
 0x36f   : > { %v2774_v63 = vmax.f32 %v2742_v53, 0.0  ;;  %v8237_v35 = vld [vmem:[#allocation3 + $0xf9] sm:$0xff] }
 0x370   : > { %2808 = vst.msk [vmem:[#allocation3 + $0x111] sm:$0xff] %vm329_vm0, %v2775_v28  ;;  %3515 = vrot.lane.b32.xlu1 %v8167_v19, %s6598_s24  ;;  %v8242_v40 = vld [vmem:[#allocation3 + $0xf1] sm:$0xff]  ;;  %v8249_v1 = vld [vmem:[#allocation3 + $0xfa] sm:$0xff]  ;;  %v8273_v28 = vpop.permute.xlu0 %3075 }
 0x371   : > { %2807 = vst.msk [vmem:[#allocation3 + $0x109] sm:$0xff] %vm329_vm0, %v2774_v63  ;;  %3513 = vrot.lane.b32.xlu0 %v8172_v26, %s6598_s24  ;;  %v8254_v9 = vld [vmem:[#allocation3 + $0xf2] sm:$0xff] }
 0x373   : > { %v5946_v22 = vpop.f32.mrb[22].mxu0 }
 0x374   : > { %v2745_v17 = vadd.f32 %v5946_v22, %v8059_v8  ;;  %3391 = vrot.lane.b32.xlu1 %v8177_v20, %s6599_s26  ;;  %v2634_v54 = vpop.f32.mrb[23].mxu0 }
 0x375   : > { %v2744_v32 = vadd.f32 %v8059_v8, %v2634_v54  ;;  %3389 = vrot.lane.b32.xlu0 %v8182_v44, %s6599_s26 }
 0x376   : > { %v2777_v31 = vmax.f32 %v2745_v17, 0.0 }
 0x377   : > { %v2776_v3 = vmax.f32 %v2744_v32, 0.0  ;;  %v8261_v37 = vld [vmem:[#allocation3 + $0x111] sm:$0xff] }
 0x378   : > { %2810 = vst.msk [vmem:[#allocation3 + $0x129] sm:$0xff] %vm329_vm0, %v2777_v31  ;;  %3519 = vrot.lane.b32.xlu1 %v8187_v33, %s6598_s24  ;;  %v8268_v4 = vld [vmem:[#allocation3 + $0x109] sm:$0xff]  ;;  %v8275_v22 = vld [vmem:[#allocation3 + $0x112] sm:$0xff] }
 0x379   : > { %2809 = vst.msk [vmem:[#allocation3 + $0x121] sm:$0xff] %vm329_vm0, %v2776_v3  ;;  %3517 = vrot.lane.b32.xlu0 %v8192_v34, %s6598_s24  ;;  %v8280_v17 = vld [vmem:[#allocation3 + $0x10a] sm:$0xff]  ;;  %v8293_v3 = vld [vmem:[#allocation3 + $0x18] sm:$0xff] }
 0x37a   : > { %9252 = vst [vmem:[#allocation50_spill] sm:$0xff] %v8293_v3 }
 0x37b   : > { %v5949_v25 = vpop.f32.mrb[24].mxu0 }
 0x37c   : > { %v2747_v55 = vadd.f32 %v5949_v25, %v8059_v8  ;;  %3395 = vrot.lane.b32.xlu1 %v8197_v10, %s6599_s26  ;;  %v2644_v27 = vpop.f32.mrb[25].mxu0 }
 0x37d   : > { %v2746_v56 = vadd.f32 %v8059_v8, %v2644_v27  ;;  %3393 = vrot.lane.b32.xlu0 %v8202_v18, %s6599_s26 }
 0x37e   : > { %v2779_v15 = vmax.f32 %v2747_v55, 0.0  ;;  %v8295_v55 = vld [vmem:[#allocation3 + $0x20] sm:$0xff] }
 0x37f   : > { %v2778_v47 = vmax.f32 %v2746_v56, 0.0  ;;  %v8285_v32 = vld [vmem:[#allocation3 + $0x129] sm:$0xff]  ;;  %9253 = vst [vmem:[#allocation51_spill] sm:$0xff] %v8295_v55 }
 0x380   : > { %2812 = vst.msk [vmem:[#allocation3 + $0x141] sm:$0xff] %vm329_vm0, %v2779_v15  ;;  %3523 = vrot.lane.b32.xlu1 %v8207_v57, %s6598_s24  ;;  %v8289_v31 = vld [vmem:[#allocation3 + $0x121] sm:$0xff]  ;;  %v8299_v15 = vld [vmem:[#allocation3 + $0x12a] sm:$0xff] }
 0x381   : > { %2811 = vst.msk [vmem:[#allocation3 + $0x139] sm:$0xff] %vm329_vm0, %v2778_v47  ;;  %3521 = vrot.lane.b32.xlu0 %v8212_v45, %s6598_s24 }
 0x383   : > { %v5952_v48 = vpop.f32.mrb[26].mxu0 }
 0x384   : > { %v2749_v58 = vadd.f32 %v5952_v48, %v8059_v8  ;;  %3399 = vrot.lane.b32.xlu1 %v8217_v41, %s6599_s26  ;;  %v2654_v7 = vpop.f32.mrb[27].mxu0 }
 0x385   : > { %v2748_v60 = vadd.f32 %v8059_v8, %v2654_v7  ;;  %3397 = vrot.lane.b32.xlu0 %v8222_v2, %s6599_s26 }
 0x386   : > { %v2781_v11 = vmax.f32 %v2749_v58, 0.0  ;;  %v8306_v58 = vld [vmem:[#allocation3 + $0x122] sm:$0xff] }
 0x387   : > { %v2780_v39 = vmax.f32 %v2748_v60, 0.0 }
 0x388   : > { %2814 = vst.msk [vmem:[#allocation3 + $0x159] sm:$0xff] %vm329_vm0, %v2781_v11  ;;  %3527 = vrot.lane.b32.xlu1 %v8227_v12, %s6598_s24 }
 0x389   : > { %2813 = vst.msk [vmem:[#allocation3 + $0x151] sm:$0xff] %vm329_vm0, %v2780_v39  ;;  %3525 = vrot.lane.b32.xlu0 %v8232_v6, %s6598_s24  ;;  %v8317_v39 = vld [vmem:[#allocation3 + $0x141] sm:$0xff] }
 0x38b   : > { %v5955_v59 = vpop.f32.mrb[28].mxu0 }
 0x38c   : > { %v2751_v38 = vadd.f32 %v5955_v59, %v8059_v8  ;;  %3403 = vrot.lane.b32.xlu1 %v8237_v35, %s6599_s26  ;;  %v2664_v42 = vpop.f32.mrb[29].mxu0  ;;  %v8321_v59 = vld [vmem:[#allocation3 + $0x139] sm:$0xff] }
 0x38d   : > { %v2750_v49 = vadd.f32 %v8059_v8, %v2664_v42  ;;  %3401 = vrot.lane.b32.xlu0 %v8242_v40, %s6599_s26 }
 0x38e   : > { %v2783_v5 = vmax.f32 %v2751_v38, 0.0 }
 0x38f   : > { %v2782_v14 = vmax.f32 %v2750_v49, 0.0  ;;  %v8329_v49 = vld [vmem:[#allocation3 + $0x142] sm:$0xff] }
 0x390   : > { %2816 = vst.msk [vmem:[#allocation3 + $0x171] sm:$0xff] %vm329_vm0, %v2783_v5  ;;  %3531 = vrot.lane.b32.xlu1 %v8249_v1, %s6598_s24  ;;  %v8333_v5 = vld [vmem:[#allocation3 + $0x13a] sm:$0xff] }
 0x391   : > { %2815 = vst.msk [vmem:[#allocation3 + $0x169] sm:$0xff] %vm329_vm0, %v2782_v14  ;;  %3529 = vrot.lane.b32.xlu0 %v8254_v9, %s6598_s24 }
 0x393   : > { %v5958_v13 = vpop.f32.mrb[30].mxu0 }
 0x394   : > { %v2753_v24 = vadd.f32 %v5958_v13, %v8059_v8  ;;  %3407 = vrot.lane.b32.xlu1 %v8261_v37, %s6599_s26  ;;  %v2674_v21 = vpop.f32.mrb[31].mxu0 }
 0x395   : > { %v2752_v43 = vadd.f32 %v8059_v8, %v2674_v21  ;;  %3405 = vrot.lane.b32.xlu0 %v8268_v4, %s6599_s26  ;;  %v8341_v21 = vld [vmem:[#allocation3 + $0x151] sm:$0xff] }
 0x396   : > { %v2785_v53 = vmax.f32 %v2753_v24, 0.0  ;;  %v8337_v24 = vld [vmem:[#allocation3 + $0x159] sm:$0xff] }
 0x397   : > { %v2784_v63 = vmax.f32 %v2752_v43, 0.0  ;;  %v8345_v43 = vld [vmem:[#allocation3 + $0x30] sm:$0xff] }
 0x398   : > { %2818 = vst.msk [vmem:[#allocation3 + $0x189] sm:$0xff] %vm329_vm0, %v2785_v53  ;;  %3535 = vrot.lane.b32.xlu1 %v8275_v22, %s6598_s24  ;;  %9258 = vst [vmem:[#allocation56_spill] sm:$0xff] %v8345_v43 }
 0x399   : > { %2817 = vst.msk [vmem:[#allocation3 + $0x181] sm:$0xff] %vm329_vm0, %v2784_v63  ;;  %3533 = vrot.lane.b32.xlu0 %v8280_v17, %s6598_s24  ;;  %v8347_v63 = vld [vmem:[#allocation3 + $0x38] sm:$0xff] }
 0x39a   : > { %v3368_v8 = vpop.permute.xlu1 %3367  ;;  %9259 = vst [vmem:[#allocation57_spill] sm:$0xff] %v8347_v63 }
 0x39b   : > { %v3366_v54 = vpop.permute.xlu0 %3365  ;;  %v3590_v47 = vsel %vm329_vm0, %v8295_v55, %v3368_v8 }
 0x39c   : > { %3411 = vrot.lane.b32.xlu1 %v8285_v32, %s6599_s26  ;;  %v3589_v27 = vsel %vm329_vm0, %v8293_v3, %v3366_v54 }
 0x39d   : > { %3409 = vrot.lane.b32.xlu0 %v8289_v31, %s6599_s26 }
 0x39e   : > { %v3496_v25 = vpop.permute.xlu1 %3495 }
 0x39f   : > { %v3494_v56 = vpop.permute.xlu0 %3493  ;;  %v3622_v7 = vsel %vm835_vm6, %v3590_v47, %v3496_v25  ;;  %v8351_v25 = vld [vmem:[#allocation3 + $0x15a] sm:$0xff]  ;;  %v8358_v47 = vld [vmem:[#allocation3 + $0x152] sm:$0xff] }
 0x3a0   : > { %3539 = vrot.lane.b32.xlu1 %v8299_v15, %s6598_s24  ;;  %v3621_v48 = vsel %vm835_vm6, %v3589_v27, %v3494_v56 }
 0x3a1   : > { %5963 = vmatprep.mubr.msk.f32.mxu1 %vm1289_vm7, %v3621_v48  ;;  %3537 = vrot.lane.b32.xlu0 %v8306_v58, %s6598_s24 }
 0x3a2   : > { %v8312_v60 = vpop.permute.xlu1 %2953  ;;  %5964 = vmatmul.mubr.msk.f32.vlgmr.msra.gmra.mrb[0].mxu1 %vm1289_vm7, %v3622_v7 }
 0x3a3   : > { %9254 = vst [vmem:[#allocation52_spill] sm:$0xff] %v8312_v60  ;;  %v8315_v11 = vpop.permute.xlu0 %2951 }
 0x3a4   : > { %9255 = vst [vmem:[#allocation53_spill] sm:$0xff] %v8315_v11  ;;  %3415 = vrot.lane.b32.xlu1 %v8317_v39, %s6599_s26 }
 0x3a5   : > { %3413 = vrot.lane.b32.xlu0 %v8321_v59, %s6599_s26 }
 0x3a6   : > { %v8325_v38 = vpop.permute.xlu1 %3081 }
 0x3a7   : > { %9256 = vst [vmem:[#allocation54_spill] sm:$0xff] %v8325_v38  ;;  %v8327_v42 = vpop.permute.xlu0 %3079  ;;  %v8397_v38 = vld [vmem:[#allocation3 + $0x50] sm:$0xff] }
 0x3a8   : > { %9257 = vst [vmem:[#allocation55_spill] sm:$0xff] %v8327_v42  ;;  %3543 = vrot.lane.b32.xlu1 %v8329_v49, %s6598_s24  ;;  %v3332_v42 = vld [vmem:[#allocation3 + $0x18a] sm:$0xff] }
 0x3a9   : > { %3541 = vrot.lane.b32.xlu0 %v8333_v5, %s6598_s24 }
 0x3aa   : > { %v3372_v14 = vpop.permute.xlu1 %3371 }
 0x3ab   : > { %v3370_v13 = vpop.permute.xlu0 %3369  ;;  %v3592_v27 = vsel %vm329_vm0, %v8347_v63, %v3372_v14  ;;  %v8369_v14 = vld [vmem:[#allocation3 + $0x171] sm:$0xff] }
 0x3ac   : > { %3419 = vrot.lane.b32.xlu1 %v8337_v24, %s6599_s26  ;;  %v3591_v8 = vsel %vm329_vm0, %v8345_v43, %v3370_v13  ;;  %v8395_v43 = vld [vmem:[#allocation3 + $0x48] sm:$0xff] }
 0x3ad   : > { %3417 = vrot.lane.b32.xlu0 %v8341_v21, %s6599_s26 }
 0x3ae   : > { %v3500_v53 = vpop.permute.xlu1 %3499 }
 0x3af   : > { %v3498_v54 = vpop.permute.xlu0 %3497  ;;  %v3624_v48 = vsel %vm835_vm6, %v3592_v27, %v3500_v53  ;;  %v3235_v53 = vld [vmem:[#allocation10] sm:$0xff] }
 0x3b0   : > { %v3623_v56 = vsel %vm835_vm6, %v3591_v8, %v3498_v54  ;;  %3547 = vrot.lane.b32.xlu1 %v8351_v25, %s6598_s24  ;;  %v8373_v8 = vld [vmem:[#allocation3 + $0x169] sm:$0xff] }
 0x3b1   : > { %5966 = vmatprep.mubr.msk.f32.mxu1 %vm1289_vm7, %v3623_v56  ;;  %3545 = vrot.lane.b32.xlu0 %v8358_v47, %s6598_s24  ;;  %v3236_v54 = vld [vmem:[#allocation10 + $0x8] sm:$0xf] }
 0x3b2   : > { %v8364_v7 = vpop.permute.xlu1 %2957  ;;  %5967 = vmatmul.mubr.msk.f32.gmra.mrb[2].mxu1 %vm1289_vm7, %v3624_v48  ;;  %v6139_v56 = vpack.c.bf16 %v3236_v54, %v3235_v53  ;;  %v8381_v48 = vld [vmem:[#allocation3 + $0x172] sm:$0xff]  ;;  %v3300_v54 = vld [vmem:[#allocation3 + $0x189] sm:$0xff] }
 0x3b3   : > { %9260 = vst [vmem:[#allocation58_spill] sm:$0xff] %v8364_v7  ;;  %v8367_v13 = vpop.permute.xlu0 %2955  ;;  %v8385_v7 = vld [vmem:[#allocation3 + $0x16a] sm:$0xff] }
 0x3b4   : > { %9261 = vst [vmem:[#allocation59_spill] sm:$0xff] %v8367_v13  ;;  %3423 = vrot.lane.b32.xlu1 %v8369_v14, %s6599_s26  ;;  %6141 = vmatprep.subr.msk.bf16.mxu1 %vm7229_vm5, %v6139_v56 }
 0x3b5   : > { %3421 = vrot.lane.b32.xlu0 %v8373_v8, %s6599_s26  ;;  %6144 = vmatpush3.bf16.msk.msra.mxu1 %vm7229_vm5, %v6139_v56 }
 0x3b6   : > { %v8377_v27 = vpop.permute.xlu1 %3085 }
 0x3b7   : > { %9262 = vst [vmem:[#allocation61_spill] sm:$0xff] %v8377_v27  ;;  %v8379_v63 = vpop.permute.xlu0 %3083 }
 0x3b8   : > { %9263 = vst [vmem:[#allocation62_spill] sm:$0xff] %v8379_v63  ;;  %3551 = vrot.lane.b32.xlu1 %v8381_v48, %s6598_s24  ;;  %v3299_v63 = vld [vmem:[#allocation3 + $0x181] sm:$0xff] }
 0x3b9   : > { %3549 = vrot.lane.b32.xlu0 %v8385_v7, %s6598_s24 }
 0x3ba   : > { %v3376_v27 = vpop.permute.xlu1 %3375 }
 0x3bb   : > { %v3374_v53 = vpop.permute.xlu0 %3373  ;;  %v3594_v56 = vsel %vm329_vm0, %v8397_v38, %v3376_v27 }
 0x3bc   : > { %3427 = vrot.lane.b32.xlu1 %v3300_v54, %s6599_s26  ;;  %v3593_v55 = vsel %vm329_vm0, %v8395_v43, %v3374_v53  ;;  %v3331_v54 = vld [vmem:[#allocation3 + $0x182] sm:$0xff] }
 0x3bd   : > { %3425 = vrot.lane.b32.xlu0 %v3299_v63, %s6599_s26 }
 0x3be   : > { %v3504_v13 = vpop.permute.xlu1 %3503 }
 0x3bf   : > { %v3502_v60 = vpop.permute.xlu0 %3501  ;;  %v3626_v63 = vsel %vm835_vm6, %v3594_v56, %v3504_v13  ;;  %v8431_v13 = vld [vmem:[#allocation3 + $0x68] sm:$0xff] }
 0x3c0   : > { %v3625_v3 = vsel %vm835_vm6, %v3593_v55, %v3502_v60  ;;  %3555 = vrot.lane.b32.xlu1 %v3332_v42, %s6598_s24 }
 0x3c1   : > { %5969 = vmatprep.mubr.msk.f32.mxu1 %vm1289_vm7, %v3625_v3  ;;  %3553 = vrot.lane.b32.xlu0 %v3331_v54, %s6598_s24 }
 0x3c2   : > { %v8408_v11 = vpop.permute.xlu1 %2961  ;;  %5970 = vmatmul.mubr.msk.f32.gmra.mrb[4].mxu1 %vm1289_vm7, %v3626_v63 }
 0x3c3   : > { %v8411_v53 = vpop.permute.xlu0 %2959 }
 0x3c4   : > { %3093 = vrot.lane.b32.xlu1 %v8123_v36, %s6598_s24  ;;  %v8429_v36 = vld [vmem:[#allocation3 + $0x60] sm:$0xff] }
 0x3c5   : > { %3091 = vrot.lane.b32.xlu0 %v8128_v62, %s6598_s24 }
 0x3c6   : > { %v8417_v55 = vpop.permute.xlu1 %3089 }
 0x3c7   : > { %v8419_v60 = vpop.permute.xlu0 %3087 }
 0x3c8   : > { %2969 = vrot.lane.b32.xlu1 %v8137_v29, %s6599_s26 }
 0x3c9   : > { %2967 = vrot.lane.b32.xlu0 %v8142_v23, %s6599_s26 }
 0x3ca   : > { %v3380_v3 = vpop.permute.xlu1 %3379 }
 0x3cb   : > { %v3378_v42 = vpop.permute.xlu0 %3377  ;;  %v3596_v23 = vsel %vm329_vm0, %v8431_v13, %v3380_v3 }
 0x3cc   : > { %3097 = vrot.lane.b32.xlu1 %v8147_v0, %s6598_s24  ;;  %v3595_v27 = vsel %vm329_vm0, %v8429_v36, %v3378_v42  ;;  %v8459_v42 = vld [vmem:[#allocation3 + $0x80] sm:$0xff] }
 0x3cd   : > { %3095 = vrot.lane.b32.xlu0 %v8152_v51, %s6598_s24 }
 0x3ce   : > { %v3508_v62 = vpop.permute.xlu1 %3507 }
 0x3cf   : > { %v3506_v29 = vpop.permute.xlu0 %3505  ;;  %v3628_v0 = vsel %vm835_vm6, %v3596_v23, %v3508_v62  ;;  %v8477_v23 = vld [vmem:[#allocation3 + $0x90] sm:$0xff] }
 0x3d0   : > { %v3627_v56 = vsel %vm835_vm6, %v3595_v27, %v3506_v29  ;;  %2973 = vrot.lane.b32.xlu1 %v8157_v52, %s6599_s26 }
 0x3d1   : > { %5972 = vmatprep.mubr.msk.f32.mxu1 %vm1289_vm7, %v3627_v56  ;;  %2971 = vrot.lane.b32.xlu0 %v8162_v16, %s6599_s26  ;;  %v8457_v16 = vld [vmem:[#allocation3 + $0x78] sm:$0xff] }
 0x3d2   : > { %v8444_v51 = vpop.permute.xlu1 %2965  ;;  %5973 = vmatmul.mubr.msk.f32.gmra.mrb[6].mxu1 %vm1289_vm7, %v3628_v0  ;;  %v8479_v56 = vld [vmem:[#allocation3 + $0x98] sm:$0xff] }
 0x3d3   : > { %v8447_v54 = vpop.permute.xlu0 %2963 }
 0x3d4   : > { %3101 = vrot.lane.b32.xlu1 %v8167_v19, %s6598_s24 }
 0x3d5   : > { %3099 = vrot.lane.b32.xlu0 %v8172_v26, %s6598_s24 }
 0x3d6   : > { %v3384_v52 = vpop.permute.xlu1 %3383 }
 0x3d7   : > { %v3382_v63 = vpop.permute.xlu0 %3381  ;;  %v3598_v26 = vsel %vm329_vm0, %v8459_v42, %v3384_v52 }
 0x3d8   : > { %2977 = vrot.lane.b32.xlu1 %v8177_v20, %s6599_s26  ;;  %v3597_v62 = vsel %vm329_vm0, %v8457_v16, %v3382_v63 }
 0x3d9   : > { %2975 = vrot.lane.b32.xlu0 %v8182_v44, %s6599_s26 }
 0x3da   : > { %v3512_v3 = vpop.permute.xlu1 %3511 }
 0x3db   : > { %v3510_v19 = vpop.permute.xlu0 %3509  ;;  %v3630_v20 = vsel %vm835_vm6, %v3598_v26, %v3512_v3 }
 0x3dc   : > { %v3629_v27 = vsel %vm835_vm6, %v3597_v62, %v3510_v19  ;;  %3105 = vrot.lane.b32.xlu1 %v8187_v33, %s6598_s24  ;;  %v8497_v62 = vld [vmem:[#allocation3 + $0xa8] sm:$0xff]  ;;  %v8499_v19 = vld [vmem:[#allocation3 + $0xb0] sm:$0xff] }
 0x3dd   : > { %5975 = vmatprep.mubr.msk.f32.mxu1 %vm1289_vm7, %v3629_v27  ;;  %3103 = vrot.lane.b32.xlu0 %v8192_v34, %s6598_s24 }
 0x3de   : > { %5976 = vmatmul.mubr.msk.f32.gmra.mrb[8].mxu1 %vm1289_vm7, %v3630_v20  ;;  %v3388_v44 = vpop.permute.xlu1 %3387 }
 0x3df   : > { %v3386_v29 = vpop.permute.xlu0 %3385  ;;  %v3600_v34 = vsel %vm329_vm0, %v8479_v56, %v3388_v44 }
 0x3e0   : > { %2981 = vrot.lane.b32.xlu1 %v8197_v10, %s6599_s26  ;;  %v3599_v0 = vsel %vm329_vm0, %v8477_v23, %v3386_v29  ;;  %v8517_v29 = vld [vmem:[#allocation3 + $0xc0] sm:$0xff] }
 0x3e1   : > { %2979 = vrot.lane.b32.xlu0 %v8202_v18, %s6599_s26 }
 0x3e2   : > { %v3516_v33 = vpop.permute.xlu1 %3515 }
 0x3e3   : > { %v3514_v52 = vpop.permute.xlu0 %3513  ;;  %v3632_v10 = vsel %vm835_vm6, %v3600_v34, %v3516_v33  ;;  %v8519_v33 = vld [vmem:[#allocation3 + $0xc8] sm:$0xff] }
 0x3e4   : > { %v3631_v63 = vsel %vm835_vm6, %v3599_v0, %v3514_v52  ;;  %3109 = vrot.lane.b32.xlu1 %v8207_v57, %s6598_s24 }
 0x3e5   : > { %5978 = vmatprep.mubr.msk.f32.mxu1 %vm1289_vm7, %v3631_v63  ;;  %3107 = vrot.lane.b32.xlu0 %v8212_v45, %s6598_s24 }
 0x3e6   : > { %5979 = vmatmul.mubr.msk.f32.gmra.mrb[10].mxu1 %vm1289_vm7, %v3632_v10  ;;  %v3392_v18 = vpop.permute.xlu1 %3391  ;;  %v4722_v10 = vld [vmem:[#allocation10 + $0x20] sm:$0xff] }
 0x3e7   : > { %v3390_v3 = vpop.permute.xlu0 %3389  ;;  %v3602_v45 = vsel %vm329_vm0, %v8499_v19, %v3392_v18  ;;  %v4723_v18 = vld [vmem:[#allocation10 + $0x28] sm:$0xf] }
 0x3e8   : > { %2985 = vrot.lane.b32.xlu1 %v8217_v41, %s6599_s26  ;;  %v3601_v26 = vsel %vm329_vm0, %v8497_v62, %v3390_v3  ;;  %v8539_v3 = vld [vmem:[#allocation3 + $0xd8] sm:$0xff] }
 0x3e9   : > { %2983 = vrot.lane.b32.xlu0 %v8222_v2, %s6599_s26 }
 0x3ea   : > { %v3520_v57 = vpop.permute.xlu1 %3519 }
 0x3eb   : > { %v3518_v27 = vpop.permute.xlu0 %3517  ;;  %v3634_v41 = vsel %vm835_vm6, %v3602_v45, %v3520_v57 }
 0x3ec   : > { %v3633_v20 = vsel %vm835_vm6, %v3601_v26, %v3518_v27  ;;  %3113 = vrot.lane.b32.xlu1 %v8227_v12, %s6598_s24  ;;  %v8541_v26 = vld [vmem:[#allocation3 + $0xe0] sm:$0xff] }
 0x3ed   : > { %5981 = vmatprep.mubr.msk.f32.mxu1 %vm1289_vm7, %v3633_v20  ;;  %3111 = vrot.lane.b32.xlu0 %v8232_v6, %s6598_s24 }
 0x3ee   : > { %5982 = vmatmul.mubr.msk.f32.gmra.mrb[12].mxu1 %vm1289_vm7, %v3634_v41  ;;  %v3396_v2 = vpop.permute.xlu1 %3395 }
 0x3ef   : > { %v3394_v44 = vpop.permute.xlu0 %3393  ;;  %v3604_v6 = vsel %vm329_vm0, %v8519_v33, %v3396_v2  ;;  %v8562_v2 = vld [vmem:[#allocation3 + $0xf0] sm:$0xff] }
 0x3f0   : > { %2989 = vrot.lane.b32.xlu1 %v8237_v35, %s6599_s26  ;;  %v3603_v0 = vsel %vm329_vm0, %v8517_v29, %v3394_v44  ;;  %v8564_v44 = vld [vmem:[#allocation3 + $0xf8] sm:$0xff] }
 0x3f1   : > { %2987 = vrot.lane.b32.xlu0 %v8242_v40, %s6599_s26 }
 0x3f2   : > { %v3524_v12 = vpop.permute.xlu1 %3523 }
 0x3f3   : > { %v3522_v52 = vpop.permute.xlu0 %3521  ;;  %v3636_v35 = vsel %vm835_vm6, %v3604_v6, %v3524_v12 }
 0x3f4   : > { %v3635_v34 = vsel %vm835_vm6, %v3603_v0, %v3522_v52  ;;  %3117 = vrot.lane.b32.xlu1 %v8249_v1, %s6598_s24  ;;  %v8537_v1 = vpack.c.bf16 %v4723_v18, %v4722_v10 }
 0x3f5   : > { %5984 = vmatprep.mubr.msk.f32.mxu1 %vm1289_vm7, %v3635_v34  ;;  %3115 = vrot.lane.b32.xlu0 %v8254_v9, %s6598_s24  ;;  %v8582_v34 = vld [vmem:[#allocation3 + $0x108] sm:$0xff] }
 0x3f6   : > { %5985 = vmatmul.mubr.msk.f32.gmra.mrb[14].mxu1 %vm1289_vm7, %v3636_v35  ;;  %v3400_v40 = vpop.permute.xlu1 %3399  ;;  %6147 = vmatprep.subr.msk.bf16.mxu1 %vm7229_vm5, %v8537_v1  ;;  %v8584_v35 = vld [vmem:[#allocation3 + $0x110] sm:$0xff] }
 0x3f7   : > { %v3398_v63 = vpop.permute.xlu0 %3397 }
 0x3f8   : > { %2993 = vrot.lane.b32.xlu1 %v8261_v37, %s6599_s26  ;;  %v3605_v9 = vsel %vm329_vm0, %v8539_v3, %v3398_v63  ;;  %v3606_v37 = vsel %vm329_vm0, %v8541_v26, %v3400_v40 }
 0x3f9   : > { %2991 = vrot.lane.b32.xlu0 %v8268_v4, %s6599_s26 }
 0x3fa   : > { %v3528_v57 = vpop.permute.xlu1 %3527 }
 0x3fb   : > { %v3526_v27 = vpop.permute.xlu0 %3525  ;;  %v3638_v45 = vsel %vm835_vm6, %v3606_v37, %v3528_v57  ;;  %v8602_v57 = vld [vmem:[#allocation3 + $0x120] sm:$0xff] }
 0x3fc   : > { %v3637_v4 = vsel %vm835_vm6, %v3605_v9, %v3526_v27  ;;  %3121 = vrot.lane.b32.xlu1 %v8275_v22, %s6598_s24  ;;  %v8604_v9 = vld [vmem:[#allocation3 + $0x128] sm:$0xff] }
 0x3fd   : > { %5987 = vmatprep.mubr.msk.f32.mxu1 %vm1289_vm7, %v3637_v4  ;;  %3119 = vrot.lane.b32.xlu0 %v8280_v17, %s6598_s24 }
 0x3fe   : > { %5988 = vmatmul.mubr.msk.f32.gmra.mrb[16].mxu1 %vm1289_vm7, %v3638_v45  ;;  %v3404_v20 = vpop.permute.xlu1 %3403 }
 0x3ff   : > { %v3402_v41 = vpop.permute.xlu0 %3401  ;;  %v3608_v17 = vsel %vm329_vm0, %v8564_v44, %v3404_v20  ;;  %v8622_v20 = vld [vmem:[#allocation3 + $0x138] sm:$0xff] }
 0x400   : > { %2997 = vrot.lane.b32.xlu1 %v8285_v32, %s6599_s26  ;;  %v3607_v12 = vsel %vm329_vm0, %v8562_v2, %v3402_v41  ;;  %v8624_v41 = vld [vmem:[#allocation3 + $0x140] sm:$0xff] }
 0x401   : > { %2995 = vrot.lane.b32.xlu0 %v8289_v31, %s6599_s26 }
 0x402   : > { %v3532_v22 = vpop.permute.xlu1 %3531 }
 0x403   : > { %v3530_v0 = vpop.permute.xlu0 %3529  ;;  %v3640_v32 = vsel %vm835_vm6, %v3608_v17, %v3532_v22 }
 0x404   : > { %v3639_v52 = vsel %vm835_vm6, %v3607_v12, %v3530_v0  ;;  %3125 = vrot.lane.b32.xlu1 %v8299_v15, %s6598_s24 }
 0x405   : > { %5990 = vmatprep.mubr.msk.f32.mxu1 %vm1289_vm7, %v3639_v52  ;;  %3123 = vrot.lane.b32.xlu0 %v8306_v58, %s6598_s24  ;;  %v4338_v52 = vld [vmem:[#allocation3 + $0x39] sm:$0xff] }
 0x406   : > { %5991 = vmatmul.mubr.msk.f32.gmra.mrb[18].mxu1 %vm1289_vm7, %v3640_v32  ;;  %v3408_v31 = vpop.permute.xlu1 %3407  ;;  %v4337_v32 = vld [vmem:[#allocation3 + $0x31] sm:$0xff] }
 0x407   : > { %v3406_v6 = vpop.permute.xlu0 %3405  ;;  %v3610_v58 = vsel %vm329_vm0, %v8584_v35, %v3408_v31  ;;  %v8640_v31 = vld [vmem:[#allocation3 + $0x150] sm:$0xff] }
 0x408   : > { %3001 = vrot.lane.b32.xlu1 %v8317_v39, %s6599_s26  ;;  %v3609_v40 = vsel %vm329_vm0, %v8582_v34, %v3406_v6  ;;  %v8642_v6 = vld [vmem:[#allocation3 + $0x158] sm:$0xff] }
 0x409   : > { %2999 = vrot.lane.b32.xlu0 %v8321_v59, %s6599_s26 }
 0x40a   : > { %v3536_v15 = vpop.permute.xlu1 %3535 }
 0x40b   : > { %v3534_v63 = vpop.permute.xlu0 %3533  ;;  %v3642_v39 = vsel %vm835_vm6, %v3610_v58, %v3536_v15 }
 0x40c   : > { %v3641_v10 = vsel %vm835_vm6, %v3609_v40, %v3534_v63  ;;  %3129 = vrot.lane.b32.xlu1 %v8329_v49, %s6598_s24 }
 0x40d   : > { %5993 = vmatprep.mubr.msk.f32.mxu1 %vm1289_vm7, %v3641_v10  ;;  %3127 = vrot.lane.b32.xlu0 %v8333_v5, %s6598_s24  ;;  %v4369_v10 = vld [vmem:[#allocation3 + $0x32] sm:$0xff] }
 0x40e   : > { %5994 = vmatmul.mubr.msk.f32.gmra.mrb[20].mxu1 %vm1289_vm7, %v3642_v39  ;;  %v3412_v59 = vpop.permute.xlu1 %3411 }
 0x40f   : > { %v3410_v18 = vpop.permute.xlu0 %3409  ;;  %v3612_v5 = vsel %vm329_vm0, %v8604_v9, %v3412_v59 }
 0x410   : > { %3005 = vrot.lane.b32.xlu1 %v8337_v24, %s6599_s26  ;;  %v3611_v27 = vsel %vm329_vm0, %v8602_v57, %v3410_v18 }
 0x411   : > { %3003 = vrot.lane.b32.xlu0 %v8341_v21, %s6599_s26 }
 0x412   : > { %v3540_v49 = vpop.permute.xlu1 %3539 }
 0x413   : > { %v3538_v37 = vpop.permute.xlu0 %3537  ;;  %v3644_v24 = vsel %vm835_vm6, %v3612_v5, %v3540_v49  ;;  %v4340_v49 = vld [vmem:[#allocation3 + $0x51] sm:$0xff] }
 0x414   : > { %v3643_v4 = vsel %vm835_vm6, %v3611_v27, %v3538_v37  ;;  %3133 = vrot.lane.b32.xlu1 %v8351_v25, %s6598_s24  ;;  %v4339_v27 = vld [vmem:[#allocation3 + $0x49] sm:$0xff] }
 0x415   : > { %5996 = vmatprep.mubr.msk.f32.mxu1 %vm1289_vm7, %v3643_v4  ;;  %3131 = vrot.lane.b32.xlu0 %v8358_v47, %s6598_s24  ;;  %v8656_v37 = vld [vmem:[#allocation3 + $0x168] sm:$0xff]  ;;  %v8658_v4 = vld [vmem:[#allocation3 + $0x170] sm:$0xff] }
 0x416   : > { %5997 = vmatmul.mubr.msk.f32.gmra.mrb[22].mxu1 %vm1289_vm7, %v3644_v24  ;;  %v3416_v21 = vpop.permute.xlu1 %3415 }
 0x417   : > { %v3414_v45 = vpop.permute.xlu0 %3413  ;;  %v3614_v47 = vsel %vm329_vm0, %v8624_v41, %v3416_v21 }
 0x418   : > { %3009 = vrot.lane.b32.xlu1 %v8369_v14, %s6599_s26  ;;  %v3613_v22 = vsel %vm329_vm0, %v8622_v20, %v3414_v45  ;;  %v4372_v45 = vld [vmem:[#allocation3 + $0x52] sm:$0xff] }
 0x419   : > { %3007 = vrot.lane.b32.xlu0 %v8373_v8, %s6599_s26 }
 0x41a   : > { %v3544_v25 = vpop.permute.xlu1 %3543 }
 0x41b   : > { %v3542_v12 = vpop.permute.xlu0 %3541  ;;  %v3646_v14 = vsel %vm835_vm6, %v3614_v47, %v3544_v25 }
 0x41c   : > { %v3645_v0 = vsel %vm835_vm6, %v3613_v22, %v3542_v12  ;;  %3137 = vrot.lane.b32.xlu1 %v8381_v48, %s6598_s24  ;;  %v4371_v12 = vld [vmem:[#allocation3 + $0x4a] sm:$0xff] }
 0x41d   : > { %5999 = vmatprep.mubr.msk.f32.mxu1 %vm1289_vm7, %v3645_v0  ;;  %3135 = vrot.lane.b32.xlu0 %v8385_v7, %s6598_s24  ;;  %v4370_v7 = vld [vmem:[#allocation3 + $0x3a] sm:$0xff] }
 0x41e   : > { %6000 = vmatmul.mubr.msk.f32.gmra.mrb[24].mxu1 %vm1289_vm7, %v3646_v14  ;;  %v3420_v8 = vpop.permute.xlu1 %3419 }
 0x41f   : > { %v3418_v17 = vpop.permute.xlu0 %3417  ;;  %v3616_v63 = vsel %vm329_vm0, %v8642_v6, %v3420_v8  ;;  %v4342_v8 = vld [vmem:[#allocation3 + $0x69] sm:$0xff] }
 0x420   : > { %4435 = vrot.lane.b32.xlu1 %v4338_v52, %s6599_s26  ;;  %v3615_v15 = vsel %vm329_vm0, %v8640_v31, %v3418_v17  ;;  %v2819_v17 = vld [vmem:[#allocation3] sm:$0xff] }
 0x421   : > { %4433 = vrot.lane.b32.xlu0 %v4337_v32, %s6599_s26  ;;  %v4341_v52 = vld [vmem:[#allocation3 + $0x61] sm:$0xff] }
 0x422   : > { %v3548_v48 = vpop.permute.xlu1 %3547  ;;  %v8672_v32 = vld [vmem:[#allocation3 + $0x180] sm:$0xff] }
 0x423   : > { %v3546_v40 = vpop.permute.xlu0 %3545  ;;  %v3648_v39 = vsel %vm835_vm6, %v3616_v63, %v3548_v48 }
 0x424   : > { %v3647_v58 = vsel %vm835_vm6, %v3615_v15, %v3546_v40  ;;  %4563 = vrot.lane.b32.xlu1 %v4370_v7, %s6598_s24  ;;  %v3171_v15 = vsel %vm329_vm0, %v2819_v17, %v8257_v61  ;;  %v2820_v40 = vld [vmem:[#allocation3 + $0x8] sm:$0xff] }
 0x425   : > { %6002 = vmatprep.mubr.msk.f32.mxu1 %vm1289_vm7, %v3647_v58  ;;  %4561 = vrot.lane.b32.xlu0 %v4369_v10, %s6598_s24  ;;  %v8676_v7 = vld [vmem:[#allocation3 + $0x188] sm:$0xff]  ;;  %v3172_v61 = vsel %vm329_vm0, %v2820_v40, %v8247_v50 }
 0x426   : > { %6003 = vmatmul.mubr.msk.f32.gmra.mrb[26].mxu1 %vm1289_vm7, %v3648_v39  ;;  %v3424_v59 = vpop.permute.xlu1 %3423  ;;  %v4374_v10 = vld [vmem:[#allocation3 + $0x6a] sm:$0xff] }
 0x427   : > { %v3422_v18 = vpop.permute.xlu0 %3421  ;;  %v3618_v25 = vsel %vm329_vm0, %v8658_v4, %v3424_v59  ;;  %v9268_v17 = vld [vmem:[#allocation51_spill] sm:$0xff] }
 0x428   : > { %4439 = vrot.lane.b32.xlu1 %v4340_v49, %s6599_s26  ;;  %v3617_v24 = vsel %vm329_vm0, %v8656_v37, %v3422_v18  ;;  %v4373_v18 = vld [vmem:[#allocation3 + $0x62] sm:$0xff] }
 0x429   : > { %4437 = vrot.lane.b32.xlu0 %v4339_v27, %s6599_s26  ;;  %v3203_v27 = vsel %vm835_vm6, %v3171_v15, %v8273_v28  ;;  %v9266_v28 = vld [vmem:[#allocation55_spill] sm:$0xff]  ;;  %v9269_v15 = vld [vmem:[#allocation54_spill] sm:$0xff] }
 0x42a   : > { %v3552_v5 = vpop.permute.xlu1 %3551 }
 0x42b   : > { %v3550_v21 = vpop.permute.xlu0 %3549  ;;  %v3650_v47 = vsel %vm835_vm6, %v3618_v25, %v3552_v5  ;;  %v3204_v25 = vsel %vm835_vm6, %v3172_v61, %v8266_v30  ;;  %v9267_v30 = vld [vmem:[#allocation52_spill] sm:$0xff]  ;;  %v9274_v61 = vld [vmem:[#allocation57_spill] sm:$0xff] }
 0x42c   : > { %v3649_v22 = vsel %vm835_vm6, %v3617_v24, %v3550_v21  ;;  %4567 = vrot.lane.b32.xlu1 %v4372_v45, %s6598_s24  ;;  %v4344_v21 = vld [vmem:[#allocation3 + $0x81] sm:$0xff]  ;;  %v4343_v45 = vld [vmem:[#allocation3 + $0x79] sm:$0xff] }
 0x42d   : > { %6005 = vmatprep.mubr.msk.f32.mxu1 %vm1289_vm7, %v3649_v22  ;;  %4565 = vrot.lane.b32.xlu0 %v4371_v12, %s6598_s24  ;;  %v9264_v22 = vld [vmem:[#allocation53_spill] sm:$0xff]  ;;  %v9265_v12 = vld [vmem:[#allocation50_spill] sm:$0xff] }
 0x42e   : > { %6006 = vmatmul.mubr.msk.f32.gmra.mrb[28].mxu1 %vm1289_vm7, %v3650_v47  ;;  %v3428_v0 = vpop.permute.xlu1 %3427  ;;  %v3173_v50 = vsel %vm329_vm0, %v9265_v12, %v9264_v22  ;;  %v3177_v22 = vsel %vm329_vm0, %v8395_v43, %v8411_v53  ;;  %v3179_v53 = vsel %vm329_vm0, %v8429_v36, %v8447_v54 }
 0x42f   : > { %v3426_v14 = vpop.permute.xlu0 %3425  ;;  %v3620_v39 = vsel %vm329_vm0, %v8676_v7, %v3428_v0  ;;  %v3205_v47 = vsel %vm835_vm6, %v3173_v50, %v9266_v28  ;;  %v3209_v12 = vsel %vm835_vm6, %v3177_v22, %v8419_v60  ;;  %v4351_v22 = vld [vmem:[#allocation3 + $0xd9] sm:$0xff] }
 0x430   : > { %4443 = vrot.lane.b32.xlu1 %v4342_v8, %s6599_s26  ;;  %v3619_v63 = vsel %vm329_vm0, %v8672_v32, %v3426_v14  ;;  %v4376_v8 = vld [vmem:[#allocation3 + $0x82] sm:$0xff] }
 0x431   : > { %4441 = vrot.lane.b32.xlu0 %v4341_v52, %s6599_s26  ;;  %v3174_v52 = vsel %vm329_vm0, %v9268_v17, %v9267_v30  ;;  %v4377_v30 = vld [vmem:[#allocation3 + $0x92] sm:$0xff] }
 0x432   : > { %v3556_v48 = vpop.permute.xlu1 %3555  ;;  %v3206_v40 = vsel %vm835_vm6, %v3174_v52, %v9269_v15 }
 0x433   : > { %v3554_v58 = vpop.permute.xlu0 %3553  ;;  %v3652_v49 = vsel %vm835_vm6, %v3620_v39, %v3556_v48  ;;  %v4375_v48 = vld [vmem:[#allocation3 + $0x7a] sm:$0xff]  ;;  %v9272_v39 = vld [vmem:[#allocation62_spill] sm:$0xff] }
 0x434   : > { %v3651_v59 = vsel %vm835_vm6, %v3619_v63, %v3554_v58  ;;  %4571 = vrot.lane.b32.xlu1 %v4374_v10, %s6598_s24  ;;  %v9270_v63 = vld [vmem:[#allocation59_spill] sm:$0xff]  ;;  %v9271_v58 = vld [vmem:[#allocation56_spill] sm:$0xff] }
 0x435   : > { %4569 = vrot.lane.b32.xlu0 %v4373_v18, %s6598_s24  ;;  %6008 = vmatprep.mubr.msk.f32.mxu1 %vm1289_vm7, %v3651_v59  ;;  %v3175_v10 = vsel %vm329_vm0, %v9271_v58, %v9270_v63  ;;  %v4346_v18 = vld [vmem:[#allocation3 + $0x99] sm:$0xff] }
 0x436   : > { %v3094_v5 = vpop.permute.xlu1 %3093  ;;  %6009 = vmatmul.mubr.msk.f32.gmra.mrb[30].mxu1 %vm1289_vm7, %v3652_v49  ;;  %v3207_v46 = vsel %vm835_vm6, %v3175_v10, %v9272_v39  ;;  %v9273_v49 = vld [vmem:[#allocation58_spill] sm:$0xff] }
 0x437   : > { %v3092_v24 = vpop.permute.xlu0 %3091  ;;  %6015 = vmatprep.mubr.msk.f32.mxu1 %vm1289_vm7, %v3203_v27  ;;  %v3176_v27 = vsel %vm329_vm0, %v9274_v61, %v9273_v49  ;;  %v4350_v10 = vld [vmem:[#allocation3 + $0xc9] sm:$0xff] }
 0x438   : > { %4447 = vrot.lane.b32.xlu1 %v4344_v21, %s6599_s26  ;;  %v4345_v21 = vld [vmem:[#allocation3 + $0x91] sm:$0xff]  ;;  %v3211_v60 = vsel %vm835_vm6, %v3179_v53, %v3092_v24  ;;  %v4381_v49 = vld [vmem:[#allocation3 + $0xc2] sm:$0xff] }
 0x439   : > { %4445 = vrot.lane.b32.xlu0 %v4343_v45, %s6599_s26  ;;  %v9275_v45 = vld [vmem:[#allocation61_spill] sm:$0xff] }
 0x43a   : > { %v2970_v0 = vpop.permute.xlu1 %2969  ;;  %6016 = vmatmul.mubr.msk.f32.vlgmr.msra.gmra.mrb[0].mxu1 %vm1289_vm7, %v3204_v25  ;;  %v3208_v25 = vsel %vm835_vm6, %v3176_v27, %v9275_v45  ;;  %v4352_v45 = vld [vmem:[#allocation3 + $0xe1] sm:$0xff] }
 0x43b   : > { %v2968_v14 = vpop.permute.xlu0 %2967  ;;  %6018 = vmatprep.mubr.msk.f32.mxu1 %vm1289_vm7, %v3205_v47  ;;  %6150 = vmatpush3.bf16.msk.msra.mxu1 %vm7229_vm5, %v8537_v1  ;;  %v4378_v47 = vld [vmem:[#allocation3 + $0x9a] sm:$0xff] }
 0x43c   : > { %4575 = vrot.lane.b32.xlu1 %v4376_v8, %s6598_s24  ;;  %v3178_v8 = vsel %vm329_vm0, %v8397_v38, %v8408_v11  ;;  %v4348_v11 = vld [vmem:[#allocation3 + $0xb1] sm:$0xff]  ;;  %v3180_v38 = vsel %vm329_vm0, %v8431_v13, %v8444_v51  ;;  %v3181_v54 = vsel %vm329_vm0, %v8457_v16, %v2968_v14  ;;  %v3182_v13 = vsel %vm329_vm0, %v8459_v42, %v2970_v0  ;;  %v4349_v0 = vld [vmem:[#allocation3 + $0xc1] sm:$0xff] }
 0x43d   : > { %4573 = vrot.lane.b32.xlu0 %v4375_v48, %s6598_s24  ;;  %v3210_v43 = vsel %vm835_vm6, %v3178_v8, %v8417_v55  ;;  %v4347_v55 = vld [vmem:[#allocation3 + $0xa9] sm:$0xff]  ;;  %v3212_v36 = vsel %vm835_vm6, %v3180_v38, %v3094_v5  ;;  %v4383_v8 = vld [vmem:[#allocation3 + $0xda] sm:$0xff] }
 0x43e   : > { %v3098_v1 = vpop.permute.xlu1 %3097  ;;  %6019 = vmatmul.mubr.msk.f32.gmra.mrb[2].mxu1 %vm1289_vm7, %v3206_v40  ;;  %v4380_v40 = vld [vmem:[#allocation3 + $0xb2] sm:$0xff]  ;;  %v4379_v51 = vld [vmem:[#allocation3 + $0xaa] sm:$0xff] }
 0x43f   : > { %v3096_v59 = vpop.permute.xlu0 %3095  ;;  %6021 = vmatprep.mubr.msk.f32.mxu1 %vm1289_vm7, %v3207_v46  ;;  %v3214_v5 = vsel %vm835_vm6, %v3182_v13, %v3098_v1  ;;  %v4356_v13 = vld [vmem:[#allocation3 + $0x111] sm:$0xff] }
 0x440   : > { %4451 = vrot.lane.b32.xlu1 %v4346_v18, %s6599_s26  ;;  %v3213_v24 = vsel %vm835_vm6, %v3181_v54, %v3096_v59  ;;  %v4382_v18 = vld [vmem:[#allocation3 + $0xca] sm:$0xff]  ;;  %v4386_v54 = vld [vmem:[#allocation3 + $0xfa] sm:$0xff] }
 0x441   : > { %4449 = vrot.lane.b32.xlu0 %v4345_v21, %s6599_s26 }
 0x442   : > { %v2974_v50 = vpop.permute.xlu1 %2973  ;;  %6022 = vmatmul.mubr.msk.f32.gmra.mrb[4].mxu1 %vm1289_vm7, %v3208_v25 }
 0x443   : > { %v2972_v28 = vpop.permute.xlu0 %2971  ;;  %6024 = vmatprep.mubr.msk.f32.mxu1 %vm1289_vm7, %v3209_v12  ;;  %v3184_v42 = vsel %vm329_vm0, %v8479_v56, %v2974_v50 }
 0x444   : > { %4579 = vrot.lane.b32.xlu1 %v4378_v47, %s6598_s24  ;;  %v3183_v16 = vsel %vm329_vm0, %v8477_v23, %v2972_v28  ;;  %v4384_v47 = vld [vmem:[#allocation3 + $0xe2] sm:$0xff] }
 0x445   : > { %4577 = vrot.lane.b32.xlu0 %v4377_v30, %s6598_s24 }
 0x446   : > { %v3102_v17 = vpop.permute.xlu1 %3101  ;;  %6025 = vmatmul.mubr.msk.f32.gmra.mrb[6].mxu1 %vm1289_vm7, %v3210_v43 }
 0x447   : > { %v3100_v52 = vpop.permute.xlu0 %3099  ;;  %6027 = vmatprep.mubr.msk.f32.mxu1 %vm1289_vm7, %v3211_v60  ;;  %v3216_v39 = vsel %vm835_vm6, %v3184_v42, %v3102_v17  ;;  %v4354_v60 = vld [vmem:[#allocation3 + $0xf9] sm:$0xff]  ;;  %v4387_v42 = vld [vmem:[#allocation3 + $0x10a] sm:$0xff] }
 0x448   : > { %4455 = vrot.lane.b32.xlu1 %v4348_v11, %s6599_s26  ;;  %v3215_v14 = vsel %vm835_vm6, %v3183_v16, %v3100_v52  ;;  %v4353_v11 = vld [vmem:[#allocation3 + $0xf1] sm:$0xff]  ;;  %v4355_v16 = vld [vmem:[#allocation3 + $0x109] sm:$0xff] }
 0x449   : > { %4453 = vrot.lane.b32.xlu0 %v4347_v55, %s6599_s26 }
 0x44a   : > { %v2978_v48 = vpop.permute.xlu1 %2977  ;;  %6028 = vmatmul.mubr.msk.f32.gmra.mrb[8].mxu1 %vm1289_vm7, %v3212_v36 }
 0x44b   : > { %v2976_v15 = vpop.permute.xlu0 %2975  ;;  %6030 = vmatprep.mubr.msk.f32.mxu1 %vm1289_vm7, %v3213_v24  ;;  %v3186_v56 = vsel %vm329_vm0, %v8499_v19, %v2978_v48  ;;  %v4385_v24 = vld [vmem:[#allocation3 + $0xf2] sm:$0xff] }
 0x44c   : > { %4583 = vrot.lane.b32.xlu1 %v4380_v40, %s6598_s24  ;;  %v3185_v23 = vsel %vm329_vm0, %v8497_v62, %v2976_v15 }
 0x44d   : > { %4581 = vrot.lane.b32.xlu0 %v4379_v51, %s6598_s24 }
 0x44e   : > { %v3106_v63 = vpop.permute.xlu1 %3105  ;;  %6031 = vmatmul.mubr.msk.f32.gmra.mrb[10].mxu1 %vm1289_vm7, %v3214_v5 }
 0x44f   : > { %v3104_v58 = vpop.permute.xlu0 %3103  ;;  %6033 = vmatprep.mubr.msk.f32.mxu1 %vm1289_vm7, %v3215_v14  ;;  %v3218_v61 = vsel %vm835_vm6, %v3186_v56, %v3106_v63 }
 0x450   : > { %4459 = vrot.lane.b32.xlu1 %v4350_v10, %s6599_s26  ;;  %v3217_v46 = vsel %vm835_vm6, %v3185_v23, %v3104_v58  ;;  %v4388_v10 = vld [vmem:[#allocation3 + $0x112] sm:$0xff] }
 0x451   : > { %4457 = vrot.lane.b32.xlu0 %v4349_v0, %s6599_s26 }
 0x452   : > { %v2982_v1 = vpop.permute.xlu1 %2981  ;;  %6034 = vmatmul.mubr.msk.f32.gmra.mrb[12].mxu1 %vm1289_vm7, %v3216_v39 }
 0x453   : > { %v2980_v59 = vpop.permute.xlu0 %2979  ;;  %6036 = vmatprep.mubr.msk.f32.mxu1 %vm1289_vm7, %v3217_v46  ;;  %v3188_v25 = vsel %vm329_vm0, %v8519_v33, %v2982_v1  ;;  %v4358_v46 = vld [vmem:[#allocation3 + $0x129] sm:$0xff] }
 0x454   : > { %4587 = vrot.lane.b32.xlu1 %v4382_v18, %s6598_s24  ;;  %v3187_v27 = vsel %vm329_vm0, %v8517_v29, %v2980_v59  ;;  %v4357_v18 = vld [vmem:[#allocation3 + $0x121] sm:$0xff] }
 0x455   : > { %4585 = vrot.lane.b32.xlu0 %v4381_v49, %s6598_s24 }
 0x456   : > { %v3110_v62 = vpop.permute.xlu1 %3109  ;;  %6037 = vmatmul.mubr.msk.f32.gmra.mrb[14].mxu1 %vm1289_vm7, %v3218_v61 }
 0x457   : > { %v3108_v21 = vpop.permute.xlu0 %3107  ;;  %v3220_v12 = vsel %vm835_vm6, %v3188_v25, %v3110_v62  ;;  %v4390_v62 = vld [vmem:[#allocation3 + $0x12a] sm:$0xff] }
 0x458   : > { %v3219_v19 = vsel %vm835_vm6, %v3187_v27, %v3108_v21  ;;  %4463 = vrot.lane.b32.xlu1 %v4352_v45, %s6599_s26  ;;  %v4389_v27 = vld [vmem:[#allocation3 + $0x122] sm:$0xff] }
 0x459   : > { %4461 = vrot.lane.b32.xlu0 %v4351_v22, %s6599_s26  ;;  %6039 = vmatprep.mubr.msk.f32.mxu1 %vm1289_vm7, %v3219_v19  ;;  %v4360_v19 = vld [vmem:[#allocation3 + $0x141] sm:$0xff] }
 0x45a   : > { %v2986_v50 = vpop.permute.xlu1 %2985  ;;  %6040 = vmatmul.mubr.msk.f32.gmra.mrb[16].mxu1 %vm1289_vm7, %v3220_v12 }
 0x45b   : > { %v2984_v28 = vpop.permute.xlu0 %2983  ;;  %v3190_v17 = vsel %vm329_vm0, %v8541_v26, %v2986_v50  ;;  %v4359_v50 = vld [vmem:[#allocation3 + $0x139] sm:$0xff] }
 0x45c   : > { %4591 = vrot.lane.b32.xlu1 %v4384_v47, %s6598_s24  ;;  %v3189_v43 = vsel %vm329_vm0, %v8539_v3, %v2984_v28 }
 0x45d   : > { %4589 = vrot.lane.b32.xlu0 %v4383_v8, %s6598_s24 }
 0x45e   : > { %v3114_v30 = vpop.permute.xlu1 %3113 }
 0x45f   : > { %v3112_v53 = vpop.permute.xlu0 %3111  ;;  %v3222_v38 = vsel %vm835_vm6, %v3190_v17, %v3114_v30  ;;  %v4392_v30 = vld [vmem:[#allocation3 + $0x142] sm:$0xff] }
 0x460   : > { %v3221_v52 = vsel %vm835_vm6, %v3189_v43, %v3112_v53  ;;  %4467 = vrot.lane.b32.xlu1 %v4354_v60, %s6599_s26  ;;  %v4391_v43 = vld [vmem:[#allocation3 + $0x13a] sm:$0xff] }
 0x461   : > { %4465 = vrot.lane.b32.xlu0 %v4353_v11, %s6599_s26  ;;  %6042 = vmatprep.mubr.msk.f32.mxu1 %vm1289_vm7, %v3221_v52  ;;  %v4362_v52 = vld [vmem:[#allocation3 + $0x159] sm:$0xff] }
 0x462   : > { %v2990_v55 = vpop.permute.xlu1 %2989  ;;  %6043 = vmatmul.mubr.msk.f32.gmra.mrb[18].mxu1 %vm1289_vm7, %v3222_v38 }
 0x463   : > { %v2988_v36 = vpop.permute.xlu0 %2987  ;;  %v3192_v51 = vsel %vm329_vm0, %v8564_v44, %v2990_v55  ;;  %v4361_v55 = vld [vmem:[#allocation3 + $0x151] sm:$0xff] }
 0x464   : > { %4595 = vrot.lane.b32.xlu1 %v4386_v54, %s6598_s24  ;;  %v3191_v15 = vsel %vm329_vm0, %v8562_v2, %v2988_v36 }
 0x465   : > { %4593 = vrot.lane.b32.xlu0 %v4385_v24, %s6598_s24 }
 0x466   : > { %v3118_v48 = vpop.permute.xlu1 %3117 }
 0x467   : > { %v3116_v40 = vpop.permute.xlu0 %3115  ;;  %v3224_v14 = vsel %vm835_vm6, %v3192_v51, %v3118_v48  ;;  %v4394_v48 = vld [vmem:[#allocation3 + $0x15a] sm:$0xff] }
 0x468   : > { %v3223_v5 = vsel %vm835_vm6, %v3191_v15, %v3116_v40  ;;  %4471 = vrot.lane.b32.xlu1 %v4356_v13, %s6599_s26  ;;  %v4393_v15 = vld [vmem:[#allocation3 + $0x152] sm:$0xff] }
 0x469   : > { %4469 = vrot.lane.b32.xlu0 %v4355_v16, %s6599_s26  ;;  %6045 = vmatprep.mubr.msk.f32.mxu1 %vm1289_vm7, %v3223_v5  ;;  %v4364_v5 = vld [vmem:[#allocation3 + $0x171] sm:$0xff] }
 0x46a   : > { %v2994_v63 = vpop.permute.xlu1 %2993  ;;  %6046 = vmatmul.mubr.msk.f32.gmra.mrb[20].mxu1 %vm1289_vm7, %v3224_v14 }
 0x46b   : > { %v2992_v58 = vpop.permute.xlu0 %2991  ;;  %v3194_v1 = vsel %vm329_vm0, %v8584_v35, %v2994_v63  ;;  %v4363_v63 = vld [vmem:[#allocation3 + $0x169] sm:$0xff] }
 0x46c   : > { %4599 = vrot.lane.b32.xlu1 %v4388_v10, %s6598_s24  ;;  %v3193_v39 = vsel %vm329_vm0, %v8582_v34, %v2992_v58 }
 0x46d   : > { %4597 = vrot.lane.b32.xlu0 %v4387_v42, %s6598_s24 }
 0x46e   : > { %v3122_v0 = vpop.permute.xlu1 %3121 }
 0x46f   : > { %v3120_v23 = vpop.permute.xlu0 %3119  ;;  %v3226_v56 = vsel %vm835_vm6, %v3194_v1, %v3122_v0  ;;  %v4396_v0 = vld [vmem:[#allocation3 + $0x172] sm:$0xff] }
 0x470   : > { %v3225_v59 = vsel %vm835_vm6, %v3193_v39, %v3120_v23  ;;  %4475 = vrot.lane.b32.xlu1 %v4358_v46, %s6599_s26  ;;  %v4395_v39 = vld [vmem:[#allocation3 + $0x16a] sm:$0xff] }
 0x471   : > { %4473 = vrot.lane.b32.xlu0 %v4357_v18, %s6599_s26  ;;  %6048 = vmatprep.mubr.msk.f32.mxu1 %vm1289_vm7, %v3225_v59  ;;  %v4366_v59 = vld [vmem:[#allocation3 + $0x189] sm:$0xff] }
 0x472   : > { %v2998_v49 = vpop.permute.xlu1 %2997  ;;  %6049 = vmatmul.mubr.msk.f32.gmra.mrb[22].mxu1 %vm1289_vm7, %v3226_v56 }
 0x473   : > { %v2996_v61 = vpop.permute.xlu0 %2995  ;;  %v3196_v22 = vsel %vm329_vm0, %v8604_v9, %v2998_v49  ;;  %v4365_v49 = vld [vmem:[#allocation3 + $0x181] sm:$0xff] }
 0x474   : > { %4603 = vrot.lane.b32.xlu1 %v4390_v62, %s6598_s24  ;;  %v3195_v45 = vsel %vm329_vm0, %v8602_v57, %v2996_v61 }
 0x475   : > { %4601 = vrot.lane.b32.xlu0 %v4389_v27, %s6598_s24 }
 0x476   : > { %v3126_v21 = vpop.permute.xlu1 %3125 }
 0x477   : > { %v3124_v25 = vpop.permute.xlu0 %3123  ;;  %v3228_v28 = vsel %vm835_vm6, %v3196_v22, %v3126_v21  ;;  %v4398_v21 = vld [vmem:[#allocation3 + $0x18a] sm:$0xff] }
 0x478   : > { %v3227_v12 = vsel %vm835_vm6, %v3195_v45, %v3124_v25  ;;  %4479 = vrot.lane.b32.xlu1 %v4360_v19, %s6599_s26  ;;  %v4397_v45 = vld [vmem:[#allocation3 + $0x182] sm:$0xff]  ;;  %v4305_v19 = vld [vmem:[#allocation3 + $0x30] sm:$0xff] }
 0x479   : > { %4477 = vrot.lane.b32.xlu0 %v4359_v50, %s6599_s26  ;;  %6051 = vmatprep.mubr.msk.f32.mxu1 %vm1289_vm7, %v3227_v12  ;;  %v4368_v25 = vld [vmem:[#allocation3 + $0x1a1] sm:$0xff]  ;;  %v4367_v12 = vld [vmem:[#allocation3 + $0x199] sm:$0xff] }
 0x47a   : > { %v3002_v47 = vpop.permute.xlu1 %3001  ;;  %6052 = vmatmul.mubr.msk.f32.gmra.mrb[24].mxu1 %vm1289_vm7, %v3228_v28  ;;  %v4306_v50 = vld [vmem:[#allocation3 + $0x38] sm:$0xff] }
 0x47b   : > { %v3000_v8 = vpop.permute.xlu0 %2999  ;;  %v3198_v11 = vsel %vm329_vm0, %v8624_v41, %v3002_v47 }
 0x47c   : > { %4607 = vrot.lane.b32.xlu1 %v4392_v30, %s6598_s24  ;;  %v3197_v60 = vsel %vm329_vm0, %v8622_v20, %v3000_v8 }
 0x47d   : > { %4605 = vrot.lane.b32.xlu0 %v4391_v43, %s6598_s24 }
 0x47e   : > { %v3130_v53 = vpop.permute.xlu1 %3129 }
 0x47f   : > { %v3128_v17 = vpop.permute.xlu0 %3127  ;;  %v3230_v36 = vsel %vm835_vm6, %v3198_v11, %v3130_v53  ;;  %v4400_v53 = vld [vmem:[#allocation3 + $0x1a2] sm:$0xff] }
 0x480   : > { %v3229_v38 = vsel %vm835_vm6, %v3197_v60, %v3128_v17  ;;  %4483 = vrot.lane.b32.xlu1 %v4362_v52, %s6599_s26  ;;  %v4399_v17 = vld [vmem:[#allocation3 + $0x19a] sm:$0xff]  ;;  %v4307_v11 = vld [vmem:[#allocation3 + $0x48] sm:$0xff] }
 0x481   : > { %4481 = vrot.lane.b32.xlu0 %v4361_v55, %s6599_s26  ;;  %6054 = vmatprep.mubr.msk.f32.mxu1 %vm1289_vm7, %v3229_v38  ;;  %v4308_v55 = vld [vmem:[#allocation3 + $0x50] sm:$0xff] }
 0x482   : > { %v3006_v54 = vpop.permute.xlu1 %3005  ;;  %6055 = vmatmul.mubr.msk.f32.gmra.mrb[26].mxu1 %vm1289_vm7, %v3230_v36 }
 0x483   : > { %v3004_v24 = vpop.permute.xlu0 %3003  ;;  %v3200_v16 = vsel %vm329_vm0, %v8642_v6, %v3006_v54 }
 0x484   : > { %4611 = vrot.lane.b32.xlu1 %v4394_v48, %s6598_s24  ;;  %v3199_v13 = vsel %vm329_vm0, %v8640_v31, %v3004_v24 }
 0x485   : > { %4609 = vrot.lane.b32.xlu0 %v4393_v15, %s6598_s24 }
 0x486   : > { %v3134_v40 = vpop.permute.xlu1 %3133 }
 0x487   : > { %v3132_v51 = vpop.permute.xlu0 %3131  ;;  %v3232_v58 = vsel %vm835_vm6, %v3200_v16, %v3134_v40  ;;  %v4310_v16 = vld [vmem:[#allocation3 + $0x68] sm:$0xff] }
 0x488   : > { %v3231_v14 = vsel %vm835_vm6, %v3199_v13, %v3132_v51  ;;  %4487 = vrot.lane.b32.xlu1 %v4364_v5, %s6599_s26  ;;  %v4309_v51 = vld [vmem:[#allocation3 + $0x60] sm:$0xff] }
 0x489   : > { %4485 = vrot.lane.b32.xlu0 %v4363_v63, %s6599_s26  ;;  %6057 = vmatprep.mubr.msk.f32.mxu1 %vm1289_vm7, %v3231_v14 }
 0x48a   : > { %v3010_v10 = vpop.permute.xlu1 %3009  ;;  %6058 = vmatmul.mubr.msk.f32.gmra.mrb[28].mxu1 %vm1289_vm7, %v3232_v58 }
 0x48b   : > { %v3008_v42 = vpop.permute.xlu0 %3007  ;;  %v3202_v18 = vsel %vm329_vm0, %v8658_v4, %v3010_v10 }
 0x48c   : > { %4615 = vrot.lane.b32.xlu1 %v4396_v0, %s6598_s24  ;;  %v3201_v46 = vsel %vm329_vm0, %v8656_v37, %v3008_v42 }
 0x48d   : > { %4613 = vrot.lane.b32.xlu0 %v4395_v39, %s6598_s24 }
 0x48e   : > { %v3138_v23 = vpop.permute.xlu1 %3137 }
 0x48f   : > { %v3136_v1 = vpop.permute.xlu0 %3135  ;;  %v3234_v61 = vsel %vm835_vm6, %v3202_v18, %v3138_v23  ;;  %v4311_v23 = vld [vmem:[#allocation3 + $0x78] sm:$0xff] }
 0x490   : > { %v3233_v56 = vsel %vm835_vm6, %v3201_v46, %v3136_v1  ;;  %4491 = vrot.lane.b32.xlu1 %v4366_v59, %s6599_s26  ;;  %v4312_v1 = vld [vmem:[#allocation3 + $0x80] sm:$0xff] }
 0x491   : > { %4489 = vrot.lane.b32.xlu0 %v4365_v49, %s6599_s26  ;;  %6060 = vmatprep.mubr.msk.f32.mxu1 %vm1289_vm7, %v3233_v56 }
 0x492   : > { %v4436_v62 = vpop.permute.xlu1 %4435  ;;  %6061 = vmatmul.mubr.msk.f32.gmra.mrb[30].mxu1 %vm1289_vm7, %v3234_v61 }
 0x493   : > { %v4434_v27 = vpop.permute.xlu0 %4433  ;;  %v4658_v8 = vsel %vm329_vm0, %v4306_v50, %v4436_v62 }
 0x494   : > { %4619 = vrot.lane.b32.xlu1 %v4398_v21, %s6598_s24  ;;  %v4657_v28 = vsel %vm329_vm0, %v4305_v19, %v4434_v27  ;;  %v4313_v21 = vld [vmem:[#allocation3 + $0x90] sm:$0xff] }
 0x495   : > { %4617 = vrot.lane.b32.xlu0 %v4397_v45, %s6598_s24 }
 0x496   : > { %v4564_v22 = vpop.permute.xlu1 %4563 }
 0x497   : > { %v4562_v47 = vpop.permute.xlu0 %4561  ;;  %v4690_v43 = vsel %vm835_vm6, %v4658_v8, %v4564_v22 }
 0x498   : > { %v4689_v30 = vsel %vm835_vm6, %v4657_v28, %v4562_v47  ;;  %4495 = vrot.lane.b32.xlu1 %v4368_v25, %s6599_s26  ;;  %v4314_v25 = vld [vmem:[#allocation3 + $0x98] sm:$0xff] }
 0x499   : > { %4493 = vrot.lane.b32.xlu0 %v4367_v12, %s6599_s26  ;;  %6067 = vmatprep.mubr.msk.f32.mxu1 %vm1289_vm7, %v4689_v30  ;;  %v4315_v30 = vld [vmem:[#allocation3 + $0xa8] sm:$0xff] }
 0x49a   : > { %v4440_v60 = vpop.permute.xlu1 %4439  ;;  %6068 = vmatmul.mubr.msk.f32.vlgmr.msra.gmra.mrb[0].mxu1 %vm1289_vm7, %v4690_v43 }
 0x49b   : > { %v4438_v52 = vpop.permute.xlu0 %4437  ;;  %v4660_v24 = vsel %vm329_vm0, %v4308_v55, %v4440_v60 }
 0x49c   : > { %4623 = vrot.lane.b32.xlu1 %v4400_v53, %s6598_s24  ;;  %v4659_v36 = vsel %vm329_vm0, %v4307_v11, %v4438_v52  ;;  %v4316_v53 = vld [vmem:[#allocation3 + $0xb0] sm:$0xff] }
 0x49d   : > { %4621 = vrot.lane.b32.xlu0 %v4399_v17, %s6598_s24 }
 0x49e   : > { %v4568_v38 = vpop.permute.xlu1 %4567 }
 0x49f   : > { %v4566_v54 = vpop.permute.xlu0 %4565  ;;  %v4692_v15 = vsel %vm835_vm6, %v4660_v24, %v4568_v38 }
 0x4a0   : > { %v4691_v48 = vsel %vm835_vm6, %v4659_v36, %v4566_v54 }
 0x4a1   : > { %6070 = vmatprep.mubr.msk.f32.mxu1 %vm1289_vm7, %v4691_v48 }
 0x4a2   : > { %v4444_v40 = vpop.permute.xlu1 %4443  ;;  %6071 = vmatmul.mubr.msk.f32.gmra.mrb[2].mxu1 %vm1289_vm7, %v4692_v15 }
 0x4a3   : > { %v4442_v13 = vpop.permute.xlu0 %4441  ;;  %v4662_v58 = vsel %vm329_vm0, %v4310_v16, %v4444_v40 }
 0x4a4   : > { %v4661_v14 = vsel %vm329_vm0, %v4309_v51, %v4442_v13 }
 0x4a6   : > { %v4572_v5 = vpop.permute.xlu1 %4571 }
 0x4a7   : > { %v4570_v63 = vpop.permute.xlu0 %4569  ;;  %v4694_v42 = vsel %vm835_vm6, %v4662_v58, %v4572_v5 }
 0x4a8   : > { %v4693_v10 = vsel %vm835_vm6, %v4661_v14, %v4570_v63 }
 0x4a9   : > { %6073 = vmatprep.mubr.msk.f32.mxu1 %vm1289_vm7, %v4693_v10 }
 0x4aa   : > { %v4448_v0 = vpop.permute.xlu1 %4447  ;;  %6074 = vmatmul.mubr.msk.f32.gmra.mrb[4].mxu1 %vm1289_vm7, %v4694_v42 }
 0x4ab   : > { %v4446_v39 = vpop.permute.xlu0 %4445  ;;  %v4664_v56 = vsel %vm329_vm0, %v4312_v1, %v4448_v0 }
 0x4ac   : > { %v4663_v59 = vsel %vm329_vm0, %v4311_v23, %v4446_v39 }
 0x4ae   : > { %v4576_v46 = vpop.permute.xlu1 %4575 }
 0x4af   : > { %v4574_v18 = vpop.permute.xlu0 %4573  ;;  %v4696_v61 = vsel %vm835_vm6, %v4664_v56, %v4576_v46 }
 0x4b0   : > { %v4695_v49 = vsel %vm835_vm6, %v4663_v59, %v4574_v18 }
 0x4b1   : > { %6076 = vmatprep.mubr.msk.f32.mxu1 %vm1289_vm7, %v4695_v49 }
 0x4b2   : > { %v4452_v62 = vpop.permute.xlu1 %4451  ;;  %6077 = vmatmul.mubr.msk.f32.gmra.mrb[6].mxu1 %vm1289_vm7, %v4696_v61 }
 0x4b3   : > { %v4450_v27 = vpop.permute.xlu0 %4449  ;;  %v4666_v12 = vsel %vm329_vm0, %v4314_v25, %v4452_v62 }
 0x4b4   : > { %v4665_v19 = vsel %vm329_vm0, %v4313_v21, %v4450_v27 }
 0x4b6   : > { %v4580_v45 = vpop.permute.xlu1 %4579 }
 0x4b7   : > { %v4578_v22 = vpop.permute.xlu0 %4577  ;;  %v4698_v28 = vsel %vm835_vm6, %v4666_v12, %v4580_v45 }
 0x4b8   : > { %v4697_v50 = vsel %vm835_vm6, %v4665_v19, %v4578_v22 }
 0x4b9   : > { %6079 = vmatprep.mubr.msk.f32.mxu1 %vm1289_vm7, %v4697_v50 }
 0x4ba   : > { %v4456_v47 = vpop.permute.xlu1 %4455  ;;  %6080 = vmatmul.mubr.msk.f32.gmra.mrb[8].mxu1 %vm1289_vm7, %v4698_v28 }
 0x4bb   : > { %v4454_v8 = vpop.permute.xlu0 %4453  ;;  %v4668_v52 = vsel %vm329_vm0, %v4316_v53, %v4456_v47 }
 0x4bc   : > { %v4667_v60 = vsel %vm329_vm0, %v4315_v30, %v4454_v8 }
 0x4be   : > { %v4584_v43 = vpop.permute.xlu1 %4583 }
 0x4bf   : > { %v4582_v17 = vpop.permute.xlu0 %4581  ;;  %v4700_v38 = vsel %vm835_vm6, %v4668_v52, %v4584_v43 }
 0x4c0   : > { %v4699_v11 = vsel %vm835_vm6, %v4667_v60, %v4582_v17 }
 0x4c1   : > { %6082 = vmatprep.mubr.msk.f32.mxu1 %vm1289_vm7, %v4699_v11 }
 0x4c2   : > { %v4460_v55 = vpop.permute.xlu1 %4459  ;;  %6083 = vmatmul.mubr.msk.f32.gmra.mrb[10].mxu1 %vm1289_vm7, %v4700_v38 }
 0x4c3   : > { %v4458_v36 = vpop.permute.xlu0 %4457  ;;  %v4670_v15 = vsel %vm329_vm0, %v8519_v33, %v4460_v55 }
 0x4c4   : > { %v4669_v24 = vsel %vm329_vm0, %v8517_v29, %v4458_v36 }
 0x4c6   : > { %v4588_v54 = vpop.permute.xlu1 %4587 }
 0x4c7   : > { %v4586_v48 = vpop.permute.xlu0 %4585  ;;  %v4702_v13 = vsel %vm835_vm6, %v4670_v15, %v4588_v54 }
 0x4c8   : > { %v4701_v40 = vsel %vm835_vm6, %v4669_v24, %v4586_v48 }
 0x4c9   : > { %6085 = vmatprep.mubr.msk.f32.mxu1 %vm1289_vm7, %v4701_v40 }
 0x4ca   : > { %v4464_v51 = vpop.permute.xlu1 %4463  ;;  %6086 = vmatmul.mubr.msk.f32.gmra.mrb[12].mxu1 %vm1289_vm7, %v4702_v13 }
 0x4cb   : > { %v4462_v5 = vpop.permute.xlu0 %4461  ;;  %v4672_v29 = vsel %vm329_vm0, %v8541_v26, %v4464_v51 }
 0x4cc   : > { %v4671_v14 = vsel %vm329_vm0, %v8539_v3, %v4462_v5 }
 0x4ce   : > { %v4592_v16 = vpop.permute.xlu1 %4591 }
 0x4cf   : > { %v4590_v63 = vpop.permute.xlu0 %4589  ;;  %v4704_v58 = vsel %vm835_vm6, %v4672_v29, %v4592_v16  ;;  %v4335_v29 = vld [vmem:[#allocation3 + $0x198] sm:$0xff] }
 0x4d0   : > { %v4703_v33 = vsel %vm835_vm6, %v4671_v14, %v4590_v63  ;;  %v4336_v14 = vld [vmem:[#allocation3 + $0x1a0] sm:$0xff] }
 0x4d1   : > { %6088 = vmatprep.mubr.msk.f32.mxu1 %vm1289_vm7, %v4703_v33 }
 0x4d2   : > { %v4468_v10 = vpop.permute.xlu1 %4467  ;;  %6089 = vmatmul.mubr.msk.f32.gmra.mrb[14].mxu1 %vm1289_vm7, %v4704_v58 }
 0x4d3   : > { %v4466_v42 = vpop.permute.xlu0 %4465  ;;  %v4674_v3 = vsel %vm329_vm0, %v8564_v44, %v4468_v10 }
 0x4d4   : > { %v4673_v39 = vsel %vm329_vm0, %v8562_v2, %v4466_v42 }
 0x4d6   : > { %v4596_v0 = vpop.permute.xlu1 %4595 }
 0x4d7   : > { %v4594_v23 = vpop.permute.xlu0 %4593  ;;  %v4706_v46 = vsel %vm835_vm6, %v4674_v3, %v4596_v0  ;;  %v8999_v0 = vld [vmem:[#allocation12] ss:$0 sm:$0xff] }
 0x4d8   : > { %v4705_v26 = vsel %vm835_vm6, %v4673_v39, %v4594_v23 }
 0x4d9   : > { %6091 = vmatprep.mubr.msk.f32.mxu1 %vm1289_vm7, %v4705_v26 }
 0x4da   : > { %v4472_v1 = vpop.permute.xlu1 %4471  ;;  %6092 = vmatmul.mubr.msk.f32.gmra.mrb[16].mxu1 %vm1289_vm7, %v4706_v46  ;;  %v9276_v46 = vld [vmem:[#allocation18_spill] sm:$0xff] }
 0x4db   : > { %v4470_v59 = vpop.permute.xlu0 %4469  ;;  %v4676_v2 = vsel %vm329_vm0, %v8584_v35, %v4472_v1 }
 0x4dc   : > { %v4675_v56 = vsel %vm329_vm0, %v8582_v34, %v4470_v59  ;;  %v9277_v59 = vld [vmem:[#allocation19_spill] sm:$0xff] }
 0x4de   : > { %v4600_v18 = vpop.permute.xlu1 %4599 }
 0x4df   : > { %v4598_v49 = vpop.permute.xlu0 %4597  ;;  %v4708_v61 = vsel %vm835_vm6, %v4676_v2, %v4600_v18 }
 0x4e0   : > { %v4707_v44 = vsel %vm835_vm6, %v4675_v56, %v4598_v49 }
 0x4e1   : > { %6094 = vmatprep.mubr.msk.f32.mxu1 %vm1289_vm7, %v4707_v44 }
 0x4e2   : > { %v4476_v62 = vpop.permute.xlu1 %4475  ;;  %6095 = vmatmul.mubr.msk.f32.gmra.mrb[18].mxu1 %vm1289_vm7, %v4708_v61 }
 0x4e3   : > { %v4474_v27 = vpop.permute.xlu0 %4473  ;;  %v4678_v34 = vsel %vm329_vm0, %v8604_v9, %v4476_v62 }
 0x4e4   : > { %v4677_v45 = vsel %vm329_vm0, %v8602_v57, %v4474_v27  ;;  %v9278_v27 = vld [vmem:[#allocation21_spill] sm:$0xff] }
 0x4e6   : > { %v4604_v21 = vpop.permute.xlu1 %4603 }
 0x4e7   : > { %v4602_v25 = vpop.permute.xlu0 %4601  ;;  %v4710_v19 = vsel %vm835_vm6, %v4678_v34, %v4604_v21 }
 0x4e8   : > { %v4709_v35 = vsel %vm835_vm6, %v4677_v45, %v4602_v25  ;;  %v9279_v45 = vld [vmem:[#allocation20_spill] sm:$0xff] }
 0x4e9   : > { %6097 = vmatprep.mubr.msk.f32.mxu1 %vm1289_vm7, %v4709_v35 }
 0x4ea   : > { %v4480_v22 = vpop.permute.xlu1 %4479  ;;  %6098 = vmatmul.mubr.msk.f32.gmra.mrb[20].mxu1 %vm1289_vm7, %v4710_v19 }
 0x4eb   : > { %v4478_v12 = vpop.permute.xlu0 %4477  ;;  %v4680_v57 = vsel %vm329_vm0, %v8624_v41, %v4480_v22 }
 0x4ec   : > { %v4679_v28 = vsel %vm329_vm0, %v8622_v20, %v4478_v12 }
 0x4ee   : > { %v4608_v50 = vpop.permute.xlu1 %4607 }
 0x4ef   : > { %v4606_v47 = vpop.permute.xlu0 %4605  ;;  %v4712_v8 = vsel %vm835_vm6, %v4680_v57, %v4608_v50  ;;  %v9281_v57 = vld [vmem:[#allocation22_spill] sm:$0xff] }
 0x4f0   : > { %v4711_v9 = vsel %vm835_vm6, %v4679_v28, %v4606_v47  ;;  %v9280_v28 = vld [vmem:[#allocation23_spill] sm:$0xff] }
 0x4f1   : > { %6100 = vmatprep.mubr.msk.f32.mxu1 %vm1289_vm7, %v4711_v9 }
 0x4f2   : > { %v4484_v30 = vpop.permute.xlu1 %4483  ;;  %6101 = vmatmul.mubr.msk.f32.gmra.mrb[22].mxu1 %vm1289_vm7, %v4712_v8 }
 0x4f3   : > { %v4482_v43 = vpop.permute.xlu0 %4481  ;;  %v4682_v20 = vsel %vm329_vm0, %v8642_v6, %v4484_v30 }
 0x4f4   : > { %v4681_v60 = vsel %vm329_vm0, %v8640_v31, %v4482_v43 }
 0x4f6   : > { %v4612_v53 = vpop.permute.xlu1 %4611 }
 0x4f7   : > { %v4610_v17 = vpop.permute.xlu0 %4609  ;;  %v4714_v52 = vsel %vm835_vm6, %v4682_v20, %v4612_v53  ;;  %v9282_v20 = vld [vmem:[#allocation25_spill] sm:$0xff] }
 0x4f8   : > { %v4713_v41 = vsel %vm835_vm6, %v4681_v60, %v4610_v17 }
 0x4f9   : > { %6103 = vmatprep.mubr.msk.f32.mxu1 %vm1289_vm7, %v4713_v41 }
 0x4fa   : > { %v4488_v11 = vpop.permute.xlu1 %4487  ;;  %6104 = vmatmul.mubr.msk.f32.gmra.mrb[24].mxu1 %vm1289_vm7, %v4714_v52  ;;  %v9283_v52 = vld [vmem:[#allocation24_spill] sm:$0xff] }
 0x4fb   : > { %v4486_v38 = vpop.permute.xlu0 %4485  ;;  %v4684_v31 = vsel %vm329_vm0, %v8658_v4, %v4488_v11 }
 0x4fc   : > { %v4683_v36 = vsel %vm329_vm0, %v8656_v37, %v4486_v38 }
 0x4fe   : > { %v4616_v55 = vpop.permute.xlu1 %4615 }
 0x4ff   : > { %v4614_v54 = vpop.permute.xlu0 %4613  ;;  %v4716_v24 = vsel %vm835_vm6, %v4684_v31, %v4616_v55 }
 0x500   : > { %v4715_v6 = vsel %vm835_vm6, %v4683_v36, %v4614_v54 }
 0x501   : > { %6106 = vmatprep.mubr.msk.f32.mxu1 %vm1289_vm7, %v4715_v6 }
 0x502   : > { %v4492_v48 = vpop.permute.xlu1 %4491  ;;  %6107 = vmatmul.mubr.msk.f32.gmra.mrb[26].mxu1 %vm1289_vm7, %v4716_v24  ;;  %v9284_v24 = vld [vmem:[#allocation27_spill] sm:$0xff] }
 0x503   : > { %v4490_v15 = vpop.permute.xlu0 %4489  ;;  %v4686_v37 = vsel %vm329_vm0, %v8676_v7, %v4492_v48 }
 0x504   : > { %v4685_v13 = vsel %vm329_vm0, %v8672_v32, %v4490_v15  ;;  %v9285_v15 = vld [vmem:[#allocation26_spill] sm:$0xff] }
 0x506   : > { %v4620_v40 = vpop.permute.xlu1 %4619 }
 0x507   : > { %v4618_v51 = vpop.permute.xlu0 %4617  ;;  %v4718_v5 = vsel %vm835_vm6, %v4686_v37, %v4620_v40 }
 0x508   : > { %v4717_v4 = vsel %vm835_vm6, %v4685_v13, %v4618_v51 }
 0x509   : > { %6109 = vmatprep.mubr.msk.f32.mxu1 %vm1289_vm7, %v4717_v4 }
 0x50a   : > { %v4496_v16 = vpop.permute.xlu1 %4495  ;;  %6110 = vmatmul.mubr.msk.f32.gmra.mrb[28].mxu1 %vm1289_vm7, %v4718_v5 }
 0x50b   : > { %v4494_v63 = vpop.permute.xlu0 %4493  ;;  %v4688_v33 = vsel %vm329_vm0, %v4336_v14, %v4496_v16  ;;  %v9286_v14 = vld [vmem:[#allocation29_spill] sm:$0xff] }
 0x50c   : > { %v4687_v32 = vsel %vm329_vm0, %v4335_v29, %v4494_v63  ;;  %v9287_v29 = vld [vmem:[#allocation28_spill] sm:$0xff] }
 0x50e   : > { %v4624_v58 = vpop.permute.xlu1 %4623 }
 0x50f   : > { %v4622_v10 = vpop.permute.xlu0 %4621  ;;  %v4720_v42 = vsel %vm835_vm6, %v4688_v33, %v4624_v58 }
 0x510   : > { %v4719_v7 = vsel %vm835_vm6, %v4687_v32, %v4622_v10 }
 0x511   : > { %6112 = vmatprep.mubr.msk.f32.mxu1 %vm1289_vm7, %v4719_v7 }
 0x512   : > { %6113 = vmatmul.mubr.msk.f32.gmra.mrb[30].mxu1 %vm1289_vm7, %v4720_v42 }
 0x56d   : > { %v6069_v39 = vpop.f32.mrb[0].mxu1 }
 0x56e   : > { %v4889_v23 = vpop.f32.mrb[1].mxu1  ;;  %v5088_v3 = vadd.f32 %v6069_v39, %v8999_v0 }
 0x56f   : > { %v5087_v26 = vadd.f32 %v8999_v0, %v4889_v23  ;;  %v9288_v23 = vld [vmem:[#allocation31_spill] sm:$0xff] }
 0x570   : > { %v5120_v18 = vadd.f32 %v5088_v3, %v9277_v59 }
 0x571   : > { %v5119_v1 = vadd.f32 %v5087_v26, %v9276_v46  ;;  %v9289_v26 = vld [vmem:[#allocation30_spill] sm:$0xff] }
 0x572   : > { %v5152_v44 = vmax.f32 %v5120_v18, 0.0 }
 0x573   : > { %v5151_v56 = vmax.f32 %v5119_v1, 0.0 }
 0x575   : > { %5183 = vxpose.xlu0.b32.start [1/16] (narrow) %v5151_v56, 8  ;;  %v6072_v49 = vpop.f32.mrb[2].mxu1 }
 0x576   : > { %v4899_v2 = vpop.f32.mrb[3].mxu1  ;;  %v5090_v61 = vadd.f32 %v6072_v49, %v8999_v0 }
 0x577   : > { %v5089_v62 = vadd.f32 %v8999_v0, %v4899_v2 }
 0x578   : > { %v5122_v25 = vadd.f32 %v5090_v61, %v9279_v45 }
 0x579   : > { %v5121_v21 = vadd.f32 %v5089_v62, %v9278_v27  ;;  %5184 = vxpose.xlu0.b32.cont [2/16] (narrow) %v5152_v44, 8  ;;  %v9290_v44 = vld [vmem:[#allocation33_spill] sm:$0xff]  ;;  %v9291_v62 = vld [vmem:[#allocation32_spill] sm:$0xff] }
 0x57a   : > { %v5154_v22 = vmax.f32 %v5122_v25, 0.0 }
 0x57b   : > { %v5153_v34 = vmax.f32 %v5121_v21, 0.0 }
 0x57d   : > { %5185 = vxpose.xlu0.b32.cont [3/16] (narrow) %v5153_v34, 8  ;;  %v6075_v35 = vpop.f32.mrb[4].mxu1 }
 0x57e   : > { %v4909_v19 = vpop.f32.mrb[5].mxu1  ;;  %v5092_v12 = vadd.f32 %v6075_v35, %v8999_v0 }
 0x57f   : > { %v5091_v50 = vadd.f32 %v8999_v0, %v4909_v19 }
 0x580   : > { %v5124_v9 = vadd.f32 %v5092_v12, %v9281_v57 }
 0x581   : > { %v5123_v47 = vadd.f32 %v5091_v50, %v9280_v28  ;;  %5186 = vxpose.xlu0.b32.cont [4/16] (narrow) %v5154_v22, 8  ;;  %v9292_v22 = vld [vmem:[#allocation35_spill] sm:$0xff]  ;;  %v9293_v50 = vld [vmem:[#allocation34_spill] sm:$0xff] }
 0x582   : > { %v5156_v53 = vmax.f32 %v5124_v9, 0.0 }
 0x583   : > { %v5155_v8 = vmax.f32 %v5123_v47, 0.0 }
 0x585   : > { %5187 = vxpose.xlu0.b32.cont [5/16] (narrow) %v5155_v8, 8  ;;  %v6078_v30 = vpop.f32.mrb[6].mxu1 }
 0x586   : > { %v4919_v43 = vpop.f32.mrb[7].mxu1  ;;  %v5094_v60 = vadd.f32 %v6078_v30, %v8999_v0 }
 0x587   : > { %v5093_v17 = vadd.f32 %v8999_v0, %v4919_v43 }
 0x588   : > { %v5126_v11 = vadd.f32 %v5094_v60, %v9283_v52 }
 0x589   : > { %v5125_v41 = vadd.f32 %v5093_v17, %v9282_v20  ;;  %5188 = vxpose.xlu0.b32.cont [6/16] (narrow) %v5156_v53, 8  ;;  %v9294_v53 = vld [vmem:[#allocation37_spill] sm:$0xff]  ;;  %v9295_v17 = vld [vmem:[#allocation36_spill] sm:$0xff] }
 0x58a   : > { %v5158_v54 = vmax.f32 %v5126_v11, 0.0 }
 0x58b   : > { %v5157_v38 = vmax.f32 %v5125_v41, 0.0 }
 0x58d   : > { %5189 = vxpose.xlu0.b32.cont [7/16] (narrow) %v5157_v38, 8  ;;  %v6081_v55 = vpop.f32.mrb[8].mxu1 }
 0x58e   : > { %v4929_v36 = vpop.f32.mrb[9].mxu1  ;;  %v5096_v31 = vadd.f32 %v6081_v55, %v8999_v0 }
 0x58f   : > { %v5095_v6 = vadd.f32 %v8999_v0, %v4929_v36 }
 0x590   : > { %v5128_v40 = vadd.f32 %v5096_v31, %v9285_v15 }
 0x591   : > { %v5127_v48 = vadd.f32 %v5095_v6, %v9284_v24  ;;  %5190 = vxpose.xlu0.b32.cont [8/16] (narrow) %v5158_v54, 8  ;;  %v9296_v54 = vld [vmem:[#allocation39_spill] sm:$0xff]  ;;  %v9297_v6 = vld [vmem:[#allocation38_spill] sm:$0xff] }
 0x592   : > { %v5160_v4 = vmax.f32 %v5128_v40, 0.0 }
 0x593   : > { %v5159_v13 = vmax.f32 %v5127_v48, 0.0 }
 0x595   : > { %5191 = vxpose.xlu0.b32.cont [9/16] (narrow) %v5159_v13, 8  ;;  %v6084_v51 = vpop.f32.mrb[10].mxu1 }
 0x596   : > { %v4939_v37 = vpop.f32.mrb[11].mxu1  ;;  %v5098_v5 = vadd.f32 %v6084_v51, %v8999_v0 }
 0x597   : > { %v5097_v16 = vadd.f32 %v8999_v0, %v4939_v37 }
 0x598   : > { %v5130_v33 = vadd.f32 %v5098_v5, %v9287_v29 }
 0x599   : > { %v5129_v63 = vadd.f32 %v5097_v16, %v9286_v14  ;;  %5192 = vxpose.xlu0.b32.cont [10/16] (narrow) %v5160_v4, 8  ;;  %v9298_v4 = vld [vmem:[#allocation41_spill] sm:$0xff]  ;;  %v9299_v16 = vld [vmem:[#allocation40_spill] sm:$0xff] }
 0x59a   : > { %v5162_v7 = vmax.f32 %v5130_v33, 0.0 }
 0x59b   : > { %v5161_v58 = vmax.f32 %v5129_v63, 0.0 }
 0x59d   : > { %5193 = vxpose.xlu0.b32.cont [11/16] (narrow) %v5161_v58, 8  ;;  %v6087_v32 = vpop.f32.mrb[12].mxu1 }
 0x59e   : > { %v4949_v10 = vpop.f32.mrb[13].mxu1  ;;  %v5100_v42 = vadd.f32 %v6087_v32, %v8999_v0 }
 0x59f   : > { %v5099_v39 = vadd.f32 %v8999_v0, %v4949_v10 }
 0x5a0   : > { %v5132_v46 = vadd.f32 %v5100_v42, %v9289_v26 }
 0x5a1   : > { %v5131_v3 = vadd.f32 %v5099_v39, %v9288_v23  ;;  %5194 = vxpose.xlu0.b32.cont [12/16] (narrow) %v5162_v7, 8  ;;  %v9300_v7 = vld [vmem:[#allocation43_spill] sm:$0xff]  ;;  %v9301_v39 = vld [vmem:[#allocation42_spill] sm:$0xff] }
 0x5a2   : > { %v5164_v56 = vmax.f32 %v5132_v46, 0.0 }
 0x5a3   : > { %v5163_v1 = vmax.f32 %v5131_v3, 0.0 }
 0x5a5   : > { %5195 = vxpose.xlu0.b32.cont [13/16] (narrow) %v5163_v1, 8  ;;  %v6090_v59 = vpop.f32.mrb[14].mxu1 }
 0x5a6   : > { %v4959_v18 = vpop.f32.mrb[15].mxu1  ;;  %v5102_v49 = vadd.f32 %v6090_v59, %v8999_v0 }
 0x5a7   : > { %v5101_v2 = vadd.f32 %v8999_v0, %v4959_v18 }
 0x5a8   : > { %v5134_v27 = vadd.f32 %v5102_v49, %v9291_v62 }
 0x5a9   : > { %v5133_v61 = vadd.f32 %v5101_v2, %v9290_v44  ;;  %5196 = vxpose.xlu0.b32.cont [14/16] (narrow) %v5164_v56, 8  ;;  %v9302_v56 = vld [vmem:[#allocation45_spill] sm:$0xff]  ;;  %v9303_v2 = vld [vmem:[#allocation44_spill] sm:$0xff] }
 0x5aa   : > { %v5166_v34 = vmax.f32 %v5134_v27, 0.0 }
 0x5ab   : > { %v5165_v21 = vmax.f32 %v5133_v61, 0.0 }
 0x5ad   : > { %5197 = vxpose.xlu0.b32.cont [15/16] (narrow) %v5165_v21, 8  ;;  %v6093_v45 = vpop.f32.mrb[16].mxu1 }
 0x5ae   : > { %v4969_v25 = vpop.f32.mrb[17].mxu1  ;;  %v5104_v35 = vadd.f32 %v6093_v45, %v8999_v0 }
 0x5af   : > { %v5103_v19 = vadd.f32 %v8999_v0, %v4969_v25 }
 0x5b0   : > { %v5136_v28 = vadd.f32 %v5104_v35, %v9293_v50 }
 0x5b1   : > { %v5135_v12 = vadd.f32 %v5103_v19, %v9292_v22  ;;  %5198 = vxpose.xlu0.b32.end [16/16] (narrow) %v5166_v34, 8  ;;  %v9304_v34 = vld [vmem:[#allocation47_spill] sm:$0xff]  ;;  %v9305_v19 = vld [vmem:[#allocation46_spill] sm:$0xff] }
 0x5b2   : > { %v5168_v8 = vmax.f32 %v5136_v28, 0.0 }
 0x5b3   : > { %v5167_v47 = vmax.f32 %v5135_v12, 0.0 }
 0x5b5   : > { %5215 = vxpose.xlu1.b32.start [1/16] (narrow) %v5167_v47, 8  ;;  %v6096_v57 = vpop.f32.mrb[18].mxu1 }
 0x5b6   : > { %v4979_v9 = vpop.f32.mrb[19].mxu1  ;;  %v5106_v30 = vadd.f32 %v6096_v57, %v8999_v0 }
 0x5b7   : > { %v5105_v43 = vadd.f32 %v8999_v0, %v4979_v9 }
 0x5b8   : > { %v5138_v20 = vadd.f32 %v5106_v30, %v9295_v17 }
 0x5b9   : > { %v5137_v60 = vadd.f32 %v5105_v43, %v9294_v53  ;;  %5216 = vxpose.xlu1.b32.cont [2/16] (narrow) %v5168_v8, 8  ;;  %v9306_v8 = vld [vmem:[#allocation49_spill] sm:$0xff]  ;;  %v9307_v43 = vld [vmem:[#allocation48_spill] sm:$0xff] }
 0x5ba   : > { %v5170_v38 = vmax.f32 %v5138_v20, 0.0 }
 0x5bb   : > { %v5169_v41 = vmax.f32 %v5137_v60, 0.0 }
 0x5bd   : > { %5217 = vxpose.xlu1.b32.cont [3/16] (narrow) %v5169_v41, 8  ;;  %v6099_v52 = vpop.f32.mrb[20].mxu1 }
 0x5be   : > { %v4989_v11 = vpop.f32.mrb[21].mxu1  ;;  %v5108_v55 = vadd.f32 %v6099_v52, %v8999_v0 }
 0x5bf   : > { %v5107_v36 = vadd.f32 %v8999_v0, %v4989_v11 }
 0x5c0   : > { %v5140_v24 = vadd.f32 %v5108_v55, %v9297_v6 }
 0x5c1   : > { %v5139_v31 = vadd.f32 %v5107_v36, %v9296_v54  ;;  %5218 = vxpose.xlu1.b32.cont [4/16] (narrow) %v5170_v38, 8 }
 0x5c2   : > { %v5172_v13 = vmax.f32 %v5140_v24, 0.0 }
 0x5c3   : > { %v5171_v48 = vmax.f32 %v5139_v31, 0.0 }
 0x5c5   : > { %5219 = vxpose.xlu1.b32.cont [5/16] (narrow) %v5171_v48, 8  ;;  %v6102_v15 = vpop.f32.mrb[22].mxu1 }
 0x5c6   : > { %v4999_v40 = vpop.f32.mrb[23].mxu1  ;;  %v5110_v51 = vadd.f32 %v6102_v15, %v8999_v0 }
 0x5c7   : > { %v5109_v37 = vadd.f32 %v8999_v0, %v4999_v40 }
 0x5c8   : > { %v5142_v14 = vadd.f32 %v5110_v51, %v9299_v16 }
 0x5c9   : > { %v5141_v5 = vadd.f32 %v5109_v37, %v9298_v4  ;;  %5220 = vxpose.xlu1.b32.cont [6/16] (narrow) %v5172_v13, 8 }
 0x5ca   : > { %v5174_v58 = vmax.f32 %v5142_v14, 0.0 }
 0x5cb   : > { %v5173_v63 = vmax.f32 %v5141_v5, 0.0 }
 0x5cd   : > { %5221 = vxpose.xlu1.b32.cont [7/16] (narrow) %v5173_v63, 8  ;;  %v6105_v29 = vpop.f32.mrb[24].mxu1 }
 0x5ce   : > { %v5009_v33 = vpop.f32.mrb[25].mxu1  ;;  %v5112_v32 = vadd.f32 %v6105_v29, %v8999_v0 }
 0x5cf   : > { %v5111_v10 = vadd.f32 %v8999_v0, %v5009_v33 }
 0x5d0   : > { %v5144_v23 = vadd.f32 %v5112_v32, %v9301_v39 }
 0x5d1   : > { %v5143_v42 = vadd.f32 %v5111_v10, %v9300_v7  ;;  %5222 = vxpose.xlu1.b32.cont [8/16] (narrow) %v5174_v58, 8 }
 0x5d2   : > { %v5176_v1 = vmax.f32 %v5144_v23, 0.0 }
 0x5d3   : > { %v5175_v3 = vmax.f32 %v5143_v42, 0.0 }
 0x5d5   : > { %5223 = vxpose.xlu1.b32.cont [9/16] (narrow) %v5175_v3, 8  ;;  %v6108_v26 = vpop.f32.mrb[26].mxu1 }
 0x5d6   : > { %v5019_v46 = vpop.f32.mrb[27].mxu1  ;;  %v5114_v59 = vadd.f32 %v6108_v26, %v8999_v0 }
 0x5d7   : > { %v5113_v18 = vadd.f32 %v8999_v0, %v5019_v46 }
 0x5d8   : > { %v5146_v44 = vadd.f32 %v5114_v59, %v9303_v2 }
 0x5d9   : > { %v5145_v49 = vadd.f32 %v5113_v18, %v9302_v56  ;;  %5224 = vxpose.xlu1.b32.cont [10/16] (narrow) %v5176_v1, 8 }
 0x5da   : > { %v5178_v21 = vmax.f32 %v5146_v44, 0.0 }
 0x5db   : > { %v5177_v61 = vmax.f32 %v5145_v49, 0.0 }
 0x5dd   : > { %5225 = vxpose.xlu1.b32.cont [11/16] (narrow) %v5177_v61, 8  ;;  %v6111_v62 = vpop.f32.mrb[28].mxu1 }
 0x5de   : > { %v5029_v27 = vpop.f32.mrb[29].mxu1  ;;  %v5116_v45 = vadd.f32 %v6111_v62, %v8999_v0 }
 0x5df   : > { %v5115_v25 = vadd.f32 %v8999_v0, %v5029_v27 }
 0x5e0   : > { %v5148_v22 = vadd.f32 %v5116_v45, %v9305_v19 }
 0x5e1   : > { %v5147_v35 = vadd.f32 %v5115_v25, %v9304_v34  ;;  %5226 = vxpose.xlu1.b32.cont [12/16] (narrow) %v5178_v21, 8 }
 0x5e2   : > { %v5180_v47 = vmax.f32 %v5148_v22, 0.0 }
 0x5e3   : > { %v5179_v12 = vmax.f32 %v5147_v35, 0.0 }
 0x5e5   : > { %5227 = vxpose.xlu1.b32.cont [13/16] (narrow) %v5179_v12, 8  ;;  %v6114_v50 = vpop.f32.mrb[30].mxu1 }
 0x5e6   : > { %v5039_v28 = vpop.f32.mrb[31].mxu1  ;;  %v5118_v57 = vadd.f32 %v6114_v50, %v8999_v0 }
 0x5e7   : > { %v5117_v9 = vadd.f32 %v8999_v0, %v5039_v28 }
 0x5e8   : > { %v5150_v53 = vadd.f32 %v5118_v57, %v9307_v43 }
 0x5e9   : > { %v5149_v30 = vadd.f32 %v5117_v9, %v9306_v8  ;;  %5228 = vxpose.xlu1.b32.cont [14/16] (narrow) %v5180_v47, 8 }
 0x5ea   : > { %v5182_v17 = vmax.f32 %v5150_v53, 0.0 }
 0x5eb   : > { %v5181_v60 = vmax.f32 %v5149_v30, 0.0 }
 0x5ed   : > { %5229 = vxpose.xlu1.b32.cont [15/16] (narrow) %v5181_v60, 8 }
 0x5f1   : > { %5230 = vxpose.xlu1.b32.end [16/16] (narrow) %v5182_v17, 8 }
 0x5f5   : > { %v5199_v20 = vpop.trf.xlu0 }
 0x635   : > { %v5231_v41 = vpop.trf.xlu1 }
 0x636   : > { %v5249_v52 = vcombine.low %v5199_v20, %v5231_v41 }
 0x638   : > { %5251 = vst [vmem:[%s296_s16] sm:$0xff] %v5249_v52 }
 0x639   : > { %6527 = shalt.err (!%p6524_p13)
}
 0x63a   : > { %s6528_s30 = scalar_lea.hbm %s9070_s11, 128  ;;  %s6532_s24 = scalar_lea.hbm %s9119_s5, 256 }
 0x63b   : > { %p6529_p9 = scmp.ne.s32.totalorder %s9070_s11, %s6528_s30  ;;  %p6533_p6 = scmp.lt.u32.totalorder %s9070_s11, %s9119_s5 }
 0x63c   : > { %p6534_p4 = scmp.lt.u32.totalorder %s6532_s24, %s6528_s30  ;;  %p6536_p3 = scmp.lt.u32.totalorder %s6528_s30, %s9070_s11 }
 0x63d   : > { %p6530_p0 = pnand %p6529_p9, %p6797_p10 }
 0x63e   : > { %p6535_p8 = por %p6534_p4, %p6533_p6 }
 0x63f   : > { %p6531_p11 = pneg %p6530_p0 }
 0x640   : > { %p6537_p5 = por %p6536_p3, %p6535_p8 }
 0x642   : > { %p6538_p7 = pnand %p6537_p5, %p6531_p11 }
 0x644   : > { %6541 = shalt.err (!%p6538_p7)
}
 0x645   : > { %6297 = dma.vmem_to_hbm [thread:$0]  (%p6797_p10), %s9072_s6, 128, %s9070_s11, %s5253_s8  }
 0x646 PF: > { %s5279_s27 = sand.u32 1, %s6576_s18   ;;  %p9308_p12 = scmp.ne.s32.totalorder %s9175_s25, 0 }
 0x647   : > { %p9309_p1 = scmp.ge.s32.totalorder %s6588_s21, 2  ;;  %s5280_s16 = scalar_lea.sflag [#allocation6], %s5279_s27 }
 0x649   : > { %p6317_p2 = pnand %p9309_p1, %p9308_p12 }
 0x64b   : > { %6571 = dma.done.wait (!%p6317_p2), %s5280_s16, 128  }
 0x64c   : > { %6573 = vsyncadd (!%p6317_p2), %s5280_s16, 4294967168  ;;  %p20_p13 = scmp.ge.s32.totalorder %s6787_s14, 4   ;;  %s9310_s18 = smov %s6580_s19 }
 0x64d   : > { %s9311_s19 = smov %s6584_s20  ;;  %s9312_s20 = smov %s6803_s10 }
 0x64e   : > { %s9313_s21 = smov %s6787_s14  ;;  %22 = sbr.rel (!%p20_p13) target bundleno = 7 (0x7), region = 111 }
 0x655   :  { %5285 = vsyncpa [#allocation5], 1 }
 0x656   :  { %5287 = vsyncpa [#allocation5 + $0x1], 1 }
 0x657   :  { %5288 = vsyncpa [#allocation8], 1 }
 0x658   :  { %5289 = vsyncpa [#allocation11], 1 }
 0x659   :  { %5290 = vsyncpa [#allocation6], 1 }
 0x65a   :  { %5292 = vsyncpa [#allocation6 + $0x1], 1 }

</bundles_post_ra>
